<compile_context>
chip_gen: v7x
topology: tpu7x:2x2x1
jax: 0.10.0
libtpu: 0.0.40
codegen_flags: <defaults>
</compile_context>

<pallas_src>
import functools

import jax
import jax.numpy as jnp
from jax import lax
from jax.experimental import pallas as pl
from jax.experimental.pallas import tpu as pltpu


def _round_up(x, m):
    return (x + m - 1) // m * m


def _lstm_kernel(num_layers, seq_len, batch_pad, hidden_pad, unroll, *refs):
    """LSTM stack + final FC.

    refs = [x_flat (T*Bp, D0p),
            (wih (D_l, 4Hp), whh (Hp, 4Hp), b (1, 4Hp)) * num_layers,
            wfc (Hp, Op), bfc (1, Op),
            out (Bp, Op),
            gx (T*Bp, 4Hp), seq_ping (T*Bp, Hp)[, seq_pong (T*Bp, Hp)]]
    """
    T, Bp, Hp = seq_len, batch_pad, hidden_pad

    x_ref = refs[0]
    w_refs = refs[1:1 + 3 * num_layers]
    wfc_ref = refs[1 + 3 * num_layers]
    bfc_ref = refs[2 + 3 * num_layers]
    out_ref = refs[3 + 3 * num_layers]
    gx_ref = refs[4 + 3 * num_layers]
    seq_refs = refs[5 + 3 * num_layers:]

    # Activations feeding the MXU stay in the weight dtype (full-rate bf16 on
    # v6e/v7x); accumulation is f32 via preferred_element_type.
    mxu_dtype = w_refs[0].dtype

    h = jnp.zeros((Bp, Hp), jnp.float32)
    c = jnp.zeros((Bp, Hp), jnp.float32)

    for layer in range(num_layers):
        wih_ref, whh_ref, b_ref = w_refs[3 * layer:3 * layer + 3]
        in_ref = x_ref if layer == 0 else seq_refs[(layer - 1) % len(seq_refs)]
        store_seq = layer < num_layers - 1            # top layer's seq is dead
        out_seq = seq_refs[layer % len(seq_refs)] if store_seq else None

        # Hoisted input projection + bias: one large matmul instead of T tiny
        # matmuls (and bias broadcasts) on the serial recurrence.
        gx_ref[...] = (
            jnp.dot(in_ref[...].astype(mxu_dtype), wih_ref[...],
                    preferred_element_type=jnp.float32)
            + b_ref[...])

        # Fresh zero state per layer (matches the PyTorch h0/c0).
        h = jnp.zeros((Bp, Hp), jnp.float32)
        c = jnp.zeros((Bp, Hp), jnp.float32)

        def step(t, carry, whh_ref=whh_ref, out_seq=out_seq,
                 store_seq=store_seq):
            h, c = carry
            row = pl.multiple_of(t * Bp, 8)           # 8-aligned sublane start
            gates = gx_ref[pl.ds(row, Bp), :] + jnp.dot(
                h.astype(mxu_dtype), whh_ref[...],
                preferred_element_type=jnp.float32)   # (Bp, 4Hp) f32
            # Gate blocks start on 128-lane boundaries -> free static views.
            i_g = jax.nn.sigmoid(gates[:, 0 * Hp:1 * Hp])
            f_g = jax.nn.sigmoid(gates[:, 1 * Hp:2 * Hp])
            g_g = jnp.tanh(gates[:, 2 * Hp:3 * Hp])
            o_g = jax.nn.sigmoid(gates[:, 3 * Hp:4 * Hp])
            c_new = f_g * c + i_g * g_g
            h_new = o_g * jnp.tanh(c_new)
            if store_seq:
                out_seq[pl.ds(row, Bp), :] = h_new.astype(out_seq.dtype)
            return (h_new, c_new)

        # h/c live as loop-carried values (vregs); unrolled for LLO visibility.
        h, c = lax.fori_loop(0, T, step, (h, c), unroll=unroll)

    # fc(out[:, -1, :]) -- final hidden state of the top layer; lane-dense
    # (Bp, Op) store.
    out_ref[...] = (jnp.dot(h.astype(mxu_dtype), wfc_ref[...],
                            preferred_element_type=jnp.float32)
                    + bfc_ref[...])


def _pack_layer(wih, whh, bih, bhh, d_in, d_in_pad, H, Hp, weight_dtype):
    """PyTorch gate-stacked (4H, D)/(4H, H) weights -> lane-padded, transposed.

    Gate k occupies lanes [k*Hp, k*Hp+H) of the 4*Hp output; padding lanes are
    zero-weight / zero-bias, so padded hidden lanes stay exactly zero.
    """
    w_x = jnp.zeros((d_in_pad, 4 * Hp), jnp.float32)
    w_h = jnp.zeros((Hp, 4 * Hp), jnp.float32)
    b = jnp.zeros((1, 4 * Hp), jnp.float32)
    for k in range(4):                                # gate order i, f, g, o
        w_x = w_x.at[:d_in, k * Hp:k * Hp + H].set(wih[k * H:(k + 1) * H, :].T)
        w_h = w_h.at[:H, k * Hp:k * Hp + H].set(whh[k * H:(k + 1) * H, :].T)
        b = b.at[0, k * Hp:k * Hp + H].set(
            bih[k * H:(k + 1) * H] + bhh[k * H:(k + 1) * H])
    # Biases stay f32 (added to the f32 accumulation).
    return w_x.astype(weight_dtype), w_h.astype(weight_dtype), b


def lstm_model_forward(x, params, *, hidden_size, num_layers, output_size,
                       weight_dtype=jnp.float32, unroll=True):
    """Pallas equivalent of LSTMModel.forward. x: (B, T, D) float32."""
    B, T, D = x.shape
    H = hidden_size
    Hp = _round_up(H, 128)              # lane-align each gate block
    Bp = _round_up(B, 8)                # sublane-align batch
    Op = _round_up(output_size, 128)    # lane-dense FC output store
    D0p = _round_up(D, 128)             # lane-dense layer-0 input / matmul K

    # Pad batch + feature dims, go time-major, flatten, cast to the MXU dtype:
    # one fused XLA pass over the (small) input; the kernel then needs no
    # transposes / reshapes / casts on the input at all.
    x_tm = jnp.transpose(x.astype(jnp.float32), (1, 0, 2))        # (T, B, D)
    x_tm = jnp.pad(x_tm, ((0, 0), (0, Bp - B), (0, D0p - D)))     # (T, Bp, D0p)
    x_flat = x_tm.reshape(T * Bp, D0p).astype(weight_dtype)

    kernel_inputs = [x_flat]
    for l, (wih, whh, bih, bhh) in enumerate(params["layers"]):
        d_in = D if l == 0 else H
        d_in_pad = D0p if l == 0 else Hp
        kernel_inputs += list(_pack_layer(wih, whh, bih, bhh,
                                          d_in, d_in_pad, H, Hp, weight_dtype))
    wfc, bfc = params["fc"]
    wfc_p = (jnp.zeros((Hp, Op), jnp.float32)
             .at[:H, :output_size].set(wfc.T).astype(weight_dtype))
    bfc_p = jnp.zeros((1, Op), jnp.float32).at[0, :output_size].set(bfc)
    kernel_inputs += [wfc_p, bfc_p]

    n_seq = min(max(num_layers - 1, 0), 2)     # ping/pong inter-layer buffers
    scratch_shapes = [pltpu.VMEM((T * Bp, 4 * Hp), jnp.float32)]  # hoisted proj
    scratch_shapes += [pltpu.VMEM((T * Bp, Hp), weight_dtype)] * n_seq

    # Size the scoped-VMEM limit to the actual resident set (scoped defaults
    # are 16/32 MiB, well below physical); cap at 64 MiB (v7x-safe).
    resident = sum(int(a.size) * a.dtype.itemsize for a in kernel_inputs)
    resident += Bp * Op * 4                                        # output
    resident += T * Bp * 4 * Hp * 4                                # gx scratch
    resident += n_seq * T * Bp * Hp * jnp.dtype(weight_dtype).itemsize
    vmem_limit = max(32 * 1024 * 1024,
                     min(2 * resident + (4 << 20), 64 * 1024 * 1024))

    kernel = functools.partial(_lstm_kernel, num_layers, T, Bp, Hp, unroll)
    vmem_spec = pl.BlockSpec(memory_space=pltpu.MemorySpace.VMEM)

    out = pl.pallas_call(
        kernel,
        out_shape=jax.ShapeDtypeStruct((Bp, Op), jnp.float32),
        in_specs=[vmem_spec] * len(kernel_inputs),
        out_specs=vmem_spec,
        scratch_shapes=scratch_shapes,
        compiler_params=pltpu.CompilerParams(vmem_limit_bytes=vmem_limit),
    )(*kernel_inputs)
    return out[:B, :output_size]


def lstm_model_reference(x, params, *, hidden_size, num_layers, output_size):
    """Pure-JAX reference mirroring torch.nn.LSTM + Linear semantics."""
    B, T, _ = x.shape
    H = hidden_size
    layer_in = x.astype(jnp.float32)
    for (wih, whh, bih, bhh) in params["layers"]:
        h = jnp.zeros((B, H), jnp.float32)
        c = jnp.zeros((B, H), jnp.float32)
        outs = []
        for t in range(T):
            gates = layer_in[:, t, :] @ wih.T + bih + h @ whh.T + bhh
            i_g = jax.nn.sigmoid(gates[:, 0 * H:1 * H])
            f_g = jax.nn.sigmoid(gates[:, 1 * H:2 * H])
            g_g = jnp.tanh(gates[:, 2 * H:3 * H])
            o_g = jax.nn.sigmoid(gates[:, 3 * H:4 * H])
            c = f_g * c + i_g * g_g
            h = o_g * jnp.tanh(c)
            outs.append(h)
        layer_in = jnp.stack(outs, axis=1)
    wfc, bfc = params["fc"]
    return layer_in[:, -1, :] @ wfc.T + bfc


def init_params(key, input_size, hidden_size, num_layers, output_size):
    """Same shapes / U(-1/sqrt(H), 1/sqrt(H)) init as PyTorch."""
    H = hidden_size
    bound = 1.0 / float(jnp.sqrt(jnp.float32(H)))
    keys = jax.random.split(key, num_layers * 4 + 2)
    idx = 0
    layers = []
    for l in range(num_layers):
        d_in = input_size if l == 0 else hidden_size
        wih = jax.random.uniform(keys[idx], (4 * H, d_in), jnp.float32, -bound, bound); idx += 1
        whh = jax.random.uniform(keys[idx], (4 * H, H), jnp.float32, -bound, bound); idx += 1
        bih = jax.random.uniform(keys[idx], (4 * H,), jnp.float32, -bound, bound); idx += 1
        bhh = jax.random.uniform(keys[idx], (4 * H,), jnp.float32, -bound, bound); idx += 1
        layers.append((wih, whh, bih, bhh))
    wfc = jax.random.uniform(keys[idx], (output_size, H), jnp.float32, -bound, bound); idx += 1
    bfc = jax.random.uniform(keys[idx], (output_size,), jnp.float32, -bound, bound)
    return {"layers": layers, "fc": (wfc, bfc)}


if __name__ == "__main__":
    B, T = 2, 8
    input_size, hidden_size, num_layers, output_size = 4, 32, 2, 3

    key = jax.random.PRNGKey(0)
    k_x, k_p = jax.random.split(key)
    x = jax.random.normal(k_x, (B, T, input_size), jnp.float32)
    params = init_params(k_p, input_size, hidden_size, num_layers, output_size)

    ref = lstm_model_reference(x, params, hidden_size=hidden_size,
                               num_layers=num_layers, output_size=output_size)
    ref = jax.block_until_ready(ref)

    out = lstm_model_forward(x, params, hidden_size=hidden_size,
                             num_layers=num_layers, output_size=output_size)
    out = jax.block_until_ready(out)
    assert out.shape == (B, output_size)
    assert jnp.allclose(out, ref, rtol=1e-5, atol=1e-5), (out, ref)

    # bf16-weight fast path (halves weight + activation VMEM/DMA, full-rate
    # MXU on v6e/v7x; accumulation and gate math stay f32).
    out_bf16 = lstm_model_forward(x, params, hidden_size=hidden_size,
                                  num_layers=num_layers,
                                  output_size=output_size,
                                  weight_dtype=jnp.bfloat16)
    out_bf16 = jax.block_until_ready(out_bf16)
    assert jnp.allclose(out_bf16, ref, rtol=5e-2, atol=5e-2), (out_bf16, ref)

    print("KERNEL_OK")
</pallas_src>

<mosaic_0001>
module attributes {stable_mosaic.version = 11 : i64} {
  func.func @_lstm_kernel(%arg0: memref<64x128xf32, #tpu.memory_space<vmem>>, %arg1: memref<128x512xf32, #tpu.memory_space<vmem>>, %arg2: memref<128x512xf32, #tpu.memory_space<vmem>>, %arg3: memref<1x512xf32, #tpu.memory_space<vmem>>, %arg4: memref<128x512xf32, #tpu.memory_space<vmem>>, %arg5: memref<128x512xf32, #tpu.memory_space<vmem>>, %arg6: memref<1x512xf32, #tpu.memory_space<vmem>>, %arg7: memref<128x128xf32, #tpu.memory_space<vmem>>, %arg8: memref<1x128xf32, #tpu.memory_space<vmem>>, %arg9: memref<8x128xf32, #tpu.memory_space<vmem>>, %arg10: memref<64x512xf32, #tpu.memory_space<vmem>>, %arg11: memref<64x128xf32, #tpu.memory_space<vmem>>) attributes {dimension_semantics = [], scalar_prefetch = 0 : i64, scratch_operands = 2 : i64, tpu.core_type = #tpu.core_type<tc>} {
    %c0 = arith.constant 0 : index
    %c0_0 = arith.constant 0 : index
    %0 = vector.load %arg0[%c0, %c0_0] : memref<64x128xf32, #tpu.memory_space<vmem>>, vector<64x128xf32>
    %c0_1 = arith.constant 0 : index
    %c0_2 = arith.constant 0 : index
    %1 = vector.load %arg1[%c0_1, %c0_2] : memref<128x512xf32, #tpu.memory_space<vmem>>, vector<128x512xf32>
    %cst = arith.constant dense<0.000000e+00> : vector<64x512xf32>
    %2 = tpu.matmul %0, %1, %cst {dimension_numbers = #tpu.dot_dimension_numbers<[1], [0], [0], [1], [0, 0, 1, 1], [], []>} : vector<64x128xf32>, vector<128x512xf32>, vector<64x512xf32> -> vector<64x512xf32>
    %c0_3 = arith.constant 0 : index
    %c0_4 = arith.constant 0 : index
    %3 = vector.load %arg3[%c0_3, %c0_4] : memref<1x512xf32, #tpu.memory_space<vmem>>, vector<1x512xf32>
    %4 = vector.broadcast %3 : vector<1x512xf32> to vector<64x512xf32>
    %5 = arith.addf %2, %4 : vector<64x512xf32>
    %c0_5 = arith.constant 0 : index
    %c0_6 = arith.constant 0 : index
    %6 = vector.load %arg10[%c0_5, %c0_6] : memref<64x512xf32, #tpu.memory_space<vmem>>, vector<64x512xf32>
    tpu.vector_store %arg10[%c0_5, %c0_6], %5 {strides = array<i32>} : memref<64x512xf32, #tpu.memory_space<vmem>>, vector<64x512xf32>,
    %cst_7 = arith.constant 0.000000e+00 : f32
    %7 = vector.broadcast %cst_7 : f32 to vector<8x128xf32>
    %cst_8 = arith.constant 0.000000e+00 : f32
    %8 = vector.broadcast %cst_8 : f32 to vector<8x128xf32>
    %c0_i32 = arith.constant 0 : i32
    %c8_i32 = arith.constant 8 : i32
    %9 = arith.muli %c0_i32, %c8_i32 : i32
    %10 = tpu.assume_multiple %9, 8 : i32
    %11 = arith.index_cast %10 : i32 to index
    %c0_9 = arith.constant 0 : index
    %12 = vector.load %arg10[%11, %c0_9] : memref<64x512xf32, #tpu.memory_space<vmem>>, vector<8x512xf32>
    %c0_10 = arith.constant 0 : index
    %c0_11 = arith.constant 0 : index
    %13 = vector.load %arg2[%c0_10, %c0_11] : memref<128x512xf32, #tpu.memory_space<vmem>>, vector<128x512xf32>
    %cst_12 = arith.constant dense<0.000000e+00> : vector<8x512xf32>
    %14 = tpu.matmul %7, %13, %cst_12 {dimension_numbers = #tpu.dot_dimension_numbers<[1], [0], [0], [1], [0, 0, 1, 1], [], []>} : vector<8x128xf32>, vector<128x512xf32>, vector<8x512xf32> -> vector<8x512xf32>
    %15 = arith.addf %12, %14 : vector<8x512xf32>
    %16 = vector.extract_strided_slice %15 {offsets = [0, 0], sizes = [8, 128], strides = [1, 1]} : vector<8x512xf32> to vector<8x128xf32>
    %17 = arith.negf %16 : vector<8x128xf32>
    %18 = math.exp %17 : vector<8x128xf32>
    %cst_13 = arith.constant 1.000000e+00 : f32
    %19 = vector.broadcast %cst_13 : f32 to vector<8x128xf32>
    %20 = arith.addf %19, %18 : vector<8x128xf32>
    %21 = arith.divf %19, %20 : vector<8x128xf32>
    %22 = vector.extract_strided_slice %15 {offsets = [0, 128], sizes = [8, 128], strides = [1, 1]} : vector<8x512xf32> to vector<8x128xf32>
    %23 = arith.negf %22 : vector<8x128xf32>
    %24 = math.exp %23 : vector<8x128xf32>
    %cst_14 = arith.constant 1.000000e+00 : f32
    %25 = vector.broadcast %cst_14 : f32 to vector<8x128xf32>
    %26 = arith.addf %25, %24 : vector<8x128xf32>
    %27 = arith.divf %25, %26 : vector<8x128xf32>
    %28 = vector.extract_strided_slice %15 {offsets = [0, 256], sizes = [8, 128], strides = [1, 1]} : vector<8x512xf32> to vector<8x128xf32>
    %29 = math.tanh %28 : vector<8x128xf32>
    %30 = vector.extract_strided_slice %15 {offsets = [0, 384], sizes = [8, 128], strides = [1, 1]} : vector<8x512xf32> to vector<8x128xf32>
    %31 = arith.negf %30 : vector<8x128xf32>
    %32 = math.exp %31 : vector<8x128xf32>
    %cst_15 = arith.constant 1.000000e+00 : f32
    %33 = vector.broadcast %cst_15 : f32 to vector<8x128xf32>
    %34 = arith.addf %33, %32 : vector<8x128xf32>
    %35 = arith.divf %33, %34 : vector<8x128xf32>
    %36 = arith.mulf %27, %8 : vector<8x128xf32>
    %37 = arith.mulf %21, %29 : vector<8x128xf32>
    %38 = arith.addf %36, %37 : vector<8x128xf32>
    %39 = math.tanh %38 : vector<8x128xf32>
    %40 = arith.mulf %35, %39 : vector<8x128xf32>
    %41 = arith.index_cast %10 : i32 to index
    %c0_16 = arith.constant 0 : index
    %42 = vector.load %arg11[%41, %c0_16] : memref<64x128xf32, #tpu.memory_space<vmem>>, vector<8x128xf32>
    tpu.vector_store %arg11[%41, %c0_16], %40 {strides = array<i32>} : memref<64x128xf32, #tpu.memory_space<vmem>>, vector<8x128xf32>,
    %c1_i32 = arith.constant 1 : i32
    %c8_i32_17 = arith.constant 8 : i32
    %43 = arith.muli %c1_i32, %c8_i32_17 : i32
    %44 = tpu.assume_multiple %43, 8 : i32
    %45 = arith.index_cast %44 : i32 to index
    %c0_18 = arith.constant 0 : index
    %46 = vector.load %arg10[%45, %c0_18] : memref<64x512xf32, #tpu.memory_space<vmem>>, vector<8x512xf32>
    %c0_19 = arith.constant 0 : index
    %c0_20 = arith.constant 0 : index
    %47 = vector.load %arg2[%c0_19, %c0_20] : memref<128x512xf32, #tpu.memory_space<vmem>>, vector<128x512xf32>
    %cst_21 = arith.constant dense<0.000000e+00> : vector<8x512xf32>
    %48 = tpu.matmul %40, %47, %cst_21 {dimension_numbers = #tpu.dot_dimension_numbers<[1], [0], [0], [1], [0, 0, 1, 1], [], []>} : vector<8x128xf32>, vector<128x512xf32>, vector<8x512xf32> -> vector<8x512xf32>
    %49 = arith.addf %46, %48 : vector<8x512xf32>
    %50 = vector.extract_strided_slice %49 {offsets = [0, 0], sizes = [8, 128], strides = [1, 1]} : vector<8x512xf32> to vector<8x128xf32>
    %51 = arith.negf %50 : vector<8x128xf32>
    %52 = math.exp %51 : vector<8x128xf32>
    %cst_22 = arith.constant 1.000000e+00 : f32
    %53 = vector.broadcast %cst_22 : f32 to vector<8x128xf32>
    %54 = arith.addf %53, %52 : vector<8x128xf32>
    %55 = arith.divf %53, %54 : vector<8x128xf32>
    %56 = vector.extract_strided_slice %49 {offsets = [0, 128], sizes = [8, 128], strides = [1, 1]} : vector<8x512xf32> to vector<8x128xf32>
    %57 = arith.negf %56 : vector<8x128xf32>
    %58 = math.exp %57 : vector<8x128xf32>
    %cst_23 = arith.constant 1.000000e+00 : f32
    %59 = vector.broadcast %cst_23 : f32 to vector<8x128xf32>
    %60 = arith.addf %59, %58 : vector<8x128xf32>
    %61 = arith.divf %59, %60 : vector<8x128xf32>
    %62 = vector.extract_strided_slice %49 {offsets = [0, 256], sizes = [8, 128], strides = [1, 1]} : vector<8x512xf32> to vector<8x128xf32>
    %63 = math.tanh %62 : vector<8x128xf32>
    %64 = vector.extract_strided_slice %49 {offsets = [0, 384], sizes = [8, 128], strides = [1, 1]} : vector<8x512xf32> to vector<8x128xf32>
    %65 = arith.negf %64 : vector<8x128xf32>
    %66 = math.exp %65 : vector<8x128xf32>
    %cst_24 = arith.constant 1.000000e+00 : f32
    %67 = vector.broadcast %cst_24 : f32 to vector<8x128xf32>
    %68 = arith.addf %67, %66 : vector<8x128xf32>
    %69 = arith.divf %67, %68 : vector<8x128xf32>
    %70 = arith.mulf %61, %38 : vector<8x128xf32>
    %71 = arith.mulf %55, %63 : vector<8x128xf32>
    %72 = arith.addf %70, %71 : vector<8x128xf32>
    %73 = math.tanh %72 : vector<8x128xf32>
    %74 = arith.mulf %69, %73 : vector<8x128xf32>
    %75 = arith.index_cast %44 : i32 to index
    %c0_25 = arith.constant 0 : index
    %76 = vector.load %arg11[%75, %c0_25] : memref<64x128xf32, #tpu.memory_space<vmem>>, vector<8x128xf32>
    tpu.vector_store %arg11[%75, %c0_25], %74 {strides = array<i32>} : memref<64x128xf32, #tpu.memory_space<vmem>>, vector<8x128xf32>,
    %c2_i32 = arith.constant 2 : i32
    %c8_i32_26 = arith.constant 8 : i32
    %77 = arith.muli %c2_i32, %c8_i32_26 : i32
    %78 = tpu.assume_multiple %77, 8 : i32
    %79 = arith.index_cast %78 : i32 to index
    %c0_27 = arith.constant 0 : index
    %80 = vector.load %arg10[%79, %c0_27] : memref<64x512xf32, #tpu.memory_space<vmem>>, vector<8x512xf32>
    %c0_28 = arith.constant 0 : index
    %c0_29 = arith.constant 0 : index
    %81 = vector.load %arg2[%c0_28, %c0_29] : memref<128x512xf32, #tpu.memory_space<vmem>>, vector<128x512xf32>
    %cst_30 = arith.constant dense<0.000000e+00> : vector<8x512xf32>
    %82 = tpu.matmul %74, %81, %cst_30 {dimension_numbers = #tpu.dot_dimension_numbers<[1], [0], [0], [1], [0, 0, 1, 1], [], []>} : vector<8x128xf32>, vector<128x512xf32>, vector<8x512xf32> -> vector<8x512xf32>
    %83 = arith.addf %80, %82 : vector<8x512xf32>
    %84 = vector.extract_strided_slice %83 {offsets = [0, 0], sizes = [8, 128], strides = [1, 1]} : vector<8x512xf32> to vector<8x128xf32>
    %85 = arith.negf %84 : vector<8x128xf32>
    %86 = math.exp %85 : vector<8x128xf32>
    %cst_31 = arith.constant 1.000000e+00 : f32
    %87 = vector.broadcast %cst_31 : f32 to vector<8x128xf32>
    %88 = arith.addf %87, %86 : vector<8x128xf32>
    %89 = arith.divf %87, %88 : vector<8x128xf32>
    %90 = vector.extract_strided_slice %83 {offsets = [0, 128], sizes = [8, 128], strides = [1, 1]} : vector<8x512xf32> to vector<8x128xf32>
    %91 = arith.negf %90 : vector<8x128xf32>
    %92 = math.exp %91 : vector<8x128xf32>
    %cst_32 = arith.constant 1.000000e+00 : f32
    %93 = vector.broadcast %cst_32 : f32 to vector<8x128xf32>
    %94 = arith.addf %93, %92 : vector<8x128xf32>
    %95 = arith.divf %93, %94 : vector<8x128xf32>
    %96 = vector.extract_strided_slice %83 {offsets = [0, 256], sizes = [8, 128], strides = [1, 1]} : vector<8x512xf32> to vector<8x128xf32>
    %97 = math.tanh %96 : vector<8x128xf32>
    %98 = vector.extract_strided_slice %83 {offsets = [0, 384], sizes = [8, 128], strides = [1, 1]} : vector<8x512xf32> to vector<8x128xf32>
    %99 = arith.negf %98 : vector<8x128xf32>
    %100 = math.exp %99 : vector<8x128xf32>
    %cst_33 = arith.constant 1.000000e+00 : f32
    %101 = vector.broadcast %cst_33 : f32 to vector<8x128xf32>
    %102 = arith.addf %101, %100 : vector<8x128xf32>
    %103 = arith.divf %101, %102 : vector<8x128xf32>
    %104 = arith.mulf %95, %72 : vector<8x128xf32>
    %105 = arith.mulf %89, %97 : vector<8x128xf32>
    %106 = arith.addf %104, %105 : vector<8x128xf32>
    %107 = math.tanh %106 : vector<8x128xf32>
    %108 = arith.mulf %103, %107 : vector<8x128xf32>
    %109 = arith.index_cast %78 : i32 to index
    %c0_34 = arith.constant 0 : index
    %110 = vector.load %arg11[%109, %c0_34] : memref<64x128xf32, #tpu.memory_space<vmem>>, vector<8x128xf32>
    tpu.vector_store %arg11[%109, %c0_34], %108 {strides = array<i32>} : memref<64x128xf32, #tpu.memory_space<vmem>>, vector<8x128xf32>,
    %c3_i32 = arith.constant 3 : i32
    %c8_i32_35 = arith.constant 8 : i32
    %111 = arith.muli %c3_i32, %c8_i32_35 : i32
    %112 = tpu.assume_multiple %111, 8 : i32
    %113 = arith.index_cast %112 : i32 to index
    %c0_36 = arith.constant 0 : index
    %114 = vector.load %arg10[%113, %c0_36] : memref<64x512xf32, #tpu.memory_space<vmem>>, vector<8x512xf32>
    %c0_37 = arith.constant 0 : index
    %c0_38 = arith.constant 0 : index
    %115 = vector.load %arg2[%c0_37, %c0_38] : memref<128x512xf32, #tpu.memory_space<vmem>>, vector<128x512xf32>
    %cst_39 = arith.constant dense<0.000000e+00> : vector<8x512xf32>
    %116 = tpu.matmul %108, %115, %cst_39 {dimension_numbers = #tpu.dot_dimension_numbers<[1], [0], [0], [1], [0, 0, 1, 1], [], []>} : vector<8x128xf32>, vector<128x512xf32>, vector<8x512xf32> -> vector<8x512xf32>
    %117 = arith.addf %114, %116 : vector<8x512xf32>
    %118 = vector.extract_strided_slice %117 {offsets = [0, 0], sizes = [8, 128], strides = [1, 1]} : vector<8x512xf32> to vector<8x128xf32>
    %119 = arith.negf %118 : vector<8x128xf32>
    %120 = math.exp %119 : vector<8x128xf32>
    %cst_40 = arith.constant 1.000000e+00 : f32
    %121 = vector.broadcast %cst_40 : f32 to vector<8x128xf32>
    %122 = arith.addf %121, %120 : vector<8x128xf32>
    %123 = arith.divf %121, %122 : vector<8x128xf32>
    %124 = vector.extract_strided_slice %117 {offsets = [0, 128], sizes = [8, 128], strides = [1, 1]} : vector<8x512xf32> to vector<8x128xf32>
    %125 = arith.negf %124 : vector<8x128xf32>
    %126 = math.exp %125 : vector<8x128xf32>
    %cst_41 = arith.constant 1.000000e+00 : f32
    %127 = vector.broadcast %cst_41 : f32 to vector<8x128xf32>
    %128 = arith.addf %127, %126 : vector<8x128xf32>
    %129 = arith.divf %127, %128 : vector<8x128xf32>
    %130 = vector.extract_strided_slice %117 {offsets = [0, 256], sizes = [8, 128], strides = [1, 1]} : vector<8x512xf32> to vector<8x128xf32>
    %131 = math.tanh %130 : vector<8x128xf32>
    %132 = vector.extract_strided_slice %117 {offsets = [0, 384], sizes = [8, 128], strides = [1, 1]} : vector<8x512xf32> to vector<8x128xf32>
    %133 = arith.negf %132 : vector<8x128xf32>
    %134 = math.exp %133 : vector<8x128xf32>
    %cst_42 = arith.constant 1.000000e+00 : f32
    %135 = vector.broadcast %cst_42 : f32 to vector<8x128xf32>
    %136 = arith.addf %135, %134 : vector<8x128xf32>
    %137 = arith.divf %135, %136 : vector<8x128xf32>
    %138 = arith.mulf %129, %106 : vector<8x128xf32>
    %139 = arith.mulf %123, %131 : vector<8x128xf32>
    %140 = arith.addf %138, %139 : vector<8x128xf32>
    %141 = math.tanh %140 : vector<8x128xf32>
    %142 = arith.mulf %137, %141 : vector<8x128xf32>
    %143 = arith.index_cast %112 : i32 to index
    %c0_43 = arith.constant 0 : index
    %144 = vector.load %arg11[%143, %c0_43] : memref<64x128xf32, #tpu.memory_space<vmem>>, vector<8x128xf32>
    tpu.vector_store %arg11[%143, %c0_43], %142 {strides = array<i32>} : memref<64x128xf32, #tpu.memory_space<vmem>>, vector<8x128xf32>,
    %c4_i32 = arith.constant 4 : i32
    %c8_i32_44 = arith.constant 8 : i32
    %145 = arith.muli %c4_i32, %c8_i32_44 : i32
    %146 = tpu.assume_multiple %145, 8 : i32
    %147 = arith.index_cast %146 : i32 to index
    %c0_45 = arith.constant 0 : index
    %148 = vector.load %arg10[%147, %c0_45] : memref<64x512xf32, #tpu.memory_space<vmem>>, vector<8x512xf32>
    %c0_46 = arith.constant 0 : index
    %c0_47 = arith.constant 0 : index
    %149 = vector.load %arg2[%c0_46, %c0_47] : memref<128x512xf32, #tpu.memory_space<vmem>>, vector<128x512xf32>
    %cst_48 = arith.constant dense<0.000000e+00> : vector<8x512xf32>
    %150 = tpu.matmul %142, %149, %cst_48 {dimension_numbers = #tpu.dot_dimension_numbers<[1], [0], [0], [1], [0, 0, 1, 1], [], []>} : vector<8x128xf32>, vector<128x512xf32>, vector<8x512xf32> -> vector<8x512xf32>
    %151 = arith.addf %148, %150 : vector<8x512xf32>
    %152 = vector.extract_strided_slice %151 {offsets = [0, 0], sizes = [8, 128], strides = [1, 1]} : vector<8x512xf32> to vector<8x128xf32>
    %153 = arith.negf %152 : vector<8x128xf32>
    %154 = math.exp %153 : vector<8x128xf32>
    %cst_49 = arith.constant 1.000000e+00 : f32
    %155 = vector.broadcast %cst_49 : f32 to vector<8x128xf32>
    %156 = arith.addf %155, %154 : vector<8x128xf32>
    %157 = arith.divf %155, %156 : vector<8x128xf32>
    %158 = vector.extract_strided_slice %151 {offsets = [0, 128], sizes = [8, 128], strides = [1, 1]} : vector<8x512xf32> to vector<8x128xf32>
    %159 = arith.negf %158 : vector<8x128xf32>
    %160 = math.exp %159 : vector<8x128xf32>
    %cst_50 = arith.constant 1.000000e+00 : f32
    %161 = vector.broadcast %cst_50 : f32 to vector<8x128xf32>
    %162 = arith.addf %161, %160 : vector<8x128xf32>
    %163 = arith.divf %161, %162 : vector<8x128xf32>
    %164 = vector.extract_strided_slice %151 {offsets = [0, 256], sizes = [8, 128], strides = [1, 1]} : vector<8x512xf32> to vector<8x128xf32>
    %165 = math.tanh %164 : vector<8x128xf32>
    %166 = vector.extract_strided_slice %151 {offsets = [0, 384], sizes = [8, 128], strides = [1, 1]} : vector<8x512xf32> to vector<8x128xf32>
    %167 = arith.negf %166 : vector<8x128xf32>
    %168 = math.exp %167 : vector<8x128xf32>
    %cst_51 = arith.constant 1.000000e+00 : f32
    %169 = vector.broadcast %cst_51 : f32 to vector<8x128xf32>
    %170 = arith.addf %169, %168 : vector<8x128xf32>
    %171 = arith.divf %169, %170 : vector<8x128xf32>
    %172 = arith.mulf %163, %140 : vector<8x128xf32>
    %173 = arith.mulf %157, %165 : vector<8x128xf32>
    %174 = arith.addf %172, %173 : vector<8x128xf32>
    %175 = math.tanh %174 : vector<8x128xf32>
    %176 = arith.mulf %171, %175 : vector<8x128xf32>
    %177 = arith.index_cast %146 : i32 to index
    %c0_52 = arith.constant 0 : index
    %178 = vector.load %arg11[%177, %c0_52] : memref<64x128xf32, #tpu.memory_space<vmem>>, vector<8x128xf32>
    tpu.vector_store %arg11[%177, %c0_52], %176 {strides = array<i32>} : memref<64x128xf32, #tpu.memory_space<vmem>>, vector<8x128xf32>,
    %c5_i32 = arith.constant 5 : i32
    %c8_i32_53 = arith.constant 8 : i32
    %179 = arith.muli %c5_i32, %c8_i32_53 : i32
    %180 = tpu.assume_multiple %179, 8 : i32
    %181 = arith.index_cast %180 : i32 to index
    %c0_54 = arith.constant 0 : index
    %182 = vector.load %arg10[%181, %c0_54] : memref<64x512xf32, #tpu.memory_space<vmem>>, vector<8x512xf32>
    %c0_55 = arith.constant 0 : index
    %c0_56 = arith.constant 0 : index
    %183 = vector.load %arg2[%c0_55, %c0_56] : memref<128x512xf32, #tpu.memory_space<vmem>>, vector<128x512xf32>
    %cst_57 = arith.constant dense<0.000000e+00> : vector<8x512xf32>
    %184 = tpu.matmul %176, %183, %cst_57 {dimension_numbers = #tpu.dot_dimension_numbers<[1], [0], [0], [1], [0, 0, 1, 1], [], []>} : vector<8x128xf32>, vector<128x512xf32>, vector<8x512xf32> -> vector<8x512xf32>
    %185 = arith.addf %182, %184 : vector<8x512xf32>
    %186 = vector.extract_strided_slice %185 {offsets = [0, 0], sizes = [8, 128], strides = [1, 1]} : vector<8x512xf32> to vector<8x128xf32>
    %187 = arith.negf %186 : vector<8x128xf32>
    %188 = math.exp %187 : vector<8x128xf32>
    %cst_58 = arith.constant 1.000000e+00 : f32
    %189 = vector.broadcast %cst_58 : f32 to vector<8x128xf32>
    %190 = arith.addf %189, %188 : vector<8x128xf32>
    %191 = arith.divf %189, %190 : vector<8x128xf32>
    %192 = vector.extract_strided_slice %185 {offsets = [0, 128], sizes = [8, 128], strides = [1, 1]} : vector<8x512xf32> to vector<8x128xf32>
    %193 = arith.negf %192 : vector<8x128xf32>
    %194 = math.exp %193 : vector<8x128xf32>
    %cst_59 = arith.constant 1.000000e+00 : f32
    %195 = vector.broadcast %cst_59 : f32 to vector<8x128xf32>
    %196 = arith.addf %195, %194 : vector<8x128xf32>
    %197 = arith.divf %195, %196 : vector<8x128xf32>
    %198 = vector.extract_strided_slice %185 {offsets = [0, 256], sizes = [8, 128], strides = [1, 1]} : vector<8x512xf32> to vector<8x128xf32>
    %199 = math.tanh %198 : vector<8x128xf32>
    %200 = vector.extract_strided_slice %185 {offsets = [0, 384], sizes = [8, 128], strides = [1, 1]} : vector<8x512xf32> to vector<8x128xf32>
    %201 = arith.negf %200 : vector<8x128xf32>
    %202 = math.exp %201 : vector<8x128xf32>
    %cst_60 = arith.constant 1.000000e+00 : f32
    %203 = vector.broadcast %cst_60 : f32 to vector<8x128xf32>
    %204 = arith.addf %203, %202 : vector<8x128xf32>
    %205 = arith.divf %203, %204 : vector<8x128xf32>
    %206 = arith.mulf %197, %174 : vector<8x128xf32>
    %207 = arith.mulf %191, %199 : vector<8x128xf32>
    %208 = arith.addf %206, %207 : vector<8x128xf32>
    %209 = math.tanh %208 : vector<8x128xf32>
    %210 = arith.mulf %205, %209 : vector<8x128xf32>
    %211 = arith.index_cast %180 : i32 to index
    %c0_61 = arith.constant 0 : index
    %212 = vector.load %arg11[%211, %c0_61] : memref<64x128xf32, #tpu.memory_space<vmem>>, vector<8x128xf32>
    tpu.vector_store %arg11[%211, %c0_61], %210 {strides = array<i32>} : memref<64x128xf32, #tpu.memory_space<vmem>>, vector<8x128xf32>,
    %c6_i32 = arith.constant 6 : i32
    %c8_i32_62 = arith.constant 8 : i32
    %213 = arith.muli %c6_i32, %c8_i32_62 : i32
    %214 = tpu.assume_multiple %213, 8 : i32
    %215 = arith.index_cast %214 : i32 to index
    %c0_63 = arith.constant 0 : index
    %216 = vector.load %arg10[%215, %c0_63] : memref<64x512xf32, #tpu.memory_space<vmem>>, vector<8x512xf32>
    %c0_64 = arith.constant 0 : index
    %c0_65 = arith.constant 0 : index
    %217 = vector.load %arg2[%c0_64, %c0_65] : memref<128x512xf32, #tpu.memory_space<vmem>>, vector<128x512xf32>
    %cst_66 = arith.constant dense<0.000000e+00> : vector<8x512xf32>
    %218 = tpu.matmul %210, %217, %cst_66 {dimension_numbers = #tpu.dot_dimension_numbers<[1], [0], [0], [1], [0, 0, 1, 1], [], []>} : vector<8x128xf32>, vector<128x512xf32>, vector<8x512xf32> -> vector<8x512xf32>
    %219 = arith.addf %216, %218 : vector<8x512xf32>
    %220 = vector.extract_strided_slice %219 {offsets = [0, 0], sizes = [8, 128], strides = [1, 1]} : vector<8x512xf32> to vector<8x128xf32>
    %221 = arith.negf %220 : vector<8x128xf32>
    %222 = math.exp %221 : vector<8x128xf32>
    %cst_67 = arith.constant 1.000000e+00 : f32
    %223 = vector.broadcast %cst_67 : f32 to vector<8x128xf32>
    %224 = arith.addf %223, %222 : vector<8x128xf32>
    %225 = arith.divf %223, %224 : vector<8x128xf32>
    %226 = vector.extract_strided_slice %219 {offsets = [0, 128], sizes = [8, 128], strides = [1, 1]} : vector<8x512xf32> to vector<8x128xf32>
    %227 = arith.negf %226 : vector<8x128xf32>
    %228 = math.exp %227 : vector<8x128xf32>
    %cst_68 = arith.constant 1.000000e+00 : f32
    %229 = vector.broadcast %cst_68 : f32 to vector<8x128xf32>
    %230 = arith.addf %229, %228 : vector<8x128xf32>
    %231 = arith.divf %229, %230 : vector<8x128xf32>
    %232 = vector.extract_strided_slice %219 {offsets = [0, 256], sizes = [8, 128], strides = [1, 1]} : vector<8x512xf32> to vector<8x128xf32>
    %233 = math.tanh %232 : vector<8x128xf32>
    %234 = vector.extract_strided_slice %219 {offsets = [0, 384], sizes = [8, 128], strides = [1, 1]} : vector<8x512xf32> to vector<8x128xf32>
    %235 = arith.negf %234 : vector<8x128xf32>
    %236 = math.exp %235 : vector<8x128xf32>
    %cst_69 = arith.constant 1.000000e+00 : f32
    %237 = vector.broadcast %cst_69 : f32 to vector<8x128xf32>
    %238 = arith.addf %237, %236 : vector<8x128xf32>
    %239 = arith.divf %237, %238 : vector<8x128xf32>
    %240 = arith.mulf %231, %208 : vector<8x128xf32>
    %241 = arith.mulf %225, %233 : vector<8x128xf32>
    %242 = arith.addf %240, %241 : vector<8x128xf32>
    %243 = math.tanh %242 : vector<8x128xf32>
    %244 = arith.mulf %239, %243 : vector<8x128xf32>
    %245 = arith.index_cast %214 : i32 to index
    %c0_70 = arith.constant 0 : index
    %246 = vector.load %arg11[%245, %c0_70] : memref<64x128xf32, #tpu.memory_space<vmem>>, vector<8x128xf32>
    tpu.vector_store %arg11[%245, %c0_70], %244 {strides = array<i32>} : memref<64x128xf32, #tpu.memory_space<vmem>>, vector<8x128xf32>,
    %c7_i32 = arith.constant 7 : i32
    %c8_i32_71 = arith.constant 8 : i32
    %247 = arith.muli %c7_i32, %c8_i32_71 : i32
    %248 = tpu.assume_multiple %247, 8 : i32
    %249 = arith.index_cast %248 : i32 to index
    %c0_72 = arith.constant 0 : index
    %250 = vector.load %arg10[%249, %c0_72] : memref<64x512xf32, #tpu.memory_space<vmem>>, vector<8x512xf32>
    %c0_73 = arith.constant 0 : index
    %c0_74 = arith.constant 0 : index
    %251 = vector.load %arg2[%c0_73, %c0_74] : memref<128x512xf32, #tpu.memory_space<vmem>>, vector<128x512xf32>
    %cst_75 = arith.constant dense<0.000000e+00> : vector<8x512xf32>
    %252 = tpu.matmul %244, %251, %cst_75 {dimension_numbers = #tpu.dot_dimension_numbers<[1], [0], [0], [1], [0, 0, 1, 1], [], []>} : vector<8x128xf32>, vector<128x512xf32>, vector<8x512xf32> -> vector<8x512xf32>
    %253 = arith.addf %250, %252 : vector<8x512xf32>
    %254 = vector.extract_strided_slice %253 {offsets = [0, 0], sizes = [8, 128], strides = [1, 1]} : vector<8x512xf32> to vector<8x128xf32>
    %255 = arith.negf %254 : vector<8x128xf32>
    %256 = math.exp %255 : vector<8x128xf32>
    %cst_76 = arith.constant 1.000000e+00 : f32
    %257 = vector.broadcast %cst_76 : f32 to vector<8x128xf32>
    %258 = arith.addf %257, %256 : vector<8x128xf32>
    %259 = arith.divf %257, %258 : vector<8x128xf32>
    %260 = vector.extract_strided_slice %253 {offsets = [0, 128], sizes = [8, 128], strides = [1, 1]} : vector<8x512xf32> to vector<8x128xf32>
    %261 = arith.negf %260 : vector<8x128xf32>
    %262 = math.exp %261 : vector<8x128xf32>
    %cst_77 = arith.constant 1.000000e+00 : f32
    %263 = vector.broadcast %cst_77 : f32 to vector<8x128xf32>
    %264 = arith.addf %263, %262 : vector<8x128xf32>
    %265 = arith.divf %263, %264 : vector<8x128xf32>
    %266 = vector.extract_strided_slice %253 {offsets = [0, 256], sizes = [8, 128], strides = [1, 1]} : vector<8x512xf32> to vector<8x128xf32>
    %267 = math.tanh %266 : vector<8x128xf32>
    %268 = vector.extract_strided_slice %253 {offsets = [0, 384], sizes = [8, 128], strides = [1, 1]} : vector<8x512xf32> to vector<8x128xf32>
    %269 = arith.negf %268 : vector<8x128xf32>
    %270 = math.exp %269 : vector<8x128xf32>
    %cst_78 = arith.constant 1.000000e+00 : f32
    %271 = vector.broadcast %cst_78 : f32 to vector<8x128xf32>
    %272 = arith.addf %271, %270 : vector<8x128xf32>
    %273 = arith.divf %271, %272 : vector<8x128xf32>
    %274 = arith.mulf %265, %242 : vector<8x128xf32>
    %275 = arith.mulf %259, %267 : vector<8x128xf32>
    %276 = arith.addf %274, %275 : vector<8x128xf32>
    %277 = math.tanh %276 : vector<8x128xf32>
    %278 = arith.mulf %273, %277 : vector<8x128xf32>
    %279 = arith.index_cast %248 : i32 to index
    %c0_79 = arith.constant 0 : index
    %280 = vector.load %arg11[%279, %c0_79] : memref<64x128xf32, #tpu.memory_space<vmem>>, vector<8x128xf32>
    tpu.vector_store %arg11[%279, %c0_79], %278 {strides = array<i32>} : memref<64x128xf32, #tpu.memory_space<vmem>>, vector<8x128xf32>,
    %c8_i32_80 = arith.constant 8 : i32
    %c0_81 = arith.constant 0 : index
    %c0_82 = arith.constant 0 : index
    %281 = vector.load %arg11[%c0_81, %c0_82] : memref<64x128xf32, #tpu.memory_space<vmem>>, vector<64x128xf32>
    %c0_83 = arith.constant 0 : index
    %c0_84 = arith.constant 0 : index
    %282 = vector.load %arg4[%c0_83, %c0_84] : memref<128x512xf32, #tpu.memory_space<vmem>>, vector<128x512xf32>
    %cst_85 = arith.constant dense<0.000000e+00> : vector<64x512xf32>
    %283 = tpu.matmul %281, %282, %cst_85 {dimension_numbers = #tpu.dot_dimension_numbers<[1], [0], [0], [1], [0, 0, 1, 1], [], []>} : vector<64x128xf32>, vector<128x512xf32>, vector<64x512xf32> -> vector<64x512xf32>
    %c0_86 = arith.constant 0 : index
    %c0_87 = arith.constant 0 : index
    %284 = vector.load %arg6[%c0_86, %c0_87] : memref<1x512xf32, #tpu.memory_space<vmem>>, vector<1x512xf32>
    %285 = vector.broadcast %284 : vector<1x512xf32> to vector<64x512xf32>
    %286 = arith.addf %283, %285 : vector<64x512xf32>
    %c0_88 = arith.constant 0 : index
    %c0_89 = arith.constant 0 : index
    %287 = vector.load %arg10[%c0_88, %c0_89] : memref<64x512xf32, #tpu.memory_space<vmem>>, vector<64x512xf32>
    tpu.vector_store %arg10[%c0_88, %c0_89], %286 {strides = array<i32>} : memref<64x512xf32, #tpu.memory_space<vmem>>, vector<64x512xf32>,
    %cst_90 = arith.constant 0.000000e+00 : f32
    %288 = vector.broadcast %cst_90 : f32 to vector<8x128xf32>
    %cst_91 = arith.constant 0.000000e+00 : f32
    %289 = vector.broadcast %cst_91 : f32 to vector<8x128xf32>
    %c0_i32_92 = arith.constant 0 : i32
    %c8_i32_93 = arith.constant 8 : i32
    %290 = arith.muli %c0_i32_92, %c8_i32_93 : i32
    %291 = tpu.assume_multiple %290, 8 : i32
    %292 = arith.index_cast %291 : i32 to index
    %c0_94 = arith.constant 0 : index
    %293 = vector.load %arg10[%292, %c0_94] : memref<64x512xf32, #tpu.memory_space<vmem>>, vector<8x512xf32>
    %c0_95 = arith.constant 0 : index
    %c0_96 = arith.constant 0 : index
    %294 = vector.load %arg5[%c0_95, %c0_96] : memref<128x512xf32, #tpu.memory_space<vmem>>, vector<128x512xf32>
    %cst_97 = arith.constant dense<0.000000e+00> : vector<8x512xf32>
    %295 = tpu.matmul %288, %294, %cst_97 {dimension_numbers = #tpu.dot_dimension_numbers<[1], [0], [0], [1], [0, 0, 1, 1], [], []>} : vector<8x128xf32>, vector<128x512xf32>, vector<8x512xf32> -> vector<8x512xf32>
    %296 = arith.addf %293, %295 : vector<8x512xf32>
    %297 = vector.extract_strided_slice %296 {offsets = [0, 0], sizes = [8, 128], strides = [1, 1]} : vector<8x512xf32> to vector<8x128xf32>
    %298 = arith.negf %297 : vector<8x128xf32>
    %299 = math.exp %298 : vector<8x128xf32>
    %cst_98 = arith.constant 1.000000e+00 : f32
    %300 = vector.broadcast %cst_98 : f32 to vector<8x128xf32>
    %301 = arith.addf %300, %299 : vector<8x128xf32>
    %302 = arith.divf %300, %301 : vector<8x128xf32>
    %303 = vector.extract_strided_slice %296 {offsets = [0, 128], sizes = [8, 128], strides = [1, 1]} : vector<8x512xf32> to vector<8x128xf32>
    %304 = arith.negf %303 : vector<8x128xf32>
    %305 = math.exp %304 : vector<8x128xf32>
    %cst_99 = arith.constant 1.000000e+00 : f32
    %306 = vector.broadcast %cst_99 : f32 to vector<8x128xf32>
    %307 = arith.addf %306, %305 : vector<8x128xf32>
    %308 = arith.divf %306, %307 : vector<8x128xf32>
    %309 = vector.extract_strided_slice %296 {offsets = [0, 256], sizes = [8, 128], strides = [1, 1]} : vector<8x512xf32> to vector<8x128xf32>
    %310 = math.tanh %309 : vector<8x128xf32>
    %311 = vector.extract_strided_slice %296 {offsets = [0, 384], sizes = [8, 128], strides = [1, 1]} : vector<8x512xf32> to vector<8x128xf32>
    %312 = arith.negf %311 : vector<8x128xf32>
    %313 = math.exp %312 : vector<8x128xf32>
    %cst_100 = arith.constant 1.000000e+00 : f32
    %314 = vector.broadcast %cst_100 : f32 to vector<8x128xf32>
    %315 = arith.addf %314, %313 : vector<8x128xf32>
    %316 = arith.divf %314, %315 : vector<8x128xf32>
    %317 = arith.mulf %308, %289 : vector<8x128xf32>
    %318 = arith.mulf %302, %310 : vector<8x128xf32>
    %319 = arith.addf %317, %318 : vector<8x128xf32>
    %320 = math.tanh %319 : vector<8x128xf32>
    %321 = arith.mulf %316, %320 : vector<8x128xf32>
    %c1_i32_101 = arith.constant 1 : i32
    %c8_i32_102 = arith.constant 8 : i32
    %322 = arith.muli %c1_i32_101, %c8_i32_102 : i32
    %323 = tpu.assume_multiple %322, 8 : i32
    %324 = arith.index_cast %323 : i32 to index
    %c0_103 = arith.constant 0 : index
    %325 = vector.load %arg10[%324, %c0_103] : memref<64x512xf32, #tpu.memory_space<vmem>>, vector<8x512xf32>
    %c0_104 = arith.constant 0 : index
    %c0_105 = arith.constant 0 : index
    %326 = vector.load %arg5[%c0_104, %c0_105] : memref<128x512xf32, #tpu.memory_space<vmem>>, vector<128x512xf32>
    %cst_106 = arith.constant dense<0.000000e+00> : vector<8x512xf32>
    %327 = tpu.matmul %321, %326, %cst_106 {dimension_numbers = #tpu.dot_dimension_numbers<[1], [0], [0], [1], [0, 0, 1, 1], [], []>} : vector<8x128xf32>, vector<128x512xf32>, vector<8x512xf32> -> vector<8x512xf32>
    %328 = arith.addf %325, %327 : vector<8x512xf32>
    %329 = vector.extract_strided_slice %328 {offsets = [0, 0], sizes = [8, 128], strides = [1, 1]} : vector<8x512xf32> to vector<8x128xf32>
    %330 = arith.negf %329 : vector<8x128xf32>
    %331 = math.exp %330 : vector<8x128xf32>
    %cst_107 = arith.constant 1.000000e+00 : f32
    %332 = vector.broadcast %cst_107 : f32 to vector<8x128xf32>
    %333 = arith.addf %332, %331 : vector<8x128xf32>
    %334 = arith.divf %332, %333 : vector<8x128xf32>
    %335 = vector.extract_strided_slice %328 {offsets = [0, 128], sizes = [8, 128], strides = [1, 1]} : vector<8x512xf32> to vector<8x128xf32>
    %336 = arith.negf %335 : vector<8x128xf32>
    %337 = math.exp %336 : vector<8x128xf32>
    %cst_108 = arith.constant 1.000000e+00 : f32
    %338 = vector.broadcast %cst_108 : f32 to vector<8x128xf32>
    %339 = arith.addf %338, %337 : vector<8x128xf32>
    %340 = arith.divf %338, %339 : vector<8x128xf32>
    %341 = vector.extract_strided_slice %328 {offsets = [0, 256], sizes = [8, 128], strides = [1, 1]} : vector<8x512xf32> to vector<8x128xf32>
    %342 = math.tanh %341 : vector<8x128xf32>
    %343 = vector.extract_strided_slice %328 {offsets = [0, 384], sizes = [8, 128], strides = [1, 1]} : vector<8x512xf32> to vector<8x128xf32>
    %344 = arith.negf %343 : vector<8x128xf32>
    %345 = math.exp %344 : vector<8x128xf32>
    %cst_109 = arith.constant 1.000000e+00 : f32
    %346 = vector.broadcast %cst_109 : f32 to vector<8x128xf32>
    %347 = arith.addf %346, %345 : vector<8x128xf32>
    %348 = arith.divf %346, %347 : vector<8x128xf32>
    %349 = arith.mulf %340, %319 : vector<8x128xf32>
    %350 = arith.mulf %334, %342 : vector<8x128xf32>
    %351 = arith.addf %349, %350 : vector<8x128xf32>
    %352 = math.tanh %351 : vector<8x128xf32>
    %353 = arith.mulf %348, %352 : vector<8x128xf32>
    %c2_i32_110 = arith.constant 2 : i32
    %c8_i32_111 = arith.constant 8 : i32
    %354 = arith.muli %c2_i32_110, %c8_i32_111 : i32
    %355 = tpu.assume_multiple %354, 8 : i32
    %356 = arith.index_cast %355 : i32 to index
    %c0_112 = arith.constant 0 : index
    %357 = vector.load %arg10[%356, %c0_112] : memref<64x512xf32, #tpu.memory_space<vmem>>, vector<8x512xf32>
    %c0_113 = arith.constant 0 : index
    %c0_114 = arith.constant 0 : index
    %358 = vector.load %arg5[%c0_113, %c0_114] : memref<128x512xf32, #tpu.memory_space<vmem>>, vector<128x512xf32>
    %cst_115 = arith.constant dense<0.000000e+00> : vector<8x512xf32>
    %359 = tpu.matmul %353, %358, %cst_115 {dimension_numbers = #tpu.dot_dimension_numbers<[1], [0], [0], [1], [0, 0, 1, 1], [], []>} : vector<8x128xf32>, vector<128x512xf32>, vector<8x512xf32> -> vector<8x512xf32>
    %360 = arith.addf %357, %359 : vector<8x512xf32>
    %361 = vector.extract_strided_slice %360 {offsets = [0, 0], sizes = [8, 128], strides = [1, 1]} : vector<8x512xf32> to vector<8x128xf32>
    %362 = arith.negf %361 : vector<8x128xf32>
    %363 = math.exp %362 : vector<8x128xf32>
    %cst_116 = arith.constant 1.000000e+00 : f32
    %364 = vector.broadcast %cst_116 : f32 to vector<8x128xf32>
    %365 = arith.addf %364, %363 : vector<8x128xf32>
    %366 = arith.divf %364, %365 : vector<8x128xf32>
    %367 = vector.extract_strided_slice %360 {offsets = [0, 128], sizes = [8, 128], strides = [1, 1]} : vector<8x512xf32> to vector<8x128xf32>
    %368 = arith.negf %367 : vector<8x128xf32>
    %369 = math.exp %368 : vector<8x128xf32>
    %cst_117 = arith.constant 1.000000e+00 : f32
    %370 = vector.broadcast %cst_117 : f32 to vector<8x128xf32>
    %371 = arith.addf %370, %369 : vector<8x128xf32>
    %372 = arith.divf %370, %371 : vector<8x128xf32>
    %373 = vector.extract_strided_slice %360 {offsets = [0, 256], sizes = [8, 128], strides = [1, 1]} : vector<8x512xf32> to vector<8x128xf32>
    %374 = math.tanh %373 : vector<8x128xf32>
    %375 = vector.extract_strided_slice %360 {offsets = [0, 384], sizes = [8, 128], strides = [1, 1]} : vector<8x512xf32> to vector<8x128xf32>
    %376 = arith.negf %375 : vector<8x128xf32>
    %377 = math.exp %376 : vector<8x128xf32>
    %cst_118 = arith.constant 1.000000e+00 : f32
    %378 = vector.broadcast %cst_118 : f32 to vector<8x128xf32>
    %379 = arith.addf %378, %377 : vector<8x128xf32>
    %380 = arith.divf %378, %379 : vector<8x128xf32>
    %381 = arith.mulf %372, %351 : vector<8x128xf32>
    %382 = arith.mulf %366, %374 : vector<8x128xf32>
    %383 = arith.addf %381, %382 : vector<8x128xf32>
    %384 = math.tanh %383 : vector<8x128xf32>
    %385 = arith.mulf %380, %384 : vector<8x128xf32>
    %c3_i32_119 = arith.constant 3 : i32
    %c8_i32_120 = arith.constant 8 : i32
    %386 = arith.muli %c3_i32_119, %c8_i32_120 : i32
    %387 = tpu.assume_multiple %386, 8 : i32
    %388 = arith.index_cast %387 : i32 to index
    %c0_121 = arith.constant 0 : index
    %389 = vector.load %arg10[%388, %c0_121] : memref<64x512xf32, #tpu.memory_space<vmem>>, vector<8x512xf32>
    %c0_122 = arith.constant 0 : index
    %c0_123 = arith.constant 0 : index
    %390 = vector.load %arg5[%c0_122, %c0_123] : memref<128x512xf32, #tpu.memory_space<vmem>>, vector<128x512xf32>
    %cst_124 = arith.constant dense<0.000000e+00> : vector<8x512xf32>
    %391 = tpu.matmul %385, %390, %cst_124 {dimension_numbers = #tpu.dot_dimension_numbers<[1], [0], [0], [1], [0, 0, 1, 1], [], []>} : vector<8x128xf32>, vector<128x512xf32>, vector<8x512xf32> -> vector<8x512xf32>
    %392 = arith.addf %389, %391 : vector<8x512xf32>
    %393 = vector.extract_strided_slice %392 {offsets = [0, 0], sizes = [8, 128], strides = [1, 1]} : vector<8x512xf32> to vector<8x128xf32>
    %394 = arith.negf %393 : vector<8x128xf32>
    %395 = math.exp %394 : vector<8x128xf32>
    %cst_125 = arith.constant 1.000000e+00 : f32
    %396 = vector.broadcast %cst_125 : f32 to vector<8x128xf32>
    %397 = arith.addf %396, %395 : vector<8x128xf32>
    %398 = arith.divf %396, %397 : vector<8x128xf32>
    %399 = vector.extract_strided_slice %392 {offsets = [0, 128], sizes = [8, 128], strides = [1, 1]} : vector<8x512xf32> to vector<8x128xf32>
    %400 = arith.negf %399 : vector<8x128xf32>
    %401 = math.exp %400 : vector<8x128xf32>
    %cst_126 = arith.constant 1.000000e+00 : f32
    %402 = vector.broadcast %cst_126 : f32 to vector<8x128xf32>
    %403 = arith.addf %402, %401 : vector<8x128xf32>
    %404 = arith.divf %402, %403 : vector<8x128xf32>
    %405 = vector.extract_strided_slice %392 {offsets = [0, 256], sizes = [8, 128], strides = [1, 1]} : vector<8x512xf32> to vector<8x128xf32>
    %406 = math.tanh %405 : vector<8x128xf32>
    %407 = vector.extract_strided_slice %392 {offsets = [0, 384], sizes = [8, 128], strides = [1, 1]} : vector<8x512xf32> to vector<8x128xf32>
    %408 = arith.negf %407 : vector<8x128xf32>
    %409 = math.exp %408 : vector<8x128xf32>
    %cst_127 = arith.constant 1.000000e+00 : f32
    %410 = vector.broadcast %cst_127 : f32 to vector<8x128xf32>
    %411 = arith.addf %410, %409 : vector<8x128xf32>
    %412 = arith.divf %410, %411 : vector<8x128xf32>
    %413 = arith.mulf %404, %383 : vector<8x128xf32>
    %414 = arith.mulf %398, %406 : vector<8x128xf32>
    %415 = arith.addf %413, %414 : vector<8x128xf32>
    %416 = math.tanh %415 : vector<8x128xf32>
    %417 = arith.mulf %412, %416 : vector<8x128xf32>
    %c4_i32_128 = arith.constant 4 : i32
    %c8_i32_129 = arith.constant 8 : i32
    %418 = arith.muli %c4_i32_128, %c8_i32_129 : i32
    %419 = tpu.assume_multiple %418, 8 : i32
    %420 = arith.index_cast %419 : i32 to index
    %c0_130 = arith.constant 0 : index
    %421 = vector.load %arg10[%420, %c0_130] : memref<64x512xf32, #tpu.memory_space<vmem>>, vector<8x512xf32>
    %c0_131 = arith.constant 0 : index
    %c0_132 = arith.constant 0 : index
    %422 = vector.load %arg5[%c0_131, %c0_132] : memref<128x512xf32, #tpu.memory_space<vmem>>, vector<128x512xf32>
    %cst_133 = arith.constant dense<0.000000e+00> : vector<8x512xf32>
    %423 = tpu.matmul %417, %422, %cst_133 {dimension_numbers = #tpu.dot_dimension_numbers<[1], [0], [0], [1], [0, 0, 1, 1], [], []>} : vector<8x128xf32>, vector<128x512xf32>, vector<8x512xf32> -> vector<8x512xf32>
    %424 = arith.addf %421, %423 : vector<8x512xf32>
    %425 = vector.extract_strided_slice %424 {offsets = [0, 0], sizes = [8, 128], strides = [1, 1]} : vector<8x512xf32> to vector<8x128xf32>
    %426 = arith.negf %425 : vector<8x128xf32>
    %427 = math.exp %426 : vector<8x128xf32>
    %cst_134 = arith.constant 1.000000e+00 : f32
    %428 = vector.broadcast %cst_134 : f32 to vector<8x128xf32>
    %429 = arith.addf %428, %427 : vector<8x128xf32>
    %430 = arith.divf %428, %429 : vector<8x128xf32>
    %431 = vector.extract_strided_slice %424 {offsets = [0, 128], sizes = [8, 128], strides = [1, 1]} : vector<8x512xf32> to vector<8x128xf32>
    %432 = arith.negf %431 : vector<8x128xf32>
    %433 = math.exp %432 : vector<8x128xf32>
    %cst_135 = arith.constant 1.000000e+00 : f32
    %434 = vector.broadcast %cst_135 : f32 to vector<8x128xf32>
    %435 = arith.addf %434, %433 : vector<8x128xf32>
    %436 = arith.divf %434, %435 : vector<8x128xf32>
    %437 = vector.extract_strided_slice %424 {offsets = [0, 256], sizes = [8, 128], strides = [1, 1]} : vector<8x512xf32> to vector<8x128xf32>
    %438 = math.tanh %437 : vector<8x128xf32>
    %439 = vector.extract_strided_slice %424 {offsets = [0, 384], sizes = [8, 128], strides = [1, 1]} : vector<8x512xf32> to vector<8x128xf32>
    %440 = arith.negf %439 : vector<8x128xf32>
    %441 = math.exp %440 : vector<8x128xf32>
    %cst_136 = arith.constant 1.000000e+00 : f32
    %442 = vector.broadcast %cst_136 : f32 to vector<8x128xf32>
    %443 = arith.addf %442, %441 : vector<8x128xf32>
    %444 = arith.divf %442, %443 : vector<8x128xf32>
    %445 = arith.mulf %436, %415 : vector<8x128xf32>
    %446 = arith.mulf %430, %438 : vector<8x128xf32>
    %447 = arith.addf %445, %446 : vector<8x128xf32>
    %448 = math.tanh %447 : vector<8x128xf32>
    %449 = arith.mulf %444, %448 : vector<8x128xf32>
    %c5_i32_137 = arith.constant 5 : i32
    %c8_i32_138 = arith.constant 8 : i32
    %450 = arith.muli %c5_i32_137, %c8_i32_138 : i32
    %451 = tpu.assume_multiple %450, 8 : i32
    %452 = arith.index_cast %451 : i32 to index
    %c0_139 = arith.constant 0 : index
    %453 = vector.load %arg10[%452, %c0_139] : memref<64x512xf32, #tpu.memory_space<vmem>>, vector<8x512xf32>
    %c0_140 = arith.constant 0 : index
    %c0_141 = arith.constant 0 : index
    %454 = vector.load %arg5[%c0_140, %c0_141] : memref<128x512xf32, #tpu.memory_space<vmem>>, vector<128x512xf32>
    %cst_142 = arith.constant dense<0.000000e+00> : vector<8x512xf32>
    %455 = tpu.matmul %449, %454, %cst_142 {dimension_numbers = #tpu.dot_dimension_numbers<[1], [0], [0], [1], [0, 0, 1, 1], [], []>} : vector<8x128xf32>, vector<128x512xf32>, vector<8x512xf32> -> vector<8x512xf32>
    %456 = arith.addf %453, %455 : vector<8x512xf32>
    %457 = vector.extract_strided_slice %456 {offsets = [0, 0], sizes = [8, 128], strides = [1, 1]} : vector<8x512xf32> to vector<8x128xf32>
    %458 = arith.negf %457 : vector<8x128xf32>
    %459 = math.exp %458 : vector<8x128xf32>
    %cst_143 = arith.constant 1.000000e+00 : f32
    %460 = vector.broadcast %cst_143 : f32 to vector<8x128xf32>
    %461 = arith.addf %460, %459 : vector<8x128xf32>
    %462 = arith.divf %460, %461 : vector<8x128xf32>
    %463 = vector.extract_strided_slice %456 {offsets = [0, 128], sizes = [8, 128], strides = [1, 1]} : vector<8x512xf32> to vector<8x128xf32>
    %464 = arith.negf %463 : vector<8x128xf32>
    %465 = math.exp %464 : vector<8x128xf32>
    %cst_144 = arith.constant 1.000000e+00 : f32
    %466 = vector.broadcast %cst_144 : f32 to vector<8x128xf32>
    %467 = arith.addf %466, %465 : vector<8x128xf32>
    %468 = arith.divf %466, %467 : vector<8x128xf32>
    %469 = vector.extract_strided_slice %456 {offsets = [0, 256], sizes = [8, 128], strides = [1, 1]} : vector<8x512xf32> to vector<8x128xf32>
    %470 = math.tanh %469 : vector<8x128xf32>
    %471 = vector.extract_strided_slice %456 {offsets = [0, 384], sizes = [8, 128], strides = [1, 1]} : vector<8x512xf32> to vector<8x128xf32>
    %472 = arith.negf %471 : vector<8x128xf32>
    %473 = math.exp %472 : vector<8x128xf32>
    %cst_145 = arith.constant 1.000000e+00 : f32
    %474 = vector.broadcast %cst_145 : f32 to vector<8x128xf32>
    %475 = arith.addf %474, %473 : vector<8x128xf32>
    %476 = arith.divf %474, %475 : vector<8x128xf32>
    %477 = arith.mulf %468, %447 : vector<8x128xf32>
    %478 = arith.mulf %462, %470 : vector<8x128xf32>
    %479 = arith.addf %477, %478 : vector<8x128xf32>
    %480 = math.tanh %479 : vector<8x128xf32>
    %481 = arith.mulf %476, %480 : vector<8x128xf32>
    %c6_i32_146 = arith.constant 6 : i32
    %c8_i32_147 = arith.constant 8 : i32
    %482 = arith.muli %c6_i32_146, %c8_i32_147 : i32
    %483 = tpu.assume_multiple %482, 8 : i32
    %484 = arith.index_cast %483 : i32 to index
    %c0_148 = arith.constant 0 : index
    %485 = vector.load %arg10[%484, %c0_148] : memref<64x512xf32, #tpu.memory_space<vmem>>, vector<8x512xf32>
    %c0_149 = arith.constant 0 : index
    %c0_150 = arith.constant 0 : index
    %486 = vector.load %arg5[%c0_149, %c0_150] : memref<128x512xf32, #tpu.memory_space<vmem>>, vector<128x512xf32>
    %cst_151 = arith.constant dense<0.000000e+00> : vector<8x512xf32>
    %487 = tpu.matmul %481, %486, %cst_151 {dimension_numbers = #tpu.dot_dimension_numbers<[1], [0], [0], [1], [0, 0, 1, 1], [], []>} : vector<8x128xf32>, vector<128x512xf32>, vector<8x512xf32> -> vector<8x512xf32>
    %488 = arith.addf %485, %487 : vector<8x512xf32>
    %489 = vector.extract_strided_slice %488 {offsets = [0, 0], sizes = [8, 128], strides = [1, 1]} : vector<8x512xf32> to vector<8x128xf32>
    %490 = arith.negf %489 : vector<8x128xf32>
    %491 = math.exp %490 : vector<8x128xf32>
    %cst_152 = arith.constant 1.000000e+00 : f32
    %492 = vector.broadcast %cst_152 : f32 to vector<8x128xf32>
    %493 = arith.addf %492, %491 : vector<8x128xf32>
    %494 = arith.divf %492, %493 : vector<8x128xf32>
    %495 = vector.extract_strided_slice %488 {offsets = [0, 128], sizes = [8, 128], strides = [1, 1]} : vector<8x512xf32> to vector<8x128xf32>
    %496 = arith.negf %495 : vector<8x128xf32>
    %497 = math.exp %496 : vector<8x128xf32>
    %cst_153 = arith.constant 1.000000e+00 : f32
    %498 = vector.broadcast %cst_153 : f32 to vector<8x128xf32>
    %499 = arith.addf %498, %497 : vector<8x128xf32>
    %500 = arith.divf %498, %499 : vector<8x128xf32>
    %501 = vector.extract_strided_slice %488 {offsets = [0, 256], sizes = [8, 128], strides = [1, 1]} : vector<8x512xf32> to vector<8x128xf32>
    %502 = math.tanh %501 : vector<8x128xf32>
    %503 = vector.extract_strided_slice %488 {offsets = [0, 384], sizes = [8, 128], strides = [1, 1]} : vector<8x512xf32> to vector<8x128xf32>
    %504 = arith.negf %503 : vector<8x128xf32>
    %505 = math.exp %504 : vector<8x128xf32>
    %cst_154 = arith.constant 1.000000e+00 : f32
    %506 = vector.broadcast %cst_154 : f32 to vector<8x128xf32>
    %507 = arith.addf %506, %505 : vector<8x128xf32>
    %508 = arith.divf %506, %507 : vector<8x128xf32>
    %509 = arith.mulf %500, %479 : vector<8x128xf32>
    %510 = arith.mulf %494, %502 : vector<8x128xf32>
    %511 = arith.addf %509, %510 : vector<8x128xf32>
    %512 = math.tanh %511 : vector<8x128xf32>
    %513 = arith.mulf %508, %512 : vector<8x128xf32>
    %c7_i32_155 = arith.constant 7 : i32
    %c8_i32_156 = arith.constant 8 : i32
    %514 = arith.muli %c7_i32_155, %c8_i32_156 : i32
    %515 = tpu.assume_multiple %514, 8 : i32
    %516 = arith.index_cast %515 : i32 to index
    %c0_157 = arith.constant 0 : index
    %517 = vector.load %arg10[%516, %c0_157] : memref<64x512xf32, #tpu.memory_space<vmem>>, vector<8x512xf32>
    %c0_158 = arith.constant 0 : index
    %c0_159 = arith.constant 0 : index
    %518 = vector.load %arg5[%c0_158, %c0_159] : memref<128x512xf32, #tpu.memory_space<vmem>>, vector<128x512xf32>
    %cst_160 = arith.constant dense<0.000000e+00> : vector<8x512xf32>
    %519 = tpu.matmul %513, %518, %cst_160 {dimension_numbers = #tpu.dot_dimension_numbers<[1], [0], [0], [1], [0, 0, 1, 1], [], []>} : vector<8x128xf32>, vector<128x512xf32>, vector<8x512xf32> -> vector<8x512xf32>
    %520 = arith.addf %517, %519 : vector<8x512xf32>
    %521 = vector.extract_strided_slice %520 {offsets = [0, 0], sizes = [8, 128], strides = [1, 1]} : vector<8x512xf32> to vector<8x128xf32>
    %522 = arith.negf %521 : vector<8x128xf32>
    %523 = math.exp %522 : vector<8x128xf32>
    %cst_161 = arith.constant 1.000000e+00 : f32
    %524 = vector.broadcast %cst_161 : f32 to vector<8x128xf32>
    %525 = arith.addf %524, %523 : vector<8x128xf32>
    %526 = arith.divf %524, %525 : vector<8x128xf32>
    %527 = vector.extract_strided_slice %520 {offsets = [0, 128], sizes = [8, 128], strides = [1, 1]} : vector<8x512xf32> to vector<8x128xf32>
    %528 = arith.negf %527 : vector<8x128xf32>
    %529 = math.exp %528 : vector<8x128xf32>
    %cst_162 = arith.constant 1.000000e+00 : f32
    %530 = vector.broadcast %cst_162 : f32 to vector<8x128xf32>
    %531 = arith.addf %530, %529 : vector<8x128xf32>
    %532 = arith.divf %530, %531 : vector<8x128xf32>
    %533 = vector.extract_strided_slice %520 {offsets = [0, 256], sizes = [8, 128], strides = [1, 1]} : vector<8x512xf32> to vector<8x128xf32>
    %534 = math.tanh %533 : vector<8x128xf32>
    %535 = vector.extract_strided_slice %520 {offsets = [0, 384], sizes = [8, 128], strides = [1, 1]} : vector<8x512xf32> to vector<8x128xf32>
    %536 = arith.negf %535 : vector<8x128xf32>
    %537 = math.exp %536 : vector<8x128xf32>
    %cst_163 = arith.constant 1.000000e+00 : f32
    %538 = vector.broadcast %cst_163 : f32 to vector<8x128xf32>
    %539 = arith.addf %538, %537 : vector<8x128xf32>
    %540 = arith.divf %538, %539 : vector<8x128xf32>
    %541 = arith.mulf %532, %511 : vector<8x128xf32>
    %542 = arith.mulf %526, %534 : vector<8x128xf32>
    %543 = arith.addf %541, %542 : vector<8x128xf32>
    %544 = math.tanh %543 : vector<8x128xf32>
    %545 = arith.mulf %540, %544 : vector<8x128xf32>
    %c8_i32_164 = arith.constant 8 : i32
    %c0_165 = arith.constant 0 : index
    %c0_166 = arith.constant 0 : index
    %546 = vector.load %arg7[%c0_165, %c0_166] : memref<128x128xf32, #tpu.memory_space<vmem>>, vector<128x128xf32>
    %cst_167 = arith.constant dense<0.000000e+00> : vector<8x128xf32>
    %547 = tpu.matmul %545, %546, %cst_167 {dimension_numbers = #tpu.dot_dimension_numbers<[1], [0], [0], [1], [0, 0, 1, 1], [], []>} : vector<8x128xf32>, vector<128x128xf32>, vector<8x128xf32> -> vector<8x128xf32>
    %c0_168 = arith.constant 0 : index
    %c0_169 = arith.constant 0 : index
    %548 = vector.load %arg8[%c0_168, %c0_169] : memref<1x128xf32, #tpu.memory_space<vmem>>, vector<1x128xf32>
    %549 = vector.broadcast %548 : vector<1x128xf32> to vector<8x128xf32>
    %550 = arith.addf %547, %549 : vector<8x128xf32>
    %c0_170 = arith.constant 0 : index
    %c0_171 = arith.constant 0 : index
    %551 = vector.load %arg9[%c0_170, %c0_171] : memref<8x128xf32, #tpu.memory_space<vmem>>, vector<8x128xf32>
    tpu.vector_store %arg9[%c0_170, %c0_171], %550 {strides = array<i32>} : memref<8x128xf32, #tpu.memory_space<vmem>>, vector<8x128xf32>,
    return
  }
}

</mosaic_0001>

<bundles_post_ra>
// kernel: tpu_custom_call.1
= control target key start
LH: loop header
LB: loop body
LE: loop exit
PB: predicated region body
PF: predicated region fallthrough
CT: control target
= control target key end

     0   :  { %14 = vsyncpa [#allocation5], 0  ;;  %s7316_s0 = inlined_call_operand.hbm [shape: f32[64,128], index: 0, kind: input, shape index: {}]   ;;  %s7317_s1 = inlined_call_operand.hbm [shape: f32[128,512], index: 1, kind: input, shape index: {}]   ;;  %s7318_s2 = inlined_call_operand.hbm [shape: f32[128,512], index: 2, kind: input, shape index: {}]   ;;  %s7319_s3 = inlined_call_operand.vmem [shape: f32[1,512], index: 3, kind: input, shape index: {}]   ;;  %s7320_s4 = inlined_call_operand.hbm [shape: f32[128,512], index: 4, kind: input, shape index: {}]   ;;  %s7321_s5 = inlined_call_operand.hbm [shape: f32[128,512], index: 5, kind: input, shape index: {}]   ;;  %s7322_s6 = inlined_call_operand.vmem [shape: f32[1,512], index: 6, kind: input, shape index: {}]   ;;  %s7323_s7 = inlined_call_operand.hbm [shape: f32[128,128], index: 7, kind: input, shape index: {}]   ;;  %s7324_s8 = inlined_call_operand.vmem [shape: f32[1,128], index: 8, kind: input, shape index: {}]   ;;  %s7325_s9 = inlined_call_operand.hbm [shape: f32[8,128], index: 9, kind: output, shape index: {}]  }
   0x1   :  { %15 = vsyncpa [#allocation8], 0 }
   0x2   :  { %16 = vsyncpa [#allocation11], 0 }
   0x3   :  { %17 = vsyncpa [#allocation14], 0 }
   0x4   :  { %18 = vsyncpa [#allocation6], 0  ;;  %s6176_s30 = smov [#allocation7]   ;;  %s6012_s13 = scalar_lea.hbm %s7317_s1, 8192 }
   0x5   :  { %s36_s10 = sshll.u32 %s6176_s30, 4  ;;  %p6013_p0 = scmp.ne.s32.totalorder %s7317_s1, %s6012_s13  ;;  %s37_s10 = int_to_ptr.vmem [resolvable:$true] %s36_s10 }
   0x6   :  { %p6016_p1 = scmp.lt.u32.totalorder %s6012_s13, %s7317_s1 }
   0x8   :  { %p6018_p2 = pnand %p6016_p1, %p6013_p0 }
   0xa   :  { %6021 = shalt.err (!%p6018_p2)
}
   0xb   :  { %s6022_s18 = scalar_lea.vmem %s37_s10, 8192  ;;  %p6027_p4 = scmp.lt.s32.totalorder %s37_s10, %s37_s10 }
   0xc   :  { %p6023_p3 = scmp.ne.s32.totalorder %s37_s10, %s6022_s18  ;;  %p6028_p5 = scmp.lt.s32.totalorder %s6022_s18, %s6022_s18 }
   0xe   :  { %p6029_p6 = por %p6028_p5, %p6027_p4 }
  0x10   :  { %p6030_p7 = pnand %p6029_p6, %p6023_p3 }
  0x12   :  { %6033 = shalt.err (!%p6030_p7)
}
  0x13   :  { %s6177_s19 = smov 512   ;;  %s6178_s20 = smov 32  }
  0x14   :  { %42 = dma.hbm_to_vmem [thread:$0]  %s7317_s1, 8192, %s37_s10, [#allocation8], %s6177_s19, %s6177_s19, %s6178_s20  }
  0x15   :  { %s6179_s23 = smov [#allocation10]   ;;  %s6180_s25 = smov [#allocation4]  }
  0x16   :  { %s62_s24 = sshll.u32 %s6179_s23, 4  ;;  %s24_s26 = sshll.u32 %s6180_s25, 4  ;;  %s63_s24 = int_to_ptr.vmem [resolvable:$true] %s62_s24  ;;  %s25_s26 = int_to_ptr.vmem [resolvable:$true] %s24_s26 }
  0x17   :  { %s6034_s29 = scalar_lea.hbm %s7320_s4, 8192 }
  0x18   :  { %p6035_p8 = scmp.ne.s32.totalorder %s7320_s4, %s6034_s29  ;;  %p6038_p9 = scmp.lt.u32.totalorder %s6034_s29, %s7320_s4 }
  0x1a   :  { %p6040_p10 = pnand %p6038_p9, %p6035_p8 }
  0x1c   :  { %6043 = shalt.err (!%p6040_p10)
}
  0x1d   :  { %s6044_s1 = scalar_lea.vmem %s63_s24, 8192  ;;  %p6049_p12 = scmp.lt.s32.totalorder %s63_s24, %s63_s24 }
  0x1e   :  { %p6045_p11 = scmp.ne.s32.totalorder %s63_s24, %s6044_s1  ;;  %p6050_p13 = scmp.lt.s32.totalorder %s6044_s1, %s6044_s1 }
  0x20   :  { %p6051_p0 = por %p6050_p13, %p6049_p12 }
  0x22   :  { %p6052_p1 = pnand %p6051_p0, %p6045_p11 }
  0x24   :  { %6055 = shalt.err (!%p6052_p1)
}
  0x25   :  { %68 = dma.hbm_to_vmem [thread:$0]  %s7320_s4, 8192, %s63_s24, [#allocation11], %s6177_s19, %s6177_s19, %s6178_s20  }
  0x26   :  { %s6056_s17 = scalar_lea.hbm %s7316_s0, 1024 }
  0x27   :  { %p6057_p2 = scmp.ne.s32.totalorder %s7316_s0, %s6056_s17  ;;  %p6060_p3 = scmp.lt.u32.totalorder %s6056_s17, %s7316_s0 }
  0x29   :  { %p6062_p4 = pnand %p6060_p3, %p6057_p2 }
  0x2b   :  { %6065 = shalt.err (!%p6062_p4)
}
  0x2c   :  { %s6066_s25 = scalar_lea.vmem %s25_s26, 1024  ;;  %p6071_p6 = scmp.lt.s32.totalorder %s25_s26, %s25_s26 }
  0x2d   :  { %p6067_p5 = scmp.ne.s32.totalorder %s25_s26, %s6066_s25  ;;  %p6072_p7 = scmp.lt.s32.totalorder %s6066_s25, %s6066_s25 }
  0x2f   :  { %p6073_p8 = por %p6072_p7, %p6071_p6 }
  0x31   :  { %p6074_p9 = pnand %p6073_p8, %p6067_p5 }
  0x33   :  { %6077 = shalt.err (!%p6074_p9)
}
  0x34   :  { %s6181_s4 = smov 128   ;;  %s6182_s24 = smov 8  }
  0x35   :  { %30 = dma.hbm_to_vmem [thread:$0]  %s7316_s0, 1024, %s25_s26, [#allocation5], %s6181_s4, %s6181_s4, %s6182_s24  }
  0x36   :  { %s6183_s29 = smov [#allocation9]   ;;  %s6184_s11 = smov [#allocation12]  }
  0x37   :  { %s48_s30 = sshll.u32 %s6183_s29, 4  ;;  %s74_s12 = sshll.u32 %s6184_s11, 4  ;;  %s49_s30 = int_to_ptr.vmem [resolvable:$true] %s48_s30  ;;  %s75_s12 = int_to_ptr.vmem [resolvable:$true] %s74_s12 }
  0x38   :  { %s6078_s10 = scalar_lea.hbm %s7318_s2, 8192 }
  0x39   :  { %p6079_p10 = scmp.ne.s32.totalorder %s7318_s2, %s6078_s10  ;;  %p6082_p11 = scmp.lt.u32.totalorder %s6078_s10, %s7318_s2 }
  0x3b   :  { %p6084_p12 = pnand %p6082_p11, %p6079_p10 }
  0x3d   :  { %6087 = shalt.err (!%p6084_p12)
}
  0x3e   :  { %s6088_s0 = scalar_lea.vmem %s49_s30, 8192  ;;  %p6093_p0 = scmp.lt.s32.totalorder %s49_s30, %s49_s30 }
  0x3f   :  { %p6089_p13 = scmp.ne.s32.totalorder %s49_s30, %s6088_s0  ;;  %p6094_p1 = scmp.lt.s32.totalorder %s6088_s0, %s6088_s0 }
  0x41   :  { %p6095_p2 = por %p6094_p1, %p6093_p0 }
  0x43   :  { %p6096_p3 = pnand %p6095_p2, %p6089_p13 }
  0x45   :  { %6099 = shalt.err (!%p6096_p3)
}
  0x46   :  { %54 = dma.hbm_to_vmem [thread:$0]  %s7318_s2, 8192, %s49_s30, [#allocation8], %s6177_s19, %s6177_s19, %s6178_s20  }
  0x47   :  { %s6100_s23 = scalar_lea.hbm %s7321_s5, 8192 }
  0x48   :  { %p6101_p4 = scmp.ne.s32.totalorder %s7321_s5, %s6100_s23  ;;  %p6104_p5 = scmp.lt.u32.totalorder %s6100_s23, %s7321_s5 }
  0x4a   :  { %p6106_p6 = pnand %p6104_p5, %p6101_p4 }
  0x4c   :  { %6109 = shalt.err (!%p6106_p6)
}
  0x4d   :  { %s6110_s11 = scalar_lea.vmem %s75_s12, 8192  ;;  %p6115_p8 = scmp.lt.s32.totalorder %s75_s12, %s75_s12 }
  0x4e   :  { %p6111_p7 = scmp.ne.s32.totalorder %s75_s12, %s6110_s11  ;;  %p6116_p9 = scmp.lt.s32.totalorder %s6110_s11, %s6110_s11 }
  0x50   :  { %p6117_p10 = por %p6116_p9, %p6115_p8 }
  0x52   :  { %p6118_p11 = pnand %p6117_p10, %p6111_p7 }
  0x54   :  { %6121 = shalt.err (!%p6118_p11)
}
  0x55   :  { %80 = dma.hbm_to_vmem [thread:$0]  %s7321_s5, 8192, %s75_s12, [#allocation11], %s6177_s19, %s6177_s19, %s6178_s20  }
  0x56   :  { %s6185_s13 = smov [#allocation13]   ;;  %s6122_s15 = scalar_lea.hbm %s7323_s7, 2048 }
  0x57   :  { %s88_s1 = sshll.u32 %s6185_s13, 4  ;;  %p6123_p12 = scmp.ne.s32.totalorder %s7323_s7, %s6122_s15  ;;  %s89_s1 = int_to_ptr.vmem [resolvable:$true] %s88_s1 }
  0x58   :  { %p6126_p13 = scmp.lt.u32.totalorder %s6122_s15, %s7323_s7 }
  0x5a   :  { %p6128_p0 = pnand %p6126_p13, %p6123_p12 }
  0x5c   :  { %6131 = shalt.err (!%p6128_p0)
}
  0x5d   :  { %s6132_s18 = scalar_lea.vmem %s89_s1, 2048  ;;  %p6137_p2 = scmp.lt.s32.totalorder %s89_s1, %s89_s1 }
  0x5e   :  { %p6133_p1 = scmp.ne.s32.totalorder %s89_s1, %s6132_s18  ;;  %p6138_p3 = scmp.lt.s32.totalorder %s6132_s18, %s6132_s18 }
  0x60   :  { %p6139_p4 = por %p6138_p3, %p6137_p2 }
  0x62   :  { %p6140_p5 = pnand %p6139_p4, %p6133_p1 }
  0x64   :  { %6143 = shalt.err (!%p6140_p5)
}
  0x65   :  { %94 = dma.hbm_to_vmem [thread:$0]  %s7323_s7, 2048, %s89_s1, [#allocation14], %s6181_s4, %s6181_s4, %s6182_s24  }
  0x66   :  { %6166 = dma.done.wait [#allocation5], 1024  }
  0x67   :  { %6167 = vsyncadd [#allocation5], 4294966272 }
  0x68   :  { %6168 = dma.done.wait [#allocation8], 16384  }
  0x69   :  { %6169 = vsyncadd [#allocation8], 4294950912 }
  0x6a   :  { %6170 = dma.done.wait [#allocation11], 16384  }
  0x6b   :  { %6171 = vsyncadd [#allocation11], 4294950912 }
  0x6c   :  { %6172 = dma.done.wait [#allocation14], 2048  }
  0x6d   :  { %6173 = vsyncadd [#allocation14], 4294965248  ;;  %v6186_v0 = vmov 0.0   ;;  %v124_v1 = vld [vmem:[#allocation7 + $0x8] sm:$0xff]  ;;  %v126_v3 = vld [vmem:[#allocation7 + $0x18] sm:$0xff]  ;;  %vm6188_vm0 = vmmov 0  }
  0x6e   :  { %273 = vmatprep.mubr.f32.mxu0 %v6186_v0  ;;  %386 = vmatprep.mubr.f32.mxu1 %v6186_v0  ;;  %v128_v2 = vld [vmem:[#allocation7 + $0x28] sm:$0xff]  ;;  %v130_v5 = vld [vmem:[#allocation7 + $0x38] sm:$0xff]  ;;  %v123_v6 = vld [vmem:[#allocation7] sm:$0xff]  ;;  %s6189_s12 = smov [#allocation15]  }
  0x6f   :  { %v4438_v4 = vpack.c.bf16 %v128_v2, %v124_v1  ;;  %v127_v7 = vld [vmem:[#allocation7 + $0x20] sm:$0xff]  ;;  %v4470_v8 = vpack.c.bf16 %v130_v5, %v126_v3  ;;  %v125_v10 = vld [vmem:[#allocation7 + $0x10] sm:$0xff]  ;;  %v132_v12 = vld [vmem:[#allocation7 + $0x48] sm:$0xff]  ;;  %s4318_s21 = sshll.u32 %s6189_s12, 4  ;;  %s4319_s21 = int_to_ptr.vmem [resolvable:$true] %s4318_s21 }
  0x70   :  { %v4440_v9 = vpack.c.bf16 %v127_v7, %v123_v6  ;;  %v129_v11 = vld [vmem:[#allocation7 + $0x30] sm:$0xff]  ;;  %v136_v14 = vld [vmem:[#allocation7 + $0x68] sm:$0xff]  ;;  %v134_v15 = vld [vmem:[#allocation7 + $0x58] sm:$0xff]  ;;  %s6144_s22 = scalar_lea.vmem %s4319_s21, 128  ;;  %p6149_p7 = scmp.lt.s32.totalorder %s4319_s21, %s4319_s21 }
  0x71   :  { %4439 = vmatprep.subr.bf16.mxu0 %v4438_v4  ;;  %v4472_v13 = vpack.c.bf16 %v129_v11, %v125_v10  ;;  %v138_v16 = vld [vmem:[#allocation7 + $0x78] sm:$0xff]  ;;  %4471 = vmatprep.subr.bf16.mxu1 %v4470_v8  ;;  %v4442_v17 = vpack.c.bf16 %v136_v14, %v132_v12  ;;  %v131_v19 = vld [vmem:[#allocation7 + $0x40] sm:$0xff]  ;;  %v133_v21 = vld [vmem:[#allocation7 + $0x50] sm:$0xff]  ;;  %p6145_p6 = scmp.ne.s32.totalorder %s4319_s21, %s6144_s22  ;;  %p6150_p8 = scmp.lt.s32.totalorder %s6144_s22, %s6144_s22 }
  0x72   :  { %4441 = vmatpush1.bf16.msra.mxu0 %v4440_v9  ;;  %v4474_v18 = vpack.c.bf16 %v138_v16, %v134_v15  ;;  %v135_v20 = vld [vmem:[#allocation7 + $0x60] sm:$0xff]  ;;  %v137_v23 = vld [vmem:[#allocation7 + $0x70] sm:$0xff]  ;;  %v140_v24 = vld [vmem:[#allocation7 + $0x88] sm:$0xff] }
  0x73   :  { %4473 = vmatpush1.bf16.msra.mxu1 %v4472_v13  ;;  %v4444_v22 = vpack.c.bf16 %v135_v20, %v131_v19  ;;  %v144_v25 = vld [vmem:[#allocation7 + $0xa8] sm:$0xff]  ;;  %4443 = vmatprep.subr.bf16.mxu0 %v4442_v17  ;;  %v4476_v26 = vpack.c.bf16 %v137_v23, %v133_v21  ;;  %v142_v28 = vld [vmem:[#allocation7 + $0x98] sm:$0xff]  ;;  %v139_v30 = vld [vmem:[#allocation7 + $0x80] sm:$0xff]  ;;  %p6151_p9 = por %p6150_p8, %p6149_p7 }
  0x74   :  { %4475 = vmatprep.subr.bf16.mxu1 %v4474_v18  ;;  %v4446_v27 = vpack.c.bf16 %v144_v25, %v140_v24  ;;  %v146_v29 = vld [vmem:[#allocation7 + $0xb8] sm:$0xff]  ;;  %v143_v32 = vld [vmem:[#allocation7 + $0xa0] sm:$0xff]  ;;  %v141_v33 = vld [vmem:[#allocation7 + $0x90] sm:$0xff] }
  0x75   :  { %v4478_v31 = vpack.c.bf16 %v146_v29, %v142_v28  ;;  %v145_v34 = vld [vmem:[#allocation7 + $0xb0] sm:$0xff]  ;;  %v4448_v35 = vpack.c.bf16 %v143_v32, %v139_v30  ;;  %v148_v36 = vld [vmem:[#allocation7 + $0xc8] sm:$0xff]  ;;  %v150_v38 = vld [vmem:[#allocation7 + $0xd8] sm:$0xff]  ;;  %p6152_p10 = pnand %p6151_p9, %p6145_p6 }
  0x76   :  { %4445 = vmatpush1.bf16.msra.mxu0 %v4444_v22  ;;  %v152_v37 = vld [vmem:[#allocation7 + $0xe8] sm:$0xff]  ;;  %v4480_v39 = vpack.c.bf16 %v145_v34, %v141_v33  ;;  %v154_v41 = vld [vmem:[#allocation7 + $0xf8] sm:$0xff]  ;;  %v147_v42 = vld [vmem:[#allocation7 + $0xc0] sm:$0xff] }
  0x77   :  { %4477 = vmatpush1.bf16.msra.mxu1 %v4476_v26  ;;  %4447 = vmatprep.subr.bf16.mxu0 %v4446_v27  ;;  %v4450_v40 = vpack.c.bf16 %v152_v37, %v148_v36  ;;  %v151_v43 = vld [vmem:[#allocation7 + $0xe0] sm:$0xff]  ;;  %v4482_v44 = vpack.c.bf16 %v154_v41, %v150_v38  ;;  %v149_v45 = vld [vmem:[#allocation7 + $0xd0] sm:$0xff]  ;;  %v156_v47 = vld [vmem:[#allocation7 + $0x108] sm:$0xff] }
  0x78   :  { %4479 = vmatprep.subr.bf16.mxu1 %v4478_v31  ;;  %v153_v46 = vld [vmem:[#allocation7 + $0xf0] sm:$0xff]  ;;  %v160_v48 = vld [vmem:[#allocation7 + $0x128] sm:$0xff]  ;;  %v158_v49 = vld [vmem:[#allocation7 + $0x118] sm:$0xff]  ;;  %v4452_v51 = vpack.c.bf16 %v151_v43, %v147_v42 }
  0x79   :  { %v162_v50 = vld [vmem:[#allocation7 + $0x138] sm:$0xff]  ;;  %v4484_v52 = vpack.c.bf16 %v153_v46, %v149_v45  ;;  %v4454_v53 = vpack.c.bf16 %v160_v48, %v156_v47  ;;  %v155_v54 = vld [vmem:[#allocation7 + $0x100] sm:$0xff]  ;;  %v157_v56 = vld [vmem:[#allocation7 + $0x110] sm:$0xff] }
  0x7a   :  { %4449 = vmatpush1.bf16.msra.mxu0 %v4448_v35  ;;  %v159_v55 = vld [vmem:[#allocation7 + $0x120] sm:$0xff]  ;;  %v4486_v57 = vpack.c.bf16 %v162_v50, %v158_v49  ;;  %v161_v58 = vld [vmem:[#allocation7 + $0x130] sm:$0xff]  ;;  %v164_v59 = vld [vmem:[#allocation7 + $0x148] sm:$0xff] }
  0x7b   :  { %4481 = vmatpush1.bf16.msra.mxu1 %v4480_v39  ;;  %4451 = vmatprep.subr.bf16.mxu0 %v4450_v40  ;;  %v168_v60 = vld [vmem:[#allocation7 + $0x168] sm:$0xff]  ;;  %v166_v61 = vld [vmem:[#allocation7 + $0x158] sm:$0xff]  ;;  %v4456_v63 = vpack.c.bf16 %v159_v55, %v155_v54  ;;  %v4488_v1 = vpack.c.bf16 %v161_v58, %v157_v56  ;;  %v163_v3 = vld [vmem:[#allocation7 + $0x140] sm:$0xff] }
  0x7c   :  { %4483 = vmatprep.subr.bf16.mxu1 %v4482_v44  ;;  %v170_v62 = vld [vmem:[#allocation7 + $0x178] sm:$0xff]  ;;  %v4458_v2 = vpack.c.bf16 %v168_v60, %v164_v59  ;;  %v167_v4 = vld [vmem:[#allocation7 + $0x160] sm:$0xff]  ;;  %v165_v5 = vld [vmem:[#allocation7 + $0x150] sm:$0xff] }
  0x7d   :  { %v4490_v6 = vpack.c.bf16 %v170_v62, %v166_v61  ;;  %v169_v7 = vld [vmem:[#allocation7 + $0x170] sm:$0xff]  ;;  %v172_v8 = vld [vmem:[#allocation7 + $0x188] sm:$0xff]  ;;  %v174_v10 = vld [vmem:[#allocation7 + $0x198] sm:$0xff]  ;;  %v4460_v12 = vpack.c.bf16 %v167_v4, %v163_v3 }
  0x7e   :  { %4453 = vmatpush1.bf16.msra.mxu0 %v4452_v51  ;;  %v176_v9 = vld [vmem:[#allocation7 + $0x1a8] sm:$0xff]  ;;  %v178_v11 = vld [vmem:[#allocation7 + $0x1b8] sm:$0xff]  ;;  %v4492_v13 = vpack.c.bf16 %v169_v7, %v165_v5  ;;  %v171_v15 = vld [vmem:[#allocation7 + $0x180] sm:$0xff] }
  0x7f   :  { %4485 = vmatpush1.bf16.msra.mxu1 %v4484_v52  ;;  %4455 = vmatprep.subr.bf16.mxu0 %v4454_v53  ;;  %v4462_v14 = vpack.c.bf16 %v176_v9, %v172_v8  ;;  %v175_v16 = vld [vmem:[#allocation7 + $0x1a0] sm:$0xff]  ;;  %v173_v17 = vld [vmem:[#allocation7 + $0x190] sm:$0xff]  ;;  %v4494_v18 = vpack.c.bf16 %v178_v11, %v174_v10  ;;  %v180_v20 = vld [vmem:[#allocation7 + $0x1c8] sm:$0xff] }
  0x80   :  { %4487 = vmatprep.subr.bf16.mxu1 %v4486_v57  ;;  %v177_v19 = vld [vmem:[#allocation7 + $0x1b0] sm:$0xff]  ;;  %v184_v21 = vld [vmem:[#allocation7 + $0x1e8] sm:$0xff]  ;;  %v182_v22 = vld [vmem:[#allocation7 + $0x1d8] sm:$0xff]  ;;  %v4464_v24 = vpack.c.bf16 %v175_v16, %v171_v15 }
  0x81   :  { %v186_v23 = vld [vmem:[#allocation7 + $0x1f8] sm:$0xff]  ;;  %v4496_v25 = vpack.c.bf16 %v177_v19, %v173_v17  ;;  %v4466_v26 = vpack.c.bf16 %v184_v21, %v180_v20  ;;  %v179_v27 = vld [vmem:[#allocation7 + $0x1c0] sm:$0xff]  ;;  %v181_v29 = vld [vmem:[#allocation7 + $0x1d0] sm:$0xff] }
  0x82   :  { %4457 = vmatpush1.bf16.msra.mxu0 %v4456_v63  ;;  %v183_v28 = vld [vmem:[#allocation7 + $0x1e0] sm:$0xff]  ;;  %v4498_v30 = vpack.c.bf16 %v186_v23, %v182_v22  ;;  %v185_v31 = vld [vmem:[#allocation7 + $0x1f0] sm:$0xff]  ;;  %v475_v32 = vld [vmem:[#allocation9 + $0x8] sm:$0xff] }
  0x83   :  { %4489 = vmatpush1.bf16.msra.mxu1 %v4488_v1  ;;  %4459 = vmatprep.subr.bf16.mxu0 %v4458_v2  ;;  %v479_v33 = vld [vmem:[#allocation9 + $0x28] sm:$0xff]  ;;  %v477_v34 = vld [vmem:[#allocation9 + $0x18] sm:$0xff]  ;;  %v4468_v36 = vpack.c.bf16 %v183_v28, %v179_v27  ;;  %v4500_v37 = vpack.c.bf16 %v185_v31, %v181_v29  ;;  %v474_v39 = vld [vmem:[#allocation9] sm:$0xff] }
  0x84   :  { %4491 = vmatprep.subr.bf16.mxu1 %v4490_v6  ;;  %v481_v35 = vld [vmem:[#allocation9 + $0x38] sm:$0xff]  ;;  %v6332_v38 = vpack.c.bf16 %v479_v33, %v475_v32  ;;  %v478_v40 = vld [vmem:[#allocation9 + $0x20] sm:$0xff]  ;;  %v476_v42 = vld [vmem:[#allocation9 + $0x10] sm:$0xff] }
  0x85   :  { %v6334_v41 = vpack.c.bf16 %v481_v35, %v477_v34  ;;  %v480_v43 = vld [vmem:[#allocation9 + $0x30] sm:$0xff]  ;;  %v483_v44 = vld [vmem:[#allocation9 + $0x48] sm:$0xff]  ;;  %v115_v46 = vld [vmem:[#allocation4] sm:$0xff]  ;;  %v6336_v47 = vpack.c.bf16 %v478_v40, %v474_v39 }
  0x86   :  { %4461 = vmatpush1.bf16.msra.mxu0 %v4460_v12  ;;  %v487_v45 = vld [vmem:[#allocation9 + $0x68] sm:$0xff]  ;;  %v485_v48 = vld [vmem:[#allocation9 + $0x58] sm:$0xff]  ;;  %v6339_v50 = vpack.c.bf16 %v480_v43, %v476_v42  ;;  %v482_v51 = vld [vmem:[#allocation9 + $0x40] sm:$0xff] }
  0x87   :  { %4493 = vmatpush1.bf16.msra.mxu1 %v4492_v13  ;;  %4463 = vmatprep.subr.bf16.mxu0 %v4462_v14  ;;  %v489_v49 = vld [vmem:[#allocation9 + $0x78] sm:$0xff]  ;;  %v486_v52 = vld [vmem:[#allocation9 + $0x60] sm:$0xff]  ;;  %v6342_v53 = vpack.c.bf16 %v487_v45, %v483_v44  ;;  %v484_v54 = vld [vmem:[#allocation9 + $0x50] sm:$0xff] }
  0x88   :  { %4495 = vmatprep.subr.bf16.mxu1 %v4494_v18  ;;  %v488_v55 = vld [vmem:[#allocation9 + $0x70] sm:$0xff]  ;;  %v6344_v56 = vpack.c.bf16 %v489_v49, %v485_v48  ;;  %v491_v57 = vld [vmem:[#allocation9 + $0x88] sm:$0xff]  ;;  %v6347_v60 = vpack.c.bf16 %v486_v52, %v482_v51  ;;  %v493_v61 = vld [vmem:[#allocation9 + $0x98] sm:$0xff] }
  0x89   :  { %v495_v58 = vld [vmem:[#allocation9 + $0xa8] sm:$0xff]  ;;  %v497_v62 = vld [vmem:[#allocation9 + $0xb8] sm:$0xff]  ;;  %v6351_v63 = vpack.c.bf16 %v488_v55, %v484_v54  ;;  %v490_v1 = vld [vmem:[#allocation9 + $0x80] sm:$0xff] }
  0x8a   :  { %4465 = vmatpush1.bf16.msra.mxu0 %v4464_v24  ;;  %v116_v59 = vld [vmem:[#allocation4 + $0x8] sm:$0xff]  ;;  %v494_v2 = vld [vmem:[#allocation9 + $0xa0] sm:$0xff]  ;;  %v6355_v3 = vpack.c.bf16 %v495_v58, %v491_v57  ;;  %v492_v4 = vld [vmem:[#allocation9 + $0x90] sm:$0xff]  ;;  %v6358_v6 = vpack.c.bf16 %v497_v62, %v493_v61 }
  0x8b   :  { %4497 = vmatpush1.bf16.msra.mxu1 %v4496_v25  ;;  %4467 = vmatprep.subr.bf16.mxu0 %v4466_v26  ;;  %v496_v5 = vld [vmem:[#allocation9 + $0xb0] sm:$0xff]  ;;  %v499_v7 = vld [vmem:[#allocation9 + $0xc8] sm:$0xff]  ;;  %v6361_v10 = vpack.c.bf16 %v494_v2, %v490_v1  ;;  %v501_v11 = vld [vmem:[#allocation9 + $0xd8] sm:$0xff] }
  0x8c   :  { %4499 = vmatprep.subr.bf16.mxu1 %v4498_v30  ;;  %v503_v8 = vld [vmem:[#allocation9 + $0xe8] sm:$0xff]  ;;  %v117_v9 = vld [vmem:[#allocation4 + $0x10] sm:$0xff]  ;;  %v505_v12 = vld [vmem:[#allocation9 + $0xf8] sm:$0xff]  ;;  %v6365_v13 = vpack.c.bf16 %v496_v5, %v492_v4 }
  0x8d   :  { %v498_v14 = vld [vmem:[#allocation9 + $0xc0] sm:$0xff]  ;;  %v6369_v16 = vpack.c.bf16 %v503_v8, %v499_v7  ;;  %v500_v17 = vld [vmem:[#allocation9 + $0xd0] sm:$0xff]  ;;  %v6372_v19 = vpack.c.bf16 %v505_v12, %v501_v11  ;;  %v507_v20 = vld [vmem:[#allocation9 + $0x108] sm:$0xff] }
  0x8e   :  { %4469 = vmatpush1.bf16.msra.mxu0 %v4468_v36  ;;  %v502_v15 = vld [vmem:[#allocation9 + $0xe0] sm:$0xff]  ;;  %v504_v18 = vld [vmem:[#allocation9 + $0xf0] sm:$0xff]  ;;  %v511_v21 = vld [vmem:[#allocation9 + $0x128] sm:$0xff] }
  0x8f   :  { %4501 = vmatpush1.bf16.msra.mxu1 %v4500_v37  ;;  %4503 = vmatprep.subr.bf16.mxu0 %v6332_v38  ;;  %v118_v22 = vld [vmem:[#allocation4 + $0x18] sm:$0xff]  ;;  %v6375_v23 = vpack.c.bf16 %v502_v15, %v498_v14  ;;  %v6379_v26 = vpack.c.bf16 %v504_v18, %v500_v17  ;;  %v506_v27 = vld [vmem:[#allocation9 + $0x100] sm:$0xff]  ;;  %v6383_v29 = vpack.c.bf16 %v511_v21, %v507_v20  ;;  %v508_v30 = vld [vmem:[#allocation9 + $0x110] sm:$0xff] }
  0x90   :  { %4535 = vmatprep.subr.bf16.mxu1 %v6334_v41  ;;  %v509_v24 = vld [vmem:[#allocation9 + $0x118] sm:$0xff]  ;;  %v510_v28 = vld [vmem:[#allocation9 + $0x120] sm:$0xff]  ;;  %v512_v31 = vld [vmem:[#allocation9 + $0x130] sm:$0xff] }
  0x91   :  { %274 = vmatmul.mubr.f32.vlgmr.msra.gmra.mrb[0].mxu0 %v115_v46  ;;  %v513_v25 = vld [vmem:[#allocation9 + $0x138] sm:$0xff]  ;;  %v515_v33 = vld [vmem:[#allocation9 + $0x148] sm:$0xff]  ;;  %v119_v35 = vld [vmem:[#allocation4 + $0x20] sm:$0xff]  ;;  %v6389_v36 = vpack.c.bf16 %v510_v28, %v506_v27  ;;  %v6393_v40 = vpack.c.bf16 %v512_v31, %v508_v30  ;;  %v189_v28 = vlaneseq }
  0x92   :  { %387 = vmatmul.mubr.f32.vlgmr.msra.gmra.mrb[0].mxu1 %v115_v46  ;;  %4505 = vmatpush1.bf16.msra.mxu0 %v6336_v47  ;;  %v6386_v32 = vpack.c.bf16 %v513_v25, %v509_v24  ;;  %v519_v34 = vld [vmem:[#allocation9 + $0x168] sm:$0xff]  ;;  %v517_v37 = vld [vmem:[#allocation9 + $0x158] sm:$0xff]  ;;  %v514_v42 = vld [vmem:[#allocation9 + $0x140] sm:$0xff] }
  0x93   :  { %4537 = vmatpush1.bf16.msra.mxu1 %v6339_v50  ;;  %279 = vmatprep.mubr.f32.mxu0 %v6186_v0  ;;  %v521_v39 = vld [vmem:[#allocation9 + $0x178] sm:$0xff]  ;;  %v518_v43 = vld [vmem:[#allocation9 + $0x160] sm:$0xff]  ;;  %v6397_v44 = vpack.c.bf16 %v519_v34, %v515_v33  ;;  %v516_v45 = vld [vmem:[#allocation9 + $0x150] sm:$0xff]  ;;  %v6482_v30 = vshrl.u32 %v189_v28, 7 }
  0x94   :  { %392 = vmatprep.mubr.f32.mxu1 %v6186_v0  ;;  %4507 = vmatprep.subr.bf16.mxu0 %v6342_v53  ;;  %v520_v46 = vld [vmem:[#allocation9 + $0x170] sm:$0xff]  ;;  %v6400_v48 = vpack.c.bf16 %v521_v39, %v517_v37  ;;  %v523_v49 = vld [vmem:[#allocation9 + $0x188] sm:$0xff]  ;;  %v6403_v54 = vpack.c.bf16 %v518_v43, %v514_v42  ;;  %v525_v55 = vld [vmem:[#allocation9 + $0x198] sm:$0xff] }
  0x95   :  { %280 = vmatmul.mubr.f32.gmra.mrb[2].mxu0 %v116_v59  ;;  %4539 = vmatprep.subr.bf16.mxu1 %v6344_v56  ;;  %v527_v51 = vld [vmem:[#allocation9 + $0x1a8] sm:$0xff]  ;;  %v529_v57 = vld [vmem:[#allocation9 + $0x1b8] sm:$0xff]  ;;  %v6407_v58 = vpack.c.bf16 %v520_v46, %v516_v45  ;;  %v526_v61 = vld [vmem:[#allocation9 + $0x1a0] sm:$0xff]  ;;  %v191_v31 = vsub.s32 0, %v6482_v30  ;;  %v195_v34 = vsub.s32 1, %v6482_v30  ;;  %v203_v37 = vsub.s32 3, %v6482_v30 }
  0x96   :  { %393 = vmatmul.mubr.f32.gmra.mrb[2].mxu1 %v116_v59  ;;  %4509 = vmatpush1.bf16.msra.mxu0 %v6347_v60  ;;  %v120_v52 = vld [vmem:[#allocation4 + $0x28] sm:$0xff]  ;;  %v522_v59 = vld [vmem:[#allocation9 + $0x180] sm:$0xff]  ;;  %v6411_v62 = vpack.c.bf16 %v527_v51, %v523_v49  ;;  %v524_v1 = vld [vmem:[#allocation9 + $0x190] sm:$0xff]  ;;  %v6414_v4 = vpack.c.bf16 %v529_v57, %v525_v55  ;;  %v199_v55 = vsub.s32 2, %v6482_v30 }
  0x97   :  { %4541 = vmatpush1.bf16.msra.mxu1 %v6351_v63  ;;  %285 = vmatprep.mubr.f32.mxu0 %v6186_v0  ;;  %v528_v2 = vld [vmem:[#allocation9 + $0x1b0] sm:$0xff]  ;;  %v531_v5 = vld [vmem:[#allocation9 + $0x1c8] sm:$0xff]  ;;  %v533_v11 = vld [vmem:[#allocation9 + $0x1d8] sm:$0xff] }
  0x98   :  { %398 = vmatprep.mubr.f32.mxu1 %v6186_v0  ;;  %4511 = vmatprep.subr.bf16.mxu0 %v6355_v3  ;;  %v535_v7 = vld [vmem:[#allocation9 + $0x1e8] sm:$0xff]  ;;  %v121_v8 = vld [vmem:[#allocation4 + $0x30] sm:$0xff]  ;;  %v537_v12 = vld [vmem:[#allocation9 + $0x1f8] sm:$0xff]  ;;  %v6421_v14 = vpack.c.bf16 %v528_v2, %v524_v1 }
  0x99   :  { %286 = vmatmul.mubr.f32.gmra.mrb[4].mxu0 %v117_v9  ;;  %4543 = vmatprep.subr.bf16.mxu1 %v6358_v6  ;;  %v530_v15 = vld [vmem:[#allocation9 + $0x1c0] sm:$0xff]  ;;  %v6425_v18 = vpack.c.bf16 %v535_v7, %v531_v5  ;;  %v532_v20 = vld [vmem:[#allocation9 + $0x1d0] sm:$0xff]  ;;  %v122_v24 = vld [vmem:[#allocation4 + $0x38] sm:$0xff] }
  0x9a   :  { %399 = vmatmul.mubr.f32.gmra.mrb[4].mxu1 %v117_v9  ;;  %4513 = vmatpush1.bf16.msra.mxu0 %v6361_v10  ;;  %v6417_v9 = vpack.c.bf16 %v526_v61, %v522_v59  ;;  %v534_v17 = vld [vmem:[#allocation9 + $0x1e0] sm:$0xff]  ;;  %v536_v21 = vld [vmem:[#allocation9 + $0x1f0] sm:$0xff] }
  0x9b   :  { %4545 = vmatpush1.bf16.msra.mxu1 %v6365_v13  ;;  %291 = vmatprep.mubr.f32.mxu0 %v6186_v0  ;;  %v6431_v25 = vpack.c.bf16 %v534_v17, %v530_v15  ;;  %v6435_v27 = vpack.c.bf16 %v536_v21, %v532_v20  ;;  %v187_v33 = vld [vmem:[%s7319_s3] sm:$0xf] }
  0x9c   :  { %404 = vmatprep.mubr.f32.mxu1 %v6186_v0  ;;  %4515 = vmatprep.subr.bf16.mxu0 %v6369_v16  ;;  %v6508_v59 = vrot.slane %v187_v33, %v199_v55 }
  0x9d   :  { %292 = vmatmul.mubr.f32.gmra.mrb[6].mxu0 %v118_v22  ;;  %4547 = vmatprep.subr.bf16.mxu1 %v6372_v19 }
  0x9e   :  { %405 = vmatmul.mubr.f32.gmra.mrb[6].mxu1 %v118_v22  ;;  %4517 = vmatpush1.bf16.msra.mxu0 %v6375_v23  ;;  %v6428_v22 = vpack.c.bf16 %v537_v12, %v533_v11 }
  0x9f   :  { %4549 = vmatpush1.bf16.msra.mxu1 %v6379_v26  ;;  %297 = vmatprep.mubr.f32.mxu0 %v6186_v0 }
  0xa0   :  { %410 = vmatprep.mubr.f32.mxu1 %v6186_v0  ;;  %4519 = vmatprep.subr.bf16.mxu0 %v6383_v29 }
  0xa1   :  { %298 = vmatmul.mubr.f32.gmra.mrb[8].mxu0 %v119_v35  ;;  %4551 = vmatprep.subr.bf16.mxu1 %v6386_v32 }
  0xa2   :  { %411 = vmatmul.mubr.f32.gmra.mrb[8].mxu1 %v119_v35  ;;  %4521 = vmatpush1.bf16.msra.mxu0 %v6389_v36  ;;  %v6491_v35 = vrot.slane %v187_v33, %v191_v31 }
  0xa3   :  { %4553 = vmatpush1.bf16.msra.mxu1 %v6393_v40  ;;  %303 = vmatprep.mubr.f32.mxu0 %v6186_v0 }
  0xa4   :  { %416 = vmatprep.mubr.f32.mxu1 %v6186_v0  ;;  %4523 = vmatprep.subr.bf16.mxu0 %v6397_v44 }
  0xa5   :  { %304 = vmatmul.mubr.f32.gmra.mrb[10].mxu0 %v120_v52  ;;  %4555 = vmatprep.subr.bf16.mxu1 %v6400_v48 }
  0xa6   :  { %417 = vmatmul.mubr.f32.gmra.mrb[10].mxu1 %v120_v52  ;;  %4525 = vmatpush1.bf16.msra.mxu0 %v6403_v54  ;;  %v6502_v52 = vrot.slane %v187_v33, %v203_v37 }
  0xa7   :  { %4557 = vmatpush1.bf16.msra.mxu1 %v6407_v58  ;;  %309 = vmatprep.mubr.f32.mxu0 %v6186_v0 }
  0xa8   :  { %422 = vmatprep.mubr.f32.mxu1 %v6186_v0  ;;  %4527 = vmatprep.subr.bf16.mxu0 %v6411_v62 }
  0xa9   :  { %310 = vmatmul.mubr.f32.gmra.mrb[12].mxu0 %v121_v8  ;;  %4559 = vmatprep.subr.bf16.mxu1 %v6414_v4 }
  0xaa   :  { %423 = vmatmul.mubr.f32.gmra.mrb[12].mxu1 %v121_v8  ;;  %4529 = vmatpush1.bf16.msra.mxu0 %v6417_v9 }
  0xab   :  { %4561 = vmatpush1.bf16.msra.mxu1 %v6421_v14  ;;  %315 = vmatprep.mubr.f32.mxu0 %v6186_v0 }
  0xac   :  { %428 = vmatprep.mubr.f32.mxu1 %v6186_v0  ;;  %4531 = vmatprep.subr.bf16.mxu0 %v6425_v18 }
  0xad   :  { %316 = vmatmul.mubr.f32.gmra.mrb[14].mxu0 %v122_v24  ;;  %4563 = vmatprep.subr.bf16.mxu1 %v6428_v22 }
  0xae   :  { %429 = vmatmul.mubr.f32.gmra.mrb[14].mxu1 %v122_v24  ;;  %4533 = vmatpush1.bf16.msra.mxu0 %v6431_v25 }
  0xaf   :  { %4565 = vmatpush1.bf16.msra.mxu1 %v6435_v27  ;;  %602 = vmatprep.mubr.f32.mxu0 %v6186_v0 }
  0xb0   :  { %673 = vmatprep.mubr.f32.mxu1 %v6186_v0  ;;  %4567 = vmatprep.subr.bf16.mxu0 %v6332_v38 }
  0xb1   :  { %603 = vmatmul.mubr.f32.vlgmr.msra.gmra.mrb[0].mxu0 %v6186_v0  ;;  %4599 = vmatprep.subr.bf16.mxu1 %v6334_v41 }
  0xb2   :  { %674 = vmatmul.mubr.f32.vlgmr.msra.gmra.mrb[0].mxu1 %v6186_v0  ;;  %4569 = vmatpush1.bf16.msra.mxu0 %v6336_v47 }
  0xb3   :  { %4601 = vmatpush1.bf16.msra.mxu1 %v6339_v50  ;;  %4571 = vmatprep.subr.bf16.mxu0 %v6342_v53 }
  0xb4   :  { %4603 = vmatprep.subr.bf16.mxu1 %v6344_v56  ;;  %844 = vmatprep.mubr.f32.mxu0 %v6186_v0 }
  0xb5   :  { %915 = vmatprep.mubr.f32.mxu1 %v6186_v0 }
  0xb6   :  { %4573 = vmatpush1.bf16.msra.mxu0 %v6347_v60 }
  0xb7   :  { %4605 = vmatpush1.bf16.msra.mxu1 %v6351_v63  ;;  %4575 = vmatprep.subr.bf16.mxu0 %v6355_v3 }
  0xb8   :  { %4607 = vmatprep.subr.bf16.mxu1 %v6358_v6 }
  0xba   :  { %4577 = vmatpush1.bf16.msra.mxu0 %v6361_v10 }
  0xbb   :  { %4609 = vmatpush1.bf16.msra.mxu1 %v6365_v13  ;;  %4579 = vmatprep.subr.bf16.mxu0 %v6369_v16 }
  0xbc   :  { %4611 = vmatprep.subr.bf16.mxu1 %v6372_v19 }
  0xbe   :  { %4581 = vmatpush1.bf16.msra.mxu0 %v6375_v23 }
  0xbf   :  { %4613 = vmatpush1.bf16.msra.mxu1 %v6379_v26  ;;  %4583 = vmatprep.subr.bf16.mxu0 %v6383_v29 }
  0xc0   :  { %4615 = vmatprep.subr.bf16.mxu1 %v6386_v32 }
  0xc2   :  { %4585 = vmatpush1.bf16.msra.mxu0 %v6389_v36 }
  0xc3   :  { %4617 = vmatpush1.bf16.msra.mxu1 %v6393_v40  ;;  %4587 = vmatprep.subr.bf16.mxu0 %v6397_v44 }
  0xc4   :  { %4619 = vmatprep.subr.bf16.mxu1 %v6400_v48 }
  0xc6   :  { %4589 = vmatpush1.bf16.msra.mxu0 %v6403_v54 }
  0xc7   :  { %4621 = vmatpush1.bf16.msra.mxu1 %v6407_v58  ;;  %4591 = vmatprep.subr.bf16.mxu0 %v6411_v62 }
  0xc8   :  { %4623 = vmatprep.subr.bf16.mxu1 %v6414_v4 }
  0xca   :  { %4593 = vmatpush1.bf16.msra.mxu0 %v6417_v9 }
  0xcb   :  { %4625 = vmatpush1.bf16.msra.mxu1 %v6421_v14  ;;  %4595 = vmatprep.subr.bf16.mxu0 %v6425_v18 }
  0xcc   :  { %4627 = vmatprep.subr.bf16.mxu1 %v6428_v22 }
  0xce   :  { %4597 = vmatpush1.bf16.msra.mxu0 %v6431_v25 }
  0xcf   :  { %4629 = vmatpush1.bf16.msra.mxu1 %v6435_v27  ;;  %4631 = vmatprep.subr.bf16.mxu0 %v6332_v38  ;;  %v6495_v38 = vrot.slane %v187_v33, %v195_v34 }
  0xd0   :  { %4663 = vmatprep.subr.bf16.mxu1 %v6334_v41 }
 0x184   :  { %v604_v41 = vpop.f32.mrb[0].mxu0 }
 0x185   :  { %v5614_v39 = vadd.f32 %v604_v41, %v6491_v35  ;;  %v675_v42 = vpop.f32.mrb[0].mxu1  ;;  %v606_v43 = vpop.f32.mrb[1].mxu0 }
 0x186   :  { %v5615_v45 = vadd.f32 %v606_v43, %v6495_v38  ;;  %v677_v46 = vpop.f32.mrb[1].mxu1  ;;  %v5630_v1 = vadd.f32 %v675_v42, %v6508_v59 }
 0x187   :  { %v4337_v49 = vmul.f32 -1.442695, %v5614_v39  ;;  %v5631_v57 = vadd.f32 %v677_v46, %v6502_v52 }
 0x188   :  { %v4338_v51 = vmul.f32 -1.442695, %v5615_v45 }
 0x189   :  { %5756 = vpow2.f32 %v4337_v49  ;;  %v4339_v61 = vmul.f32 -1.442695, %v5631_v57 }
 0x18a   :  { %5758 = vpow2.f32 %v4338_v51 }
 0x18b   :  { %5760 = vpow2.f32 %v4339_v61 }
 0x18c   :  { %5762 = vtanh.f32 %v5630_v1 }
 0x193   :  { %v5757_v2 = vpop.eup %5756 }
 0x194   :  { %v5759_v5 = vpop.eup %5758  ;;  %v687_v7 = vadd.f32 1.0, %v5757_v2 }
 0x195   :  { %v693_v8 = vadd.f32 1.0, %v5759_v5  ;;  %v5761_v11 = vpop.eup %5760 }
 0x196   :  { %5764 = vrcp.f32 %v687_v7  ;;  %v5763_v12 = vpop.eup %5762  ;;  %v700_v21 = vadd.f32 1.0, %v5761_v11 }
 0x197   :  { %5766 = vrcp.f32 %v693_v8 }
 0x198   :  { %5768 = vrcp.f32 %v700_v21 }
 0x1a0   :  { %v5765_v15 = vpop.eup %5764 }
 0x1a1   :  { %v5767_v17 = vpop.eup %5766  ;;  %v704_v20 = vmul.f32 %v5765_v15, %v5763_v12 }
 0x1a2   :  { %v703_v24 = vmul.f32 0.0, %v5767_v17  ;;  %v5769_v33 = vpop.eup %5768 }
 0x1a4   :  { %v6511_v28 = vadd.f32 %v704_v20, %v703_v24 }
 0x1a6   :  { %5770 = vtanh.f32 %v6511_v28 }
 0x1b0   :  { %v5771_v41 = vpop.eup %5770 }
 0x1b1   :  { %v6514_v39 = vmul.f32 %v5771_v41, %v5769_v33  ;;  %v1203_v33 = vld [vmem:[#allocation9 + $0x8] sm:$0xff] }
 0x1b2   :  { %v1207_v41 = vld [vmem:[#allocation9 + $0x28] sm:$0xff] }
 0x1b3   :  { %845 = vmatmul.mubr.f32.vlgmr.msra.gmra.mrb[2].mxu0 %v6514_v39  ;;  %916 = vmatmul.mubr.f32.vlgmr.msra.gmra.mrb[2].mxu1 %v6514_v39 }
 0x1b4   :  { %4633 = vmatpush1.bf16.msra.mxu0 %v6336_v47  ;;  %4665 = vmatpush1.bf16.msra.mxu1 %v6339_v50 }
 0x1b5   :  { %4635 = vmatprep.subr.bf16.mxu0 %v6342_v53  ;;  %4667 = vmatprep.subr.bf16.mxu1 %v6344_v56 }
 0x1b6   :  { %1087 = vmatprep.mubr.f32.mxu0 %v6186_v0  ;;  %1158 = vmatprep.mubr.f32.mxu1 %v6186_v0 }
 0x1b8   :  { %4637 = vmatpush1.bf16.msra.mxu0 %v6347_v60  ;;  %4669 = vmatpush1.bf16.msra.mxu1 %v6351_v63 }
 0x1b9   :  { %4639 = vmatprep.subr.bf16.mxu0 %v6355_v3  ;;  %4671 = vmatprep.subr.bf16.mxu1 %v6358_v6 }
 0x1bc   :  { %4641 = vmatpush1.bf16.msra.mxu0 %v6361_v10  ;;  %4673 = vmatpush1.bf16.msra.mxu1 %v6365_v13 }
 0x1bd   :  { %4643 = vmatprep.subr.bf16.mxu0 %v6369_v16  ;;  %4675 = vmatprep.subr.bf16.mxu1 %v6372_v19 }
 0x1c0   :  { %4645 = vmatpush1.bf16.msra.mxu0 %v6375_v23  ;;  %4677 = vmatpush1.bf16.msra.mxu1 %v6379_v26 }
 0x1c1   :  { %4647 = vmatprep.subr.bf16.mxu0 %v6383_v29  ;;  %4679 = vmatprep.subr.bf16.mxu1 %v6386_v32 }
 0x1c4   :  { %4649 = vmatpush1.bf16.msra.mxu0 %v6389_v36  ;;  %4681 = vmatpush1.bf16.msra.mxu1 %v6393_v40 }
 0x1c5   :  { %4651 = vmatprep.subr.bf16.mxu0 %v6397_v44  ;;  %4683 = vmatprep.subr.bf16.mxu1 %v6400_v48 }
 0x1c8   :  { %4653 = vmatpush1.bf16.msra.mxu0 %v6403_v54  ;;  %4685 = vmatpush1.bf16.msra.mxu1 %v6407_v58 }
 0x1c9   :  { %4655 = vmatprep.subr.bf16.mxu0 %v6411_v62  ;;  %4687 = vmatprep.subr.bf16.mxu1 %v6414_v4 }
 0x1cc   :  { %4657 = vmatpush1.bf16.msra.mxu0 %v6417_v9  ;;  %4689 = vmatpush1.bf16.msra.mxu1 %v6421_v14 }
 0x1cd   :  { %4659 = vmatprep.subr.bf16.mxu0 %v6425_v18  ;;  %4691 = vmatprep.subr.bf16.mxu1 %v6428_v22 }
 0x1d0   :  { %4661 = vmatpush1.bf16.msra.mxu0 %v6431_v25  ;;  %4693 = vmatpush1.bf16.msra.mxu1 %v6435_v27 }
 0x286   :  { %v846_v47 = vpop.f32.mrb[2].mxu0  ;;  %v917_v50 = vpop.f32.mrb[2].mxu1 }
 0x287   :  { %v5616_v53 = vadd.f32 %v846_v47, %v6491_v35  ;;  %v848_v56 = vpop.f32.mrb[3].mxu0  ;;  %v919_v60 = vpop.f32.mrb[3].mxu1  ;;  %v5632_v49 = vadd.f32 %v917_v50, %v6508_v59  ;;  %v6564_v47 = vpack.c.bf16 %v1207_v41, %v1203_v33  ;;  %v1209_v50 = vld [vmem:[#allocation9 + $0x38] sm:$0xff] }
 0x288   :  { %v5617_v63 = vadd.f32 %v848_v56, %v6495_v38  ;;  %v5633_v45 = vadd.f32 %v919_v60, %v6502_v52  ;;  %v1206_v56 = vld [vmem:[#allocation9 + $0x20] sm:$0xff]  ;;  %v1464_v33 = vld [vmem:[#allocation9 + $0x98] sm:$0xff] }
 0x289   :  { %v4340_v42 = vmul.f32 -1.442695, %v5616_v53  ;;  %v1202_v53 = vld [vmem:[#allocation9] sm:$0xff]  ;;  %4695 = vmatprep.subr.bf16.mxu0 %v6564_v47 }
 0x28a   :  { %v4341_v43 = vmul.f32 -1.442695, %v5617_v63  ;;  %v4342_v46 = vmul.f32 -1.442695, %v5633_v45  ;;  %v6568_v63 = vpack.c.bf16 %v1206_v56, %v1202_v53  ;;  %v1465_v53 = vld [vmem:[#allocation9 + $0xa0] sm:$0xff] }
 0x28b   :  { %5772 = vpow2.f32 %v4340_v42  ;;  %v1204_v42 = vld [vmem:[#allocation9 + $0x10] sm:$0xff] }
 0x28c   :  { %5774 = vpow2.f32 %v4341_v43  ;;  %v1208_v43 = vld [vmem:[#allocation9 + $0x30] sm:$0xff] }
 0x28d   :  { %5776 = vpow2.f32 %v4342_v46  ;;  %v6571_v45 = vpack.c.bf16 %v1208_v43, %v1204_v42  ;;  %v1211_v46 = vld [vmem:[#allocation9 + $0x48] sm:$0xff]  ;;  %v1463_v43 = vld [vmem:[#allocation9 + $0x90] sm:$0xff] }
 0x28e   :  { %5778 = vtanh.f32 %v5632_v49  ;;  %v1215_v49 = vld [vmem:[#allocation9 + $0x68] sm:$0xff] }
 0x295   :  { %v5773_v51 = vpop.eup %5772 }
 0x296   :  { %v5775_v57 = vpop.eup %5774  ;;  %v929_v61 = vadd.f32 1.0, %v5773_v51  ;;  %v1213_v51 = vld [vmem:[#allocation9 + $0x58] sm:$0xff] }
 0x297   :  { %v935_v1 = vadd.f32 1.0, %v5775_v57  ;;  %v5777_v2 = vpop.eup %5776  ;;  %v6576_v57 = vpack.c.bf16 %v1215_v49, %v1211_v46  ;;  %v1467_v46 = vld [vmem:[#allocation9 + $0xb0] sm:$0xff] }
 0x298   :  { %5780 = vrcp.f32 %v929_v61  ;;  %v5779_v5 = vpop.eup %5778  ;;  %v942_v12 = vadd.f32 1.0, %v5777_v2  ;;  %v1217_v61 = vld [vmem:[#allocation9 + $0x78] sm:$0xff]  ;;  %v1214_v2 = vld [vmem:[#allocation9 + $0x60] sm:$0xff]  ;;  %v6641_v49 = vpack.c.bf16 %v1467_v46, %v1463_v43  ;;  %v1498_v46 = vld [vmem:[#allocation9 + $0x1a8] sm:$0xff] }
 0x299   :  { %5782 = vrcp.f32 %v935_v1  ;;  %v1210_v1 = vld [vmem:[#allocation9 + $0x40] sm:$0xff] }
 0x29a   :  { %5784 = vrcp.f32 %v942_v12 }
 0x2a2   :  { %v5781_v7 = vpop.eup %5780 }
 0x2a3   :  { %v5783_v8 = vpop.eup %5782  ;;  %v946_v11 = vmul.f32 %v5781_v7, %v5779_v5  ;;  %v6578_v5 = vpack.c.bf16 %v1217_v61, %v1213_v51  ;;  %v6580_v7 = vpack.c.bf16 %v1214_v2, %v1210_v1  ;;  %v1470_v51 = vld [vmem:[#allocation9 + $0xc8] sm:$0xff]  ;;  %v1472_v1 = vld [vmem:[#allocation9 + $0xd8] sm:$0xff] }
 0x2a4   :  { %v945_v15 = vmul.f32 %v5783_v8, %v6511_v28  ;;  %v5785_v20 = vpop.eup %5784  ;;  %v1205_v28 = vld [vmem:[#allocation9 + $0x18] sm:$0xff]  ;;  %v1212_v8 = vld [vmem:[#allocation9 + $0x50] sm:$0xff]  ;;  %v1474_v61 = vld [vmem:[#allocation9 + $0xe8] sm:$0xff] }
 0x2a5   :  { %v6566_v60 = vpack.c.bf16 %v1209_v50, %v1205_v28  ;;  %v1468_v28 = vld [vmem:[#allocation9 + $0xb8] sm:$0xff]  ;;  %v1461_v50 = vld [vmem:[#allocation9 + $0x80] sm:$0xff]  ;;  %v6646_v2 = vpack.c.bf16 %v1474_v61, %v1470_v51 }
 0x2a6   :  { %v6555_v17 = vadd.f32 %v946_v11, %v945_v15  ;;  %v1216_v11 = vld [vmem:[#allocation9 + $0x70] sm:$0xff]  ;;  %v6636_v56 = vpack.c.bf16 %v1468_v28, %v1464_v33  ;;  %v6638_v42 = vpack.c.bf16 %v1465_v53, %v1461_v50  ;;  %v1494_v53 = vld [vmem:[#allocation9 + $0x188] sm:$0xff]  ;;  %v1496_v51 = vld [vmem:[#allocation9 + $0x198] sm:$0xff] }
 0x2a7   :  { %4727 = vmatprep.subr.bf16.mxu1 %v6566_v60  ;;  %v6583_v12 = vpack.c.bf16 %v1216_v11, %v1212_v8  ;;  %v1476_v8 = vld [vmem:[#allocation9 + $0xf8] sm:$0xff]  ;;  %v1469_v11 = vld [vmem:[#allocation9 + $0xc0] sm:$0xff]  ;;  %v1487_v28 = vld [vmem:[#allocation9 + $0x150] sm:$0xff] }
 0x2a8   :  { %5786 = vtanh.f32 %v6555_v17  ;;  %v1491_v50 = vld [vmem:[#allocation9 + $0x170] sm:$0xff]  ;;  %v1500_v61 = vld [vmem:[#allocation9 + $0x1b8] sm:$0xff] }
 0x2a9   :  { %v6677_v43 = vpack.c.bf16 %v1491_v50, %v1487_v28 }
 0x2b2   :  { %v5787_v21 = vpop.eup %5786 }
 0x2b3   :  { %v6558_v24 = vmul.f32 %v5787_v21, %v5785_v20  ;;  %v1466_v21 = vld [vmem:[#allocation9 + $0xa8] sm:$0xff] }
 0x2b5   :  { %1088 = vmatmul.mubr.f32.vlgmr.msra.gmra.mrb[4].mxu0 %v6558_v24  ;;  %1159 = vmatmul.mubr.f32.vlgmr.msra.gmra.mrb[4].mxu1 %v6558_v24 }
 0x2b6   :  { %1330 = vmatprep.mubr.f32.mxu0 %v6186_v0  ;;  %1401 = vmatprep.mubr.f32.mxu1 %v6186_v0 }
 0x2b7   :  { %4697 = vmatpush1.bf16.msra.mxu0 %v6568_v63  ;;  %4729 = vmatpush1.bf16.msra.mxu1 %v6571_v45 }
 0x2b8   :  { %4699 = vmatprep.subr.bf16.mxu0 %v6576_v57  ;;  %4731 = vmatprep.subr.bf16.mxu1 %v6578_v5 }
 0x2bb   :  { %4701 = vmatpush1.bf16.msra.mxu0 %v6580_v7  ;;  %4733 = vmatpush1.bf16.msra.mxu1 %v6583_v12 }
 0x2bc   :  { %4703 = vmatprep.subr.bf16.mxu0 %v6355_v3  ;;  %4735 = vmatprep.subr.bf16.mxu1 %v6358_v6 }
 0x2bf   :  { %4705 = vmatpush1.bf16.msra.mxu0 %v6361_v10  ;;  %4737 = vmatpush1.bf16.msra.mxu1 %v6365_v13 }
 0x2c0   :  { %4707 = vmatprep.subr.bf16.mxu0 %v6369_v16  ;;  %4739 = vmatprep.subr.bf16.mxu1 %v6372_v19 }
 0x2c3   :  { %4709 = vmatpush1.bf16.msra.mxu0 %v6375_v23  ;;  %4741 = vmatpush1.bf16.msra.mxu1 %v6379_v26 }
 0x2c4   :  { %4711 = vmatprep.subr.bf16.mxu0 %v6383_v29  ;;  %4743 = vmatprep.subr.bf16.mxu1 %v6386_v32 }
 0x2c7   :  { %4713 = vmatpush1.bf16.msra.mxu0 %v6389_v36  ;;  %4745 = vmatpush1.bf16.msra.mxu1 %v6393_v40 }
 0x2c8   :  { %4715 = vmatprep.subr.bf16.mxu0 %v6397_v44  ;;  %4747 = vmatprep.subr.bf16.mxu1 %v6400_v48 }
 0x2cb   :  { %4717 = vmatpush1.bf16.msra.mxu0 %v6403_v54  ;;  %4749 = vmatpush1.bf16.msra.mxu1 %v6407_v58 }
 0x2cc   :  { %4719 = vmatprep.subr.bf16.mxu0 %v6411_v62  ;;  %4751 = vmatprep.subr.bf16.mxu1 %v6414_v4 }
 0x2cf   :  { %4721 = vmatpush1.bf16.msra.mxu0 %v6417_v9  ;;  %4753 = vmatpush1.bf16.msra.mxu1 %v6421_v14 }
 0x2d0   :  { %4723 = vmatprep.subr.bf16.mxu0 %v6425_v18  ;;  %4755 = vmatprep.subr.bf16.mxu1 %v6428_v22 }
 0x2d3   :  { %4725 = vmatpush1.bf16.msra.mxu0 %v6431_v25  ;;  %4757 = vmatpush1.bf16.msra.mxu1 %v6435_v27 }
 0x2d4   :  { %4759 = vmatprep.subr.bf16.mxu0 %v6564_v47  ;;  %4791 = vmatprep.subr.bf16.mxu1 %v6566_v60 }
 0x388   :  { %v1089_v3 = vpop.f32.mrb[4].mxu0  ;;  %v1160_v6 = vpop.f32.mrb[4].mxu1 }
 0x389   :  { %v5618_v10 = vadd.f32 %v1089_v3, %v6491_v35  ;;  %v1091_v13 = vpop.f32.mrb[5].mxu0  ;;  %v1162_v16 = vpop.f32.mrb[5].mxu1  ;;  %v5634_v36 = vadd.f32 %v1160_v6, %v6508_v59  ;;  %v1473_v3 = vld [vmem:[#allocation9 + $0xe0] sm:$0xff]  ;;  %v6648_v6 = vpack.c.bf16 %v1476_v8, %v1472_v1  ;;  %v6680_v1 = vpack.c.bf16 %v1498_v46, %v1494_v53 }
 0x38a   :  { %v5619_v19 = vadd.f32 %v1091_v13, %v6495_v38  ;;  %v5635_v29 = vadd.f32 %v1162_v16, %v6502_v52  ;;  %v1471_v13 = vld [vmem:[#allocation9 + $0xd0] sm:$0xff]  ;;  %v6682_v8 = vpack.c.bf16 %v1500_v61, %v1496_v51 }
 0x38b   :  { %v4343_v23 = vmul.f32 -1.442695, %v5618_v10  ;;  %v6650_v10 = vpack.c.bf16 %v1473_v3, %v1469_v11  ;;  %v1475_v16 = vld [vmem:[#allocation9 + $0xf0] sm:$0xff]  ;;  %v1493_v11 = vld [vmem:[#allocation9 + $0x180] sm:$0xff] }
 0x38c   :  { %v4344_v26 = vmul.f32 -1.442695, %v5619_v19  ;;  %v4345_v32 = vmul.f32 -1.442695, %v5635_v29  ;;  %v6653_v19 = vpack.c.bf16 %v1475_v16, %v1471_v13  ;;  %v1480_v29 = vld [vmem:[#allocation9 + $0x118] sm:$0xff]  ;;  %v1497_v3 = vld [vmem:[#allocation9 + $0x1a0] sm:$0xff] }
 0x38d   :  { %5788 = vpow2.f32 %v4343_v23  ;;  %v1478_v23 = vld [vmem:[#allocation9 + $0x108] sm:$0xff]  ;;  %v1495_v13 = vld [vmem:[#allocation9 + $0x190] sm:$0xff]  ;;  %v6685_v16 = vpack.c.bf16 %v1497_v3, %v1493_v11 }
 0x38e   :  { %5790 = vpow2.f32 %v4344_v26  ;;  %v1482_v26 = vld [vmem:[#allocation9 + $0x128] sm:$0xff] }
 0x38f   :  { %5792 = vpow2.f32 %v4345_v32  ;;  %v6658_v32 = vpack.c.bf16 %v1482_v26, %v1478_v23  ;;  %v1499_v23 = vld [vmem:[#allocation9 + $0x1b0] sm:$0xff]  ;;  %v1502_v26 = vld [vmem:[#allocation9 + $0x1c8] sm:$0xff] }
 0x390   :  { %5794 = vtanh.f32 %v5634_v36  ;;  %v1484_v36 = vld [vmem:[#allocation9 + $0x138] sm:$0xff] }
 0x397   :  { %v5789_v40 = vpop.eup %5788 }
 0x398   :  { %v5791_v44 = vpop.eup %5790  ;;  %v1172_v48 = vadd.f32 1.0, %v5789_v40  ;;  %v1477_v40 = vld [vmem:[#allocation9 + $0x100] sm:$0xff] }
 0x399   :  { %v1178_v54 = vadd.f32 1.0, %v5791_v44  ;;  %v5793_v58 = vpop.eup %5792  ;;  %v1481_v44 = vld [vmem:[#allocation9 + $0x120] sm:$0xff] }
 0x39a   :  { %5796 = vrcp.f32 %v1172_v48  ;;  %v5795_v62 = vpop.eup %5794  ;;  %v1185_v18 = vadd.f32 1.0, %v5793_v58  ;;  %v6660_v48 = vpack.c.bf16 %v1484_v36, %v1480_v29  ;;  %v1479_v58 = vld [vmem:[#allocation9 + $0x110] sm:$0xff]  ;;  %v1506_v29 = vld [vmem:[#allocation9 + $0x1e8] sm:$0xff]  ;;  %v6689_v36 = vpack.c.bf16 %v1499_v23, %v1495_v13 }
 0x39b   :  { %5798 = vrcp.f32 %v1178_v54  ;;  %v6662_v54 = vpack.c.bf16 %v1481_v44, %v1477_v40  ;;  %v6691_v40 = vpack.c.bf16 %v1506_v29, %v1502_v26  ;;  %v1504_v44 = vld [vmem:[#allocation9 + $0x1d8] sm:$0xff] }
 0x39c   :  { %5800 = vrcp.f32 %v1185_v18  ;;  %v1488_v18 = vld [vmem:[#allocation9 + $0x158] sm:$0xff] }
 0x3a4   :  { %v5797_v4 = vpop.eup %5796 }
 0x3a5   :  { %v5799_v9 = vpop.eup %5798  ;;  %v1189_v14 = vmul.f32 %v5797_v4, %v5795_v62  ;;  %v1483_v62 = vld [vmem:[#allocation9 + $0x130] sm:$0xff] }
 0x3a6   :  { %v1188_v22 = vmul.f32 %v5799_v9, %v6555_v17  ;;  %v5801_v27 = vpop.eup %5800  ;;  %v1462_v17 = vld [vmem:[#allocation9 + $0x88] sm:$0xff]  ;;  %v6665_v4 = vpack.c.bf16 %v1483_v62, %v1479_v58  ;;  %v1508_v58 = vld [vmem:[#allocation9 + $0x1f8] sm:$0xff]  ;;  %v1501_v62 = vld [vmem:[#allocation9 + $0x1c0] sm:$0xff] }
 0x3a7   :  { %v6634_v41 = vpack.c.bf16 %v1466_v21, %v1462_v17  ;;  %v1486_v9 = vld [vmem:[#allocation9 + $0x148] sm:$0xff]  ;;  %v1489_v17 = vld [vmem:[#allocation9 + $0x160] sm:$0xff] }
 0x3a8   :  { %v6619_v25 = vadd.f32 %v1189_v14, %v1188_v22  ;;  %v1490_v14 = vld [vmem:[#allocation9 + $0x168] sm:$0xff] }
 0x3a9   :  { %v6669_v22 = vpack.c.bf16 %v1490_v14, %v1486_v9  ;;  %v6694_v9 = vpack.c.bf16 %v1508_v58, %v1504_v44  ;;  %v1505_v14 = vld [vmem:[#allocation9 + $0x1e0] sm:$0xff] }
 0x3aa   :  { %5802 = vtanh.f32 %v6619_v25 }
 0x3b4   :  { %v5803_v15 = vpop.eup %5802 }
 0x3b5   :  { %v6622_v20 = vmul.f32 %v5803_v15, %v5801_v27  ;;  %v1492_v27 = vld [vmem:[#allocation9 + $0x178] sm:$0xff]  ;;  %v1485_v15 = vld [vmem:[#allocation9 + $0x140] sm:$0xff] }
 0x3b6   :  { %v6672_v21 = vpack.c.bf16 %v1492_v27, %v1488_v18  ;;  %v6674_v33 = vpack.c.bf16 %v1489_v17, %v1485_v15  ;;  %v1503_v18 = vld [vmem:[#allocation9 + $0x1d0] sm:$0xff]  ;;  %v6697_v15 = vpack.c.bf16 %v1505_v14, %v1501_v62 }
 0x3b7   :  { %1331 = vmatmul.mubr.f32.vlgmr.msra.gmra.mrb[6].mxu0 %v6622_v20  ;;  %1402 = vmatmul.mubr.f32.vlgmr.msra.gmra.mrb[6].mxu1 %v6622_v20  ;;  %v1507_v27 = vld [vmem:[#allocation9 + $0x1f0] sm:$0xff] }
 0x3b8   :  { %4761 = vmatpush1.bf16.msra.mxu0 %v6568_v63  ;;  %4793 = vmatpush1.bf16.msra.mxu1 %v6571_v45  ;;  %v6701_v17 = vpack.c.bf16 %v1507_v27, %v1503_v18 }
 0x3b9   :  { %4763 = vmatprep.subr.bf16.mxu0 %v6576_v57  ;;  %4795 = vmatprep.subr.bf16.mxu1 %v6578_v5 }
 0x3ba   :  { %1573 = vmatprep.mubr.f32.mxu0 %v6186_v0  ;;  %1644 = vmatprep.mubr.f32.mxu1 %v6186_v0 }
 0x3bc   :  { %4765 = vmatpush1.bf16.msra.mxu0 %v6580_v7  ;;  %4797 = vmatpush1.bf16.msra.mxu1 %v6583_v12 }
 0x3bd   :  { %4767 = vmatprep.subr.bf16.mxu0 %v6634_v41  ;;  %4799 = vmatprep.subr.bf16.mxu1 %v6636_v56 }
 0x3c0   :  { %4769 = vmatpush1.bf16.msra.mxu0 %v6638_v42  ;;  %4801 = vmatpush1.bf16.msra.mxu1 %v6641_v49 }
 0x3c1   :  { %4771 = vmatprep.subr.bf16.mxu0 %v6646_v2  ;;  %4803 = vmatprep.subr.bf16.mxu1 %v6648_v6 }
 0x3c4   :  { %4773 = vmatpush1.bf16.msra.mxu0 %v6650_v10  ;;  %4805 = vmatpush1.bf16.msra.mxu1 %v6653_v19 }
 0x3c5   :  { %4775 = vmatprep.subr.bf16.mxu0 %v6658_v32  ;;  %4807 = vmatprep.subr.bf16.mxu1 %v6660_v48 }
 0x3c8   :  { %4777 = vmatpush1.bf16.msra.mxu0 %v6662_v54  ;;  %4809 = vmatpush1.bf16.msra.mxu1 %v6665_v4 }
 0x3c9   :  { %4779 = vmatprep.subr.bf16.mxu0 %v6669_v22  ;;  %4811 = vmatprep.subr.bf16.mxu1 %v6672_v21 }
 0x3cc   :  { %4781 = vmatpush1.bf16.msra.mxu0 %v6674_v33  ;;  %4813 = vmatpush1.bf16.msra.mxu1 %v6677_v43 }
 0x3cd   :  { %4783 = vmatprep.subr.bf16.mxu0 %v6680_v1  ;;  %4815 = vmatprep.subr.bf16.mxu1 %v6682_v8 }
 0x3d0   :  { %4785 = vmatpush1.bf16.msra.mxu0 %v6685_v16  ;;  %4817 = vmatpush1.bf16.msra.mxu1 %v6689_v36 }
 0x3d1   :  { %4787 = vmatprep.subr.bf16.mxu0 %v6691_v40  ;;  %4819 = vmatprep.subr.bf16.mxu1 %v6694_v9 }
 0x3d4   :  { %4789 = vmatpush1.bf16.msra.mxu0 %v6697_v15  ;;  %4821 = vmatpush1.bf16.msra.mxu1 %v6701_v17 }
 0x3d5   :  { %4823 = vmatprep.subr.bf16.mxu0 %v6564_v47  ;;  %4855 = vmatprep.subr.bf16.mxu1 %v6566_v60 }
 0x48a   :  { %v1332_v28 = vpop.f32.mrb[6].mxu0  ;;  %v1403_v50 = vpop.f32.mrb[6].mxu1 }
 0x48b   :  { %v5620_v53 = vadd.f32 %v1332_v28, %v6491_v35  ;;  %v1334_v46 = vpop.f32.mrb[7].mxu0  ;;  %v1405_v51 = vpop.f32.mrb[7].mxu1  ;;  %v5636_v26 = vadd.f32 %v1403_v50, %v6508_v59 }
 0x48c   :  { %v5621_v61 = vadd.f32 %v1334_v46, %v6495_v38  ;;  %v5637_v13 = vadd.f32 %v1405_v51, %v6502_v52 }
 0x48d   :  { %v4346_v11 = vmul.f32 -1.442695, %v5620_v53 }
 0x48e   :  { %v4347_v3 = vmul.f32 -1.442695, %v5621_v61  ;;  %v4348_v23 = vmul.f32 -1.442695, %v5637_v13 }
 0x48f   :  { %5804 = vpow2.f32 %v4346_v11 }
 0x490   :  { %5806 = vpow2.f32 %v4347_v3 }
 0x491   :  { %5808 = vpow2.f32 %v4348_v23 }
 0x492   :  { %5810 = vtanh.f32 %v5636_v26 }
 0x499   :  { %v5805_v29 = vpop.eup %5804 }
 0x49a   :  { %v5807_v44 = vpop.eup %5806  ;;  %v1415_v58 = vadd.f32 1.0, %v5805_v29 }
 0x49b   :  { %v1421_v62 = vadd.f32 1.0, %v5807_v44  ;;  %v5809_v14 = vpop.eup %5808 }
 0x49c   :  { %5812 = vrcp.f32 %v1415_v58  ;;  %v5811_v18 = vpop.eup %5810  ;;  %v1428_v46 = vadd.f32 1.0, %v5809_v14 }
 0x49d   :  { %5814 = vrcp.f32 %v1421_v62 }
 0x49e   :  { %5816 = vrcp.f32 %v1428_v46 }
 0x4a6   :  { %v5813_v27 = vpop.eup %5812 }
 0x4a7   :  { %v5815_v28 = vpop.eup %5814  ;;  %v1432_v53 = vmul.f32 %v5813_v27, %v5811_v18 }
 0x4a8   :  { %v1431_v61 = vmul.f32 %v5815_v28, %v6619_v25  ;;  %v5817_v50 = vpop.eup %5816 }
 0x4aa   :  { %v6713_v51 = vadd.f32 %v1432_v53, %v1431_v61 }
 0x4ac   :  { %5818 = vtanh.f32 %v6713_v51 }
 0x4b6   :  { %v5819_v11 = vpop.eup %5818 }
 0x4b7   :  { %v6716_v3 = vmul.f32 %v5819_v11, %v5817_v50 }
 0x4b9   :  { %1574 = vmatmul.mubr.f32.vlgmr.msra.gmra.mrb[8].mxu0 %v6716_v3  ;;  %1645 = vmatmul.mubr.f32.vlgmr.msra.gmra.mrb[8].mxu1 %v6716_v3 }
 0x4ba   :  { %4825 = vmatpush1.bf16.msra.mxu0 %v6568_v63  ;;  %4857 = vmatpush1.bf16.msra.mxu1 %v6571_v45 }
 0x4bb   :  { %4827 = vmatprep.subr.bf16.mxu0 %v6576_v57  ;;  %4859 = vmatprep.subr.bf16.mxu1 %v6578_v5 }
 0x4bc   :  { %1816 = vmatprep.mubr.f32.mxu0 %v6186_v0  ;;  %1887 = vmatprep.mubr.f32.mxu1 %v6186_v0 }
 0x4be   :  { %4829 = vmatpush1.bf16.msra.mxu0 %v6580_v7  ;;  %4861 = vmatpush1.bf16.msra.mxu1 %v6583_v12 }
 0x4bf   :  { %4831 = vmatprep.subr.bf16.mxu0 %v6634_v41  ;;  %4863 = vmatprep.subr.bf16.mxu1 %v6636_v56 }
 0x4c2   :  { %4833 = vmatpush1.bf16.msra.mxu0 %v6638_v42  ;;  %4865 = vmatpush1.bf16.msra.mxu1 %v6641_v49 }
 0x4c3   :  { %4835 = vmatprep.subr.bf16.mxu0 %v6646_v2  ;;  %4867 = vmatprep.subr.bf16.mxu1 %v6648_v6 }
 0x4c6   :  { %4837 = vmatpush1.bf16.msra.mxu0 %v6650_v10  ;;  %4869 = vmatpush1.bf16.msra.mxu1 %v6653_v19 }
 0x4c7   :  { %4839 = vmatprep.subr.bf16.mxu0 %v6658_v32  ;;  %4871 = vmatprep.subr.bf16.mxu1 %v6660_v48 }
 0x4ca   :  { %4841 = vmatpush1.bf16.msra.mxu0 %v6662_v54  ;;  %4873 = vmatpush1.bf16.msra.mxu1 %v6665_v4 }
 0x4cb   :  { %4843 = vmatprep.subr.bf16.mxu0 %v6669_v22  ;;  %4875 = vmatprep.subr.bf16.mxu1 %v6672_v21 }
 0x4ce   :  { %4845 = vmatpush1.bf16.msra.mxu0 %v6674_v33  ;;  %4877 = vmatpush1.bf16.msra.mxu1 %v6677_v43 }
 0x4cf   :  { %4847 = vmatprep.subr.bf16.mxu0 %v6680_v1  ;;  %4879 = vmatprep.subr.bf16.mxu1 %v6682_v8 }
 0x4d2   :  { %4849 = vmatpush1.bf16.msra.mxu0 %v6685_v16  ;;  %4881 = vmatpush1.bf16.msra.mxu1 %v6689_v36 }
 0x4d3   :  { %4851 = vmatprep.subr.bf16.mxu0 %v6691_v40  ;;  %4883 = vmatprep.subr.bf16.mxu1 %v6694_v9 }
 0x4d6   :  { %4853 = vmatpush1.bf16.msra.mxu0 %v6697_v15  ;;  %4885 = vmatpush1.bf16.msra.mxu1 %v6701_v17 }
 0x4d7   :  { %4887 = vmatprep.subr.bf16.mxu0 %v6564_v47  ;;  %4919 = vmatprep.subr.bf16.mxu1 %v6566_v60 }
 0x58c   :  { %v1575_v25 = vpop.f32.mrb[8].mxu0  ;;  %v1646_v13 = vpop.f32.mrb[8].mxu1 }
 0x58d   :  { %v5622_v23 = vadd.f32 %v1575_v25, %v6491_v35  ;;  %v1577_v26 = vpop.f32.mrb[9].mxu0  ;;  %v1648_v29 = vpop.f32.mrb[9].mxu1  ;;  %v5638_v27 = vadd.f32 %v1646_v13, %v6508_v59 }
 0x58e   :  { %v5623_v44 = vadd.f32 %v1577_v26, %v6495_v38  ;;  %v5639_v14 = vadd.f32 %v1648_v29, %v6502_v52 }
 0x58f   :  { %v4349_v58 = vmul.f32 -1.442695, %v5622_v23 }
 0x590   :  { %v4350_v62 = vmul.f32 -1.442695, %v5623_v44  ;;  %v4351_v18 = vmul.f32 -1.442695, %v5639_v14 }
 0x591   :  { %5820 = vpow2.f32 %v4349_v58 }
 0x592   :  { %5822 = vpow2.f32 %v4350_v62 }
 0x593   :  { %5824 = vpow2.f32 %v4351_v18 }
 0x594   :  { %5826 = vtanh.f32 %v5638_v27 }
 0x59b   :  { %v5821_v47 = vpop.eup %5820 }
 0x59c   :  { %v5823_v28 = vpop.eup %5822  ;;  %v1658_v60 = vadd.f32 1.0, %v5821_v47 }
 0x59d   :  { %v1664_v53 = vadd.f32 1.0, %v5823_v28  ;;  %v5825_v46 = vpop.eup %5824 }
 0x59e   :  { %5828 = vrcp.f32 %v1658_v60  ;;  %v5827_v61 = vpop.eup %5826  ;;  %v1671_v23 = vadd.f32 1.0, %v5825_v46 }
 0x59f   :  { %5830 = vrcp.f32 %v1664_v53 }
 0x5a0   :  { %5832 = vrcp.f32 %v1671_v23 }
 0x5a8   :  { %v5829_v50 = vpop.eup %5828 }
 0x5a9   :  { %v5831_v11 = vpop.eup %5830  ;;  %v1675_v25 = vmul.f32 %v5829_v50, %v5827_v61 }
 0x5aa   :  { %v1674_v26 = vmul.f32 %v5831_v11, %v6713_v51  ;;  %v5833_v13 = vpop.eup %5832 }
 0x5ac   :  { %v6759_v29 = vadd.f32 %v1675_v25, %v1674_v26 }
 0x5ae   :  { %5834 = vtanh.f32 %v6759_v29 }
 0x5b8   :  { %v5835_v44 = vpop.eup %5834 }
 0x5b9   :  { %v6762_v58 = vmul.f32 %v5835_v44, %v5833_v13 }
 0x5bb   :  { %1817 = vmatmul.mubr.f32.vlgmr.msra.gmra.mrb[10].mxu0 %v6762_v58  ;;  %1888 = vmatmul.mubr.f32.vlgmr.msra.gmra.mrb[10].mxu1 %v6762_v58 }
 0x5bc   :  { %4889 = vmatpush1.bf16.msra.mxu0 %v6568_v63  ;;  %4921 = vmatpush1.bf16.msra.mxu1 %v6571_v45 }
 0x5bd   :  { %4891 = vmatprep.subr.bf16.mxu0 %v6576_v57  ;;  %4923 = vmatprep.subr.bf16.mxu1 %v6578_v5 }
 0x5be   :  { %2059 = vmatprep.mubr.f32.mxu0 %v6186_v0  ;;  %2130 = vmatprep.mubr.f32.mxu1 %v6186_v0 }
 0x5c0   :  { %4893 = vmatpush1.bf16.msra.mxu0 %v6580_v7  ;;  %4925 = vmatpush1.bf16.msra.mxu1 %v6583_v12 }
 0x5c1   :  { %4895 = vmatprep.subr.bf16.mxu0 %v6634_v41  ;;  %4927 = vmatprep.subr.bf16.mxu1 %v6636_v56 }
 0x5c4   :  { %4897 = vmatpush1.bf16.msra.mxu0 %v6638_v42  ;;  %4929 = vmatpush1.bf16.msra.mxu1 %v6641_v49 }
 0x5c5   :  { %4899 = vmatprep.subr.bf16.mxu0 %v6646_v2  ;;  %4931 = vmatprep.subr.bf16.mxu1 %v6648_v6 }
 0x5c8   :  { %4901 = vmatpush1.bf16.msra.mxu0 %v6650_v10  ;;  %4933 = vmatpush1.bf16.msra.mxu1 %v6653_v19 }
 0x5c9   :  { %4903 = vmatprep.subr.bf16.mxu0 %v6658_v32  ;;  %4935 = vmatprep.subr.bf16.mxu1 %v6660_v48 }
 0x5cc   :  { %4905 = vmatpush1.bf16.msra.mxu0 %v6662_v54  ;;  %4937 = vmatpush1.bf16.msra.mxu1 %v6665_v4 }
 0x5cd   :  { %4907 = vmatprep.subr.bf16.mxu0 %v6669_v22  ;;  %4939 = vmatprep.subr.bf16.mxu1 %v6672_v21 }
 0x5d0   :  { %4909 = vmatpush1.bf16.msra.mxu0 %v6674_v33  ;;  %4941 = vmatpush1.bf16.msra.mxu1 %v6677_v43 }
 0x5d1   :  { %4911 = vmatprep.subr.bf16.mxu0 %v6680_v1  ;;  %4943 = vmatprep.subr.bf16.mxu1 %v6682_v8 }
 0x5d4   :  { %4913 = vmatpush1.bf16.msra.mxu0 %v6685_v16  ;;  %4945 = vmatpush1.bf16.msra.mxu1 %v6689_v36 }
 0x5d5   :  { %4915 = vmatprep.subr.bf16.mxu0 %v6691_v40  ;;  %4947 = vmatprep.subr.bf16.mxu1 %v6694_v9 }
 0x5d8   :  { %4917 = vmatpush1.bf16.msra.mxu0 %v6697_v15  ;;  %4949 = vmatpush1.bf16.msra.mxu1 %v6701_v17 }
 0x68e   :  { %v1818_v63 = vpop.f32.mrb[10].mxu0  ;;  %v1889_v45 = vpop.f32.mrb[10].mxu1 }
 0x68f   :  { %v5624_v57 = vadd.f32 %v1818_v63, %v6491_v35  ;;  %v1820_v5 = vpop.f32.mrb[11].mxu0  ;;  %v1891_v7 = vpop.f32.mrb[11].mxu1  ;;  %v5640_v27 = vadd.f32 %v1889_v45, %v6508_v59 }
 0x690   :  { %v5625_v12 = vadd.f32 %v1820_v5, %v6495_v38  ;;  %v5641_v14 = vadd.f32 %v1891_v7, %v6502_v52  ;;  %v2179_v5 = vld [vmem:[#allocation9 + $0x28] sm:$0xff] }
 0x691   :  { %v4352_v51 = vmul.f32 -1.442695, %v5624_v57  ;;  %v2175_v57 = vld [vmem:[#allocation9 + $0x8] sm:$0xff] }
 0x692   :  { %v4353_v62 = vmul.f32 -1.442695, %v5625_v12  ;;  %v4354_v18 = vmul.f32 -1.442695, %v5641_v14  ;;  %v4950_v7 = vpack.c.bf16 %v2179_v5, %v2175_v57  ;;  %v2181_v12 = vld [vmem:[#allocation9 + $0x38] sm:$0xff] }
 0x693   :  { %5836 = vpow2.f32 %v4352_v51  ;;  %v2174_v51 = vld [vmem:[#allocation9] sm:$0xff] }
 0x694   :  { %5838 = vpow2.f32 %v4353_v62  ;;  %v2178_v62 = vld [vmem:[#allocation9 + $0x20] sm:$0xff]  ;;  %4951 = vmatprep.subr.bf16.mxu0 %v4950_v7 }
 0x695   :  { %5840 = vpow2.f32 %v4354_v18  ;;  %v4952_v18 = vpack.c.bf16 %v2178_v62, %v2174_v51  ;;  %v2418_v62 = vld [vmem:[#allocation10] sm:$0xff] }
 0x696   :  { %5842 = vtanh.f32 %v5640_v27  ;;  %v2176_v27 = vld [vmem:[#allocation9 + $0x10] sm:$0xff] }
 0x69d   :  { %v5837_v47 = vpop.eup %5836 }
 0x69e   :  { %v5839_v28 = vpop.eup %5838  ;;  %v1901_v60 = vadd.f32 1.0, %v5837_v47  ;;  %v2180_v47 = vld [vmem:[#allocation9 + $0x30] sm:$0xff] }
 0x69f   :  { %v1907_v53 = vadd.f32 1.0, %v5839_v28  ;;  %v5841_v46 = vpop.eup %5840  ;;  %v4984_v28 = vpack.c.bf16 %v2180_v47, %v2176_v27  ;;  %v2424_v27 = vld [vmem:[#allocation10 + $0x30] sm:$0xff]  ;;  %v2427_v47 = vld [vmem:[#allocation10 + $0x48] sm:$0xff] }
 0x6a0   :  { %5844 = vrcp.f32 %v1901_v60  ;;  %v5843_v61 = vpop.eup %5842  ;;  %v1914_v23 = vadd.f32 1.0, %v5841_v46  ;;  %v2183_v60 = vld [vmem:[#allocation9 + $0x48] sm:$0xff]  ;;  %v2185_v46 = vld [vmem:[#allocation9 + $0x58] sm:$0xff] }
 0x6a1   :  { %5846 = vrcp.f32 %v1907_v53  ;;  %v2187_v53 = vld [vmem:[#allocation9 + $0x68] sm:$0xff] }
 0x6a2   :  { %5848 = vrcp.f32 %v1914_v23 }
 0x6aa   :  { %v5845_v50 = vpop.eup %5844 }
 0x6ab   :  { %v5847_v11 = vpop.eup %5846  ;;  %v1918_v25 = vmul.f32 %v5845_v50, %v5843_v61  ;;  %v4954_v61 = vpack.c.bf16 %v2187_v53, %v2183_v60  ;;  %v2189_v50 = vld [vmem:[#allocation9 + $0x78] sm:$0xff] }
 0x6ac   :  { %v1917_v26 = vmul.f32 %v5847_v11, %v6759_v29  ;;  %v5849_v44 = vpop.eup %5848  ;;  %v2177_v29 = vld [vmem:[#allocation9 + $0x18] sm:$0xff]  ;;  %v2182_v11 = vld [vmem:[#allocation9 + $0x40] sm:$0xff]  ;;  %v4986_v23 = vpack.c.bf16 %v2189_v50, %v2185_v46 }
 0x6ad   :  { %v4982_v14 = vpack.c.bf16 %v2181_v12, %v2177_v29  ;;  %v2429_v60 = vld [vmem:[#allocation10 + $0x58] sm:$0xff] }
 0x6ae   :  { %v6803_v13 = vadd.f32 %v1918_v25, %v1917_v26  ;;  %v2186_v25 = vld [vmem:[#allocation9 + $0x60] sm:$0xff]  ;;  %v2433_v53 = vld [vmem:[#allocation10 + $0x78] sm:$0xff] }
 0x6af   :  { %4983 = vmatprep.subr.bf16.mxu1 %v4982_v14  ;;  %v4956_v26 = vpack.c.bf16 %v2186_v25, %v2182_v11  ;;  %v2422_v14 = vld [vmem:[#allocation10 + $0x20] sm:$0xff] }
 0x6b0   :  { %5850 = vtanh.f32 %v6803_v13  ;;  %v5016_v50 = vpack.c.bf16 %v2422_v14, %v2418_v62  ;;  %v2426_v25 = vld [vmem:[#allocation10 + $0x40] sm:$0xff] }
 0x6ba   :  { %v5851_v63 = vpop.eup %5850 }
 0x6bb   :  { %v6806_v45 = vmul.f32 %v5851_v63, %v5849_v44  ;;  %v2184_v44 = vld [vmem:[#allocation9 + $0x50] sm:$0xff] }
 0x6bc   :  { %v2188_v63 = vld [vmem:[#allocation9 + $0x70] sm:$0xff] }
 0x6bd   :  { %2060 = vmatmul.mubr.f32.vlgmr.msra.gmra.mrb[12].mxu0 %v6806_v45  ;;  %2131 = vmatmul.mubr.f32.vlgmr.msra.gmra.mrb[12].mxu1 %v6806_v45  ;;  %v4988_v57 = vpack.c.bf16 %v2188_v63, %v2184_v44  ;;  %v5050_v44 = vpack.c.bf16 %v2433_v53, %v2429_v60  ;;  %v2428_v63 = vld [vmem:[#allocation10 + $0x50] sm:$0xff] }
 0x6be   :  { %2302 = vmatprep.mubr.f32.mxu0 %v6186_v0  ;;  %2373 = vmatprep.mubr.f32.mxu1 %v6186_v0  ;;  %v2452_v60 = vld [vmem:[#allocation10 + $0x110] sm:$0xff] }
 0x6bf   :  { %4953 = vmatpush1.bf16.msra.mxu0 %v4952_v18  ;;  %4985 = vmatpush1.bf16.msra.mxu1 %v4984_v28  ;;  %v2420_v18 = vld [vmem:[#allocation10 + $0x10] sm:$0xff]  ;;  %v2431_v28 = vld [vmem:[#allocation10 + $0x68] sm:$0xff] }
 0x6c0   :  { %4955 = vmatprep.subr.bf16.mxu0 %v4954_v61  ;;  %4987 = vmatprep.subr.bf16.mxu1 %v4986_v23  ;;  %v5048_v11 = vpack.c.bf16 %v2424_v27, %v2420_v18  ;;  %v2430_v23 = vld [vmem:[#allocation10 + $0x60] sm:$0xff]  ;;  %v2456_v53 = vld [vmem:[#allocation10 + $0x130] sm:$0xff] }
 0x6c1   :  { %v2450_v18 = vld [vmem:[#allocation10 + $0x100] sm:$0xff] }
 0x6c2   :  { %v2454_v27 = vld [vmem:[#allocation10 + $0x120] sm:$0xff] }
 0x6c3   :  { %4957 = vmatpush1.bf16.msra.mxu0 %v4956_v26  ;;  %4989 = vmatpush1.bf16.msra.mxu1 %v4988_v57  ;;  %v5018_v26 = vpack.c.bf16 %v2431_v28, %v2427_v47  ;;  %v2432_v57 = vld [vmem:[#allocation10 + $0x70] sm:$0xff] }
 0x6c4   :  { %4959 = vmatprep.subr.bf16.mxu0 %v6634_v41  ;;  %4991 = vmatprep.subr.bf16.mxu1 %v6636_v56  ;;  %v2419_v41 = vld [vmem:[#allocation10 + $0x8] sm:$0xff] }
 0x6c5   :  { %v2423_v56 = vld [vmem:[#allocation10 + $0x28] sm:$0xff] }
 0x6c7   :  { %4961 = vmatpush1.bf16.msra.mxu0 %v6638_v42  ;;  %4993 = vmatpush1.bf16.msra.mxu1 %v6641_v49  ;;  %v2421_v42 = vld [vmem:[#allocation10 + $0x18] sm:$0xff] }
 0x6c8   :  { %4963 = vmatprep.subr.bf16.mxu0 %v6646_v2  ;;  %4995 = vmatprep.subr.bf16.mxu1 %v6648_v6  ;;  %v2425_v49 = vld [vmem:[#allocation10 + $0x38] sm:$0xff]  ;;  %v5014_v2 = vpack.c.bf16 %v2423_v56, %v2419_v41  ;;  %v2435_v41 = vld [vmem:[#allocation10 + $0x88] sm:$0xff] }
 0x6c9   :  { %v5046_v6 = vpack.c.bf16 %v2425_v49, %v2421_v42  ;;  %v2439_v56 = vld [vmem:[#allocation10 + $0xa8] sm:$0xff]  ;;  %v2437_v42 = vld [vmem:[#allocation10 + $0x98] sm:$0xff] }
 0x6ca   :  { %v2441_v49 = vld [vmem:[#allocation10 + $0xb8] sm:$0xff] }
 0x6cb   :  { %4965 = vmatpush1.bf16.msra.mxu0 %v6650_v10  ;;  %4997 = vmatpush1.bf16.msra.mxu1 %v6653_v19 }
 0x6cc   :  { %4967 = vmatprep.subr.bf16.mxu0 %v6658_v32  ;;  %4999 = vmatprep.subr.bf16.mxu1 %v6660_v48 }
 0x6cf   :  { %4969 = vmatpush1.bf16.msra.mxu0 %v6662_v54  ;;  %5001 = vmatpush1.bf16.msra.mxu1 %v6665_v4 }
 0x6d0   :  { %4971 = vmatprep.subr.bf16.mxu0 %v6669_v22  ;;  %5003 = vmatprep.subr.bf16.mxu1 %v6672_v21 }
 0x6d3   :  { %4973 = vmatpush1.bf16.msra.mxu0 %v6674_v33  ;;  %5005 = vmatpush1.bf16.msra.mxu1 %v6677_v43 }
 0x6d4   :  { %4975 = vmatprep.subr.bf16.mxu0 %v6680_v1  ;;  %5007 = vmatprep.subr.bf16.mxu1 %v6682_v8 }
 0x6d7   :  { %4977 = vmatpush1.bf16.msra.mxu0 %v6685_v16  ;;  %5009 = vmatpush1.bf16.msra.mxu1 %v6689_v36 }
 0x6d8   :  { %4979 = vmatprep.subr.bf16.mxu0 %v6691_v40  ;;  %5011 = vmatprep.subr.bf16.mxu1 %v6694_v9 }
 0x6db   :  { %4981 = vmatpush1.bf16.msra.mxu0 %v6697_v15  ;;  %5013 = vmatpush1.bf16.msra.mxu1 %v6701_v17 }
 0x6dc   :  { %5015 = vmatprep.subr.bf16.mxu0 %v5014_v2  ;;  %5047 = vmatprep.subr.bf16.mxu1 %v5046_v6  ;;  %v5020_v2 = vpack.c.bf16 %v2430_v23, %v2426_v25  ;;  %v5052_v6 = vpack.c.bf16 %v2432_v57, %v2428_v63  ;;  %v5032_v25 = vpack.c.bf16 %v2454_v27, %v2450_v18  ;;  %v2768_v27 = vld [vmem:[#allocation12 + $0x10] sm:$0xff] }
 0x6dd   :  { %v5064_v23 = vpack.c.bf16 %v2456_v53, %v2452_v60  ;;  %v2779_v60 = vld [vmem:[#allocation12 + $0x68] sm:$0xff]  ;;  %v2777_v53 = vld [vmem:[#allocation12 + $0x58] sm:$0xff] }
 0x790   :  { %v2061_v10 = vpop.f32.mrb[12].mxu0  ;;  %v2132_v19 = vpop.f32.mrb[12].mxu1 }
 0x791   :  { %v5626_v32 = vadd.f32 %v2061_v10, %v6491_v35  ;;  %v2063_v48 = vpop.f32.mrb[13].mxu0  ;;  %v2134_v54 = vpop.f32.mrb[13].mxu1  ;;  %v5642_v1 = vadd.f32 %v2132_v19, %v6508_v59  ;;  %v2434_v10 = vld [vmem:[#allocation10 + $0x80] sm:$0xff] }
 0x792   :  { %v5627_v4 = vadd.f32 %v2063_v48, %v6495_v38  ;;  %v5643_v33 = vadd.f32 %v2134_v54, %v6502_v52  ;;  %v2438_v19 = vld [vmem:[#allocation10 + $0xa0] sm:$0xff]  ;;  %v5054_v48 = vpack.c.bf16 %v2441_v49, %v2437_v42  ;;  %v2436_v54 = vld [vmem:[#allocation10 + $0x90] sm:$0xff]  ;;  %v2467_v42 = vld [vmem:[#allocation10 + $0x188] sm:$0xff] }
 0x793   :  { %v4355_v22 = vmul.f32 -1.442695, %v5626_v32  ;;  %v5022_v32 = vpack.c.bf16 %v2439_v56, %v2435_v41  ;;  %v2460_v41 = vld [vmem:[#allocation10 + $0x150] sm:$0xff]  ;;  %v2471_v49 = vld [vmem:[#allocation10 + $0x1a8] sm:$0xff] }
 0x794   :  { %v4356_v21 = vmul.f32 -1.442695, %v5627_v4  ;;  %v4357_v43 = vmul.f32 -1.442695, %v5643_v33  ;;  %v2440_v4 = vld [vmem:[#allocation10 + $0xb0] sm:$0xff]  ;;  %v2445_v33 = vld [vmem:[#allocation10 + $0xd8] sm:$0xff] }
 0x795   :  { %5852 = vpow2.f32 %v4355_v22  ;;  %v2443_v22 = vld [vmem:[#allocation10 + $0xc8] sm:$0xff]  ;;  %v2464_v56 = vld [vmem:[#allocation10 + $0x170] sm:$0xff] }
 0x796   :  { %5854 = vpow2.f32 %v4356_v21  ;;  %v2447_v21 = vld [vmem:[#allocation10 + $0xe8] sm:$0xff] }
 0x797   :  { %5856 = vpow2.f32 %v4357_v43  ;;  %v2449_v43 = vld [vmem:[#allocation10 + $0xf8] sm:$0xff] }
 0x798   :  { %5858 = vtanh.f32 %v5642_v1  ;;  %v5024_v1 = vpack.c.bf16 %v2438_v19, %v2434_v10  ;;  %v5068_v19 = vpack.c.bf16 %v2464_v56, %v2460_v41  ;;  %v2787_v41 = vld [vmem:[#allocation12 + $0xa8] sm:$0xff]  ;;  %v2785_v56 = vld [vmem:[#allocation12 + $0x98] sm:$0xff] }
 0x79f   :  { %v5853_v8 = vpop.eup %5852 }
 0x7a0   :  { %v5855_v16 = vpop.eup %5854  ;;  %v2144_v36 = vadd.f32 1.0, %v5853_v8  ;;  %v5056_v8 = vpack.c.bf16 %v2440_v4, %v2436_v54  ;;  %v5038_v54 = vpack.c.bf16 %v2471_v49, %v2467_v42  ;;  %v2789_v49 = vld [vmem:[#allocation12 + $0xb8] sm:$0xff] }
 0x7a1   :  { %v2150_v40 = vadd.f32 1.0, %v5855_v16  ;;  %v5857_v9 = vpop.eup %5856  ;;  %v2442_v16 = vld [vmem:[#allocation10 + $0xc0] sm:$0xff] }
 0x7a2   :  { %5860 = vrcp.f32 %v2144_v36  ;;  %v5859_v15 = vpop.eup %5858  ;;  %v2157_v7 = vadd.f32 1.0, %v5857_v9  ;;  %v2446_v36 = vld [vmem:[#allocation10 + $0xe0] sm:$0xff]  ;;  %v5058_v9 = vpack.c.bf16 %v2449_v43, %v2445_v33  ;;  %v2475_v33 = vld [vmem:[#allocation10 + $0x1c8] sm:$0xff] }
 0x7a3   :  { %5862 = vrcp.f32 %v2150_v40  ;;  %v5026_v40 = vpack.c.bf16 %v2447_v21, %v2443_v22  ;;  %v5028_v62 = vpack.c.bf16 %v2446_v36, %v2442_v16  ;;  %v2468_v22 = vld [vmem:[#allocation10 + $0x190] sm:$0xff]  ;;  %v2479_v43 = vld [vmem:[#allocation10 + $0x1e8] sm:$0xff] }
 0x7a4   :  { %5864 = vrcp.f32 %v2157_v7  ;;  %v2453_v7 = vld [vmem:[#allocation10 + $0x118] sm:$0xff]  ;;  %v2472_v21 = vld [vmem:[#allocation10 + $0x1b0] sm:$0xff] }
 0x7a5   :  { %v5072_v36 = vpack.c.bf16 %v2472_v21, %v2468_v22  ;;  %v2795_v22 = vld [vmem:[#allocation12 + $0xe8] sm:$0xff]  ;;  %v2793_v21 = vld [vmem:[#allocation12 + $0xd8] sm:$0xff] }
 0x7ac   :  { %v5861_v17 = vpop.eup %5860 }
 0x7ad   :  { %v5863_v5 = vpop.eup %5862  ;;  %v2161_v29 = vmul.f32 %v5861_v17, %v5859_v15  ;;  %v2444_v15 = vld [vmem:[#allocation10 + $0xd0] sm:$0xff] }
 0x7ae   :  { %v2160_v12 = vmul.f32 %v5863_v5, %v6803_v13  ;;  %v5865_v46 = vpop.eup %5864  ;;  %v2448_v17 = vld [vmem:[#allocation10 + $0xf0] sm:$0xff]  ;;  %v2451_v5 = vld [vmem:[#allocation10 + $0x108] sm:$0xff] }
 0x7af   :  { %v5060_v14 = vpack.c.bf16 %v2448_v17, %v2444_v15  ;;  %v2478_v17 = vld [vmem:[#allocation10 + $0x1e0] sm:$0xff] }
 0x7b0   :  { %v6841_v51 = vadd.f32 %v2161_v29, %v2160_v12  ;;  %v2455_v29 = vld [vmem:[#allocation10 + $0x128] sm:$0xff]  ;;  %v2457_v12 = vld [vmem:[#allocation10 + $0x138] sm:$0xff] }
 0x7b1   :  { %v5030_v47 = vpack.c.bf16 %v2455_v29, %v2451_v5  ;;  %v5062_v28 = vpack.c.bf16 %v2457_v12, %v2453_v7  ;;  %v2476_v5 = vld [vmem:[#allocation10 + $0x1d0] sm:$0xff] }
 0x7b2   :  { %5866 = vtanh.f32 %v6841_v51  ;;  %v2480_v29 = vld [vmem:[#allocation10 + $0x1f0] sm:$0xff] }
 0x7b3   :  { %v5076_v12 = vpack.c.bf16 %v2480_v29, %v2476_v5  ;;  %v2803_v5 = vld [vmem:[#allocation12 + $0x128] sm:$0xff]  ;;  %v2801_v29 = vld [vmem:[#allocation12 + $0x118] sm:$0xff] }
 0x7bc   :  { %v5867_v61 = vpop.eup %5866 }
 0x7bd   :  { %v6844_v13 = vmul.f32 %v5867_v61, %v5865_v46  ;;  %v2459_v46 = vld [vmem:[#allocation10 + $0x148] sm:$0xff] }
 0x7be   :  { %v2463_v61 = vld [vmem:[#allocation10 + $0x168] sm:$0xff] }
 0x7bf   :  { %2303 = vmatmul.mubr.f32.vlgmr.msra.gmra.mrb[14].mxu0 %v6844_v13  ;;  %2374 = vmatmul.mubr.f32.vlgmr.msra.gmra.mrb[14].mxu1 %v6844_v13  ;;  %v5034_v63 = vpack.c.bf16 %v2463_v61, %v2459_v46  ;;  %v2781_v61 = vld [vmem:[#allocation12 + $0x78] sm:$0xff] }
 0x7c0   :  { %5017 = vmatpush1.bf16.msra.mxu0 %v5016_v50  ;;  %5049 = vmatpush1.bf16.msra.mxu1 %v5048_v11  ;;  %v2461_v50 = vld [vmem:[#allocation10 + $0x158] sm:$0xff] }
 0x7c1   :  { %5019 = vmatprep.subr.bf16.mxu0 %v5018_v26  ;;  %5051 = vmatprep.subr.bf16.mxu1 %v5050_v44  ;;  %v2465_v11 = vld [vmem:[#allocation10 + $0x178] sm:$0xff]  ;;  %v2458_v26 = vld [vmem:[#allocation10 + $0x140] sm:$0xff] }
 0x7c2   :  { %2568 = vmatprep.mubr.f32.mxu0 %v6186_v0  ;;  %2681 = vmatprep.mubr.f32.mxu1 %v6186_v0  ;;  %v2462_v44 = vld [vmem:[#allocation10 + $0x160] sm:$0xff]  ;;  %v5066_v57 = vpack.c.bf16 %v2465_v11, %v2461_v50 }
 0x7c3   :  { %v5036_v10 = vpack.c.bf16 %v2462_v44, %v2458_v26  ;;  %v2774_v50 = vld [vmem:[#allocation12 + $0x40] sm:$0xff]  ;;  %v2776_v26 = vld [vmem:[#allocation12 + $0x50] sm:$0xff] }
 0x7c4   :  { %5021 = vmatpush1.bf16.msra.mxu0 %v5020_v2  ;;  %5053 = vmatpush1.bf16.msra.mxu1 %v5052_v6  ;;  %v2469_v2 = vld [vmem:[#allocation10 + $0x198] sm:$0xff]  ;;  %v2778_v11 = vld [vmem:[#allocation12 + $0x60] sm:$0xff]  ;;  %v2780_v44 = vld [vmem:[#allocation12 + $0x70] sm:$0xff] }
 0x7c5   :  { %5023 = vmatprep.subr.bf16.mxu0 %v5022_v32  ;;  %5055 = vmatprep.subr.bf16.mxu1 %v5054_v48  ;;  %v2473_v6 = vld [vmem:[#allocation10 + $0x1b8] sm:$0xff]  ;;  %v2466_v32 = vld [vmem:[#allocation10 + $0x180] sm:$0xff] }
 0x7c6   :  { %v2470_v48 = vld [vmem:[#allocation10 + $0x1a0] sm:$0xff]  ;;  %v5070_v4 = vpack.c.bf16 %v2473_v6, %v2469_v2 }
 0x7c7   :  { %v5040_v16 = vpack.c.bf16 %v2470_v48, %v2466_v32  ;;  %v2782_v2 = vld [vmem:[#allocation12 + $0x80] sm:$0xff]  ;;  %v2784_v32 = vld [vmem:[#allocation12 + $0x90] sm:$0xff] }
 0x7c8   :  { %5025 = vmatpush1.bf16.msra.mxu0 %v5024_v1  ;;  %5057 = vmatpush1.bf16.msra.mxu1 %v5056_v8  ;;  %v2477_v1 = vld [vmem:[#allocation10 + $0x1d8] sm:$0xff]  ;;  %v2786_v6 = vld [vmem:[#allocation12 + $0xa0] sm:$0xff]  ;;  %v2788_v48 = vld [vmem:[#allocation12 + $0xb0] sm:$0xff] }
 0x7c9   :  { %5027 = vmatprep.subr.bf16.mxu0 %v5026_v40  ;;  %5059 = vmatprep.subr.bf16.mxu1 %v5058_v9  ;;  %v2481_v8 = vld [vmem:[#allocation10 + $0x1f8] sm:$0xff]  ;;  %v2474_v40 = vld [vmem:[#allocation10 + $0x1c0] sm:$0xff]  ;;  %v5042_v9 = vpack.c.bf16 %v2479_v43, %v2475_v33 }
 0x7ca   :  { %v5074_v15 = vpack.c.bf16 %v2481_v8, %v2477_v1  ;;  %v5044_v7 = vpack.c.bf16 %v2478_v17, %v2474_v40  ;;  %v2797_v43 = vld [vmem:[#allocation12 + $0xf8] sm:$0xff]  ;;  %v2790_v1 = vld [vmem:[#allocation12 + $0xc0] sm:$0xff]  ;;  %v2792_v40 = vld [vmem:[#allocation12 + $0xd0] sm:$0xff] }
 0x7cb   :  { %v2794_v8 = vld [vmem:[#allocation12 + $0xe0] sm:$0xff] }
 0x7cc   :  { %5029 = vmatpush1.bf16.msra.mxu0 %v5028_v62  ;;  %5061 = vmatpush1.bf16.msra.mxu1 %v5060_v14  ;;  %v2766_v62 = vld [vmem:[#allocation12] sm:$0xff] }
 0x7cd   :  { %5031 = vmatprep.subr.bf16.mxu0 %v5030_v47  ;;  %5063 = vmatprep.subr.bf16.mxu1 %v5062_v28  ;;  %v2772_v47 = vld [vmem:[#allocation12 + $0x30] sm:$0xff]  ;;  %v2775_v28 = vld [vmem:[#allocation12 + $0x48] sm:$0xff] }
 0x7ce   :  { %v6890_v46 = vpack.c.bf16 %v2779_v60, %v2775_v28 }
 0x7d0   :  { %5033 = vmatpush1.bf16.msra.mxu0 %v5032_v25  ;;  %5065 = vmatpush1.bf16.msra.mxu1 %v5064_v23  ;;  %v6892_v25 = vpack.c.bf16 %v2781_v61, %v2777_v53  ;;  %v6894_v23 = vpack.c.bf16 %v2778_v11, %v2774_v50  ;;  %v2809_v53 = vld [vmem:[#allocation12 + $0x158] sm:$0xff]  ;;  %v2806_v50 = vld [vmem:[#allocation12 + $0x140] sm:$0xff] }
 0x7d1   :  { %5035 = vmatprep.subr.bf16.mxu0 %v5034_v63  ;;  %5067 = vmatprep.subr.bf16.mxu1 %v5066_v57  ;;  %v6897_v63 = vpack.c.bf16 %v2780_v44, %v2776_v26  ;;  %v2783_v57 = vld [vmem:[#allocation12 + $0x88] sm:$0xff]  ;;  %v2813_v61 = vld [vmem:[#allocation12 + $0x178] sm:$0xff]  ;;  %v2810_v26 = vld [vmem:[#allocation12 + $0x160] sm:$0xff] }
 0x7d2   :  { %v6902_v42 = vpack.c.bf16 %v2787_v41, %v2783_v57  ;;  %v6938_v11 = vpack.c.bf16 %v2813_v61, %v2809_v53  ;;  %v2808_v44 = vld [vmem:[#allocation12 + $0x150] sm:$0xff]  ;;  %v6941_v41 = vpack.c.bf16 %v2810_v26, %v2806_v50 }
 0x7d3   :  { %v2812_v57 = vld [vmem:[#allocation12 + $0x170] sm:$0xff] }
 0x7d4   :  { %5037 = vmatpush1.bf16.msra.mxu0 %v5036_v10  ;;  %5069 = vmatpush1.bf16.msra.mxu1 %v5068_v19  ;;  %v6904_v10 = vpack.c.bf16 %v2789_v49, %v2785_v56  ;;  %v6906_v19 = vpack.c.bf16 %v2786_v6, %v2782_v2  ;;  %v2815_v56 = vld [vmem:[#allocation12 + $0x188] sm:$0xff]  ;;  %v2817_v2 = vld [vmem:[#allocation12 + $0x198] sm:$0xff]  ;;  %v6945_v6 = vpack.c.bf16 %v2812_v57, %v2808_v44 }
 0x7d5   :  { %5039 = vmatprep.subr.bf16.mxu0 %v5038_v54  ;;  %5071 = vmatprep.subr.bf16.mxu1 %v5070_v4  ;;  %v6909_v54 = vpack.c.bf16 %v2788_v48, %v2784_v32  ;;  %v2791_v4 = vld [vmem:[#allocation12 + $0xc8] sm:$0xff]  ;;  %v2821_v48 = vld [vmem:[#allocation12 + $0x1b8] sm:$0xff] }
 0x7d6   :  { %v6914_v33 = vpack.c.bf16 %v2795_v22, %v2791_v4  ;;  %v2819_v49 = vld [vmem:[#allocation12 + $0x1a8] sm:$0xff]  ;;  %v2814_v4 = vld [vmem:[#allocation12 + $0x180] sm:$0xff] }
 0x7d7   :  { %v6947_v32 = vpack.c.bf16 %v2819_v49, %v2815_v56  ;;  %v2818_v22 = vld [vmem:[#allocation12 + $0x1a0] sm:$0xff] }
 0x7d8   :  { %5041 = vmatpush1.bf16.msra.mxu0 %v5040_v16  ;;  %5073 = vmatpush1.bf16.msra.mxu1 %v5072_v36  ;;  %v6916_v16 = vpack.c.bf16 %v2797_v43, %v2793_v21  ;;  %v6918_v36 = vpack.c.bf16 %v2794_v8, %v2790_v1  ;;  %v6950_v21 = vpack.c.bf16 %v2821_v48, %v2817_v2  ;;  %v2816_v43 = vld [vmem:[#allocation12 + $0x190] sm:$0xff] }
 0x7d9   :  { %5043 = vmatprep.subr.bf16.mxu0 %v5042_v9  ;;  %5075 = vmatprep.subr.bf16.mxu1 %v5074_v15  ;;  %v2796_v9 = vld [vmem:[#allocation12 + $0xf0] sm:$0xff]  ;;  %v2799_v15 = vld [vmem:[#allocation12 + $0x108] sm:$0xff]  ;;  %v6953_v8 = vpack.c.bf16 %v2818_v22, %v2814_v4 }
 0x7da   :  { %v6921_v17 = vpack.c.bf16 %v2796_v9, %v2792_v40  ;;  %v2820_v1 = vld [vmem:[#allocation12 + $0x1b0] sm:$0xff]  ;;  %v2823_v9 = vld [vmem:[#allocation12 + $0x1c8] sm:$0xff] }
 0x7db   :  { %v6957_v40 = vpack.c.bf16 %v2820_v1, %v2816_v43 }
 0x7dc   :  { %5045 = vmatpush1.bf16.msra.mxu0 %v5044_v7  ;;  %5077 = vmatpush1.bf16.msra.mxu1 %v5076_v12  ;;  %v2805_v7 = vld [vmem:[#allocation12 + $0x138] sm:$0xff]  ;;  %v6925_v12 = vpack.c.bf16 %v2803_v5, %v2799_v15  ;;  %v2827_v15 = vld [vmem:[#allocation12 + $0x1e8] sm:$0xff] }
 0x7dd   :  { %v2825_v5 = vld [vmem:[#allocation12 + $0x1d8] sm:$0xff] }
 0x7df   :  { %2569 = vmatmul.mubr.f32.vlgmr.msra.gmra.mrb[16].mxu0 %v6514_v39  ;;  %2682 = vmatmul.mubr.f32.vlgmr.msra.gmra.mrb[16].mxu1 %v6514_v39  ;;  %v2767_v39 = vld [vmem:[#allocation12 + $0x8] sm:$0xff] }
 0x7e0   :  { %2574 = vmatprep.mubr.f32.mxu0 %v6186_v0  ;;  %2687 = vmatprep.mubr.f32.mxu1 %v6186_v0 }
 0x7e3   :  { %2575 = vmatmul.mubr.f32.gmra.mrb[18].mxu0 %v6558_v24  ;;  %2688 = vmatmul.mubr.f32.gmra.mrb[18].mxu1 %v6558_v24  ;;  %v2771_v24 = vld [vmem:[#allocation12 + $0x28] sm:$0xff] }
 0x7e4   :  { %2580 = vmatprep.mubr.f32.mxu0 %v6186_v0  ;;  %2693 = vmatprep.mubr.f32.mxu1 %v6186_v0 }
 0x7e7   :  { %2581 = vmatmul.mubr.f32.gmra.mrb[20].mxu0 %v6622_v20  ;;  %2694 = vmatmul.mubr.f32.gmra.mrb[20].mxu1 %v6622_v20  ;;  %v2769_v20 = vld [vmem:[#allocation12 + $0x18] sm:$0xff] }
 0x7e8   :  { %2586 = vmatprep.mubr.f32.mxu0 %v6186_v0  ;;  %2699 = vmatprep.mubr.f32.mxu1 %v6186_v0 }
 0x7eb   :  { %2587 = vmatmul.mubr.f32.gmra.mrb[22].mxu0 %v6716_v3  ;;  %2700 = vmatmul.mubr.f32.gmra.mrb[22].mxu1 %v6716_v3  ;;  %v6878_v3 = vpack.c.bf16 %v2771_v24, %v2767_v39  ;;  %v6927_v39 = vpack.c.bf16 %v2805_v7, %v2801_v29  ;;  %v2798_v24 = vld [vmem:[#allocation12 + $0x100] sm:$0xff]  ;;  %v6962_v29 = vpack.c.bf16 %v2827_v15, %v2823_v9  ;;  %v2829_v7 = vld [vmem:[#allocation12 + $0x1f8] sm:$0xff] }
 0x7ec   :  { %2592 = vmatprep.mubr.f32.mxu0 %v6186_v0  ;;  %2705 = vmatprep.mubr.f32.mxu1 %v6186_v0 }
 0x7ed   :  { %5079 = vmatprep.subr.bf16.mxu0 %v6878_v3 }
 0x7ef   :  { %2593 = vmatmul.mubr.f32.gmra.mrb[24].mxu0 %v6762_v58  ;;  %2706 = vmatmul.mubr.f32.gmra.mrb[24].mxu1 %v6762_v58  ;;  %v2773_v58 = vld [vmem:[#allocation12 + $0x38] sm:$0xff] }
 0x7f0   :  { %2598 = vmatprep.mubr.f32.mxu0 %v6186_v0  ;;  %2711 = vmatprep.mubr.f32.mxu1 %v6186_v0  ;;  %v6880_v14 = vpack.c.bf16 %v2773_v58, %v2769_v20  ;;  %v2802_v20 = vld [vmem:[#allocation12 + $0x120] sm:$0xff]  ;;  %v2800_v58 = vld [vmem:[#allocation12 + $0x110] sm:$0xff] }
 0x7f2   :  { %5111 = vmatprep.subr.bf16.mxu1 %v6880_v14 }
 0x7f3   :  { %2599 = vmatmul.mubr.f32.gmra.mrb[26].mxu0 %v6806_v45  ;;  %2712 = vmatmul.mubr.f32.gmra.mrb[26].mxu1 %v6806_v45  ;;  %v2770_v45 = vld [vmem:[#allocation12 + $0x20] sm:$0xff] }
 0x7f4   :  { %2604 = vmatprep.mubr.f32.mxu0 %v6186_v0  ;;  %2717 = vmatprep.mubr.f32.mxu1 %v6186_v0  ;;  %v6882_v18 = vpack.c.bf16 %v2770_v45, %v2766_v62  ;;  %v6930_v62 = vpack.c.bf16 %v2802_v20, %v2798_v24  ;;  %v2804_v45 = vld [vmem:[#allocation12 + $0x130] sm:$0xff]  ;;  %v2822_v24 = vld [vmem:[#allocation12 + $0x1c0] sm:$0xff] }
 0x7f5   :  { %v6934_v28 = vpack.c.bf16 %v2804_v45, %v2800_v58  ;;  %v2826_v20 = vld [vmem:[#allocation12 + $0x1e0] sm:$0xff]  ;;  %v6964_v58 = vpack.c.bf16 %v2829_v7, %v2825_v5 }
 0x7f6   :  { %5081 = vmatpush1.bf16.msra.mxu0 %v6882_v18  ;;  %v6966_v45 = vpack.c.bf16 %v2826_v20, %v2822_v24 }
 0x7f7   :  { %2605 = vmatmul.mubr.f32.gmra.mrb[28].mxu0 %v6844_v13  ;;  %2718 = vmatmul.mubr.f32.gmra.mrb[28].mxu1 %v6844_v13  ;;  %v6885_v13 = vpack.c.bf16 %v2772_v47, %v2768_v27  ;;  %v2807_v27 = vld [vmem:[#allocation12 + $0x148] sm:$0xff] }
 0x7f8   :  { %2610 = vmatprep.mubr.f32.mxu0 %v6186_v0  ;;  %2723 = vmatprep.mubr.f32.mxu1 %v6186_v0  ;;  %v2811_v47 = vld [vmem:[#allocation12 + $0x168] sm:$0xff] }
 0x7f9   :  { %5113 = vmatpush1.bf16.msra.mxu1 %v6885_v13  ;;  %5083 = vmatprep.subr.bf16.mxu0 %v6890_v46  ;;  %v6936_v60 = vpack.c.bf16 %v2811_v47, %v2807_v27  ;;  %v2824_v27 = vld [vmem:[#allocation12 + $0x1d0] sm:$0xff] }
 0x7fa   :  { %5115 = vmatprep.subr.bf16.mxu1 %v6892_v25  ;;  %5085 = vmatpush1.bf16.msra.mxu0 %v6894_v23  ;;  %v2828_v47 = vld [vmem:[#allocation12 + $0x1f0] sm:$0xff] }
 0x7fb   :  { %5087 = vmatprep.subr.bf16.mxu0 %v6902_v42  ;;  %v6969_v53 = vpack.c.bf16 %v2828_v47, %v2824_v27 }
 0x7fd   :  { %5117 = vmatpush1.bf16.msra.mxu1 %v6897_v63 }
 0x7fe   :  { %5119 = vmatprep.subr.bf16.mxu1 %v6904_v10  ;;  %5089 = vmatpush1.bf16.msra.mxu0 %v6906_v19 }
 0x7ff   :  { %5091 = vmatprep.subr.bf16.mxu0 %v6914_v33 }
 0x801   :  { %5121 = vmatpush1.bf16.msra.mxu1 %v6909_v54 }
 0x802   :  { %5123 = vmatprep.subr.bf16.mxu1 %v6916_v16  ;;  %5093 = vmatpush1.bf16.msra.mxu0 %v6918_v36 }
 0x803   :  { %5095 = vmatprep.subr.bf16.mxu0 %v6925_v12 }
 0x805   :  { %5125 = vmatpush1.bf16.msra.mxu1 %v6921_v17 }
 0x806   :  { %5127 = vmatprep.subr.bf16.mxu1 %v6927_v39  ;;  %5097 = vmatpush1.bf16.msra.mxu0 %v6930_v62 }
 0x807   :  { %5099 = vmatprep.subr.bf16.mxu0 %v6936_v60 }
 0x809   :  { %5129 = vmatpush1.bf16.msra.mxu1 %v6934_v28 }
 0x80a   :  { %5131 = vmatprep.subr.bf16.mxu1 %v6938_v11  ;;  %5101 = vmatpush1.bf16.msra.mxu0 %v6941_v41 }
 0x80b   :  { %5103 = vmatprep.subr.bf16.mxu0 %v6947_v32 }
 0x80d   :  { %5133 = vmatpush1.bf16.msra.mxu1 %v6945_v6 }
 0x80e   :  { %5135 = vmatprep.subr.bf16.mxu1 %v6950_v21  ;;  %5105 = vmatpush1.bf16.msra.mxu0 %v6953_v8 }
 0x80f   :  { %5107 = vmatprep.subr.bf16.mxu0 %v6962_v29 }
 0x811   :  { %5137 = vmatpush1.bf16.msra.mxu1 %v6957_v40 }
 0x812   :  { %5139 = vmatprep.subr.bf16.mxu1 %v6964_v58  ;;  %5109 = vmatpush1.bf16.msra.mxu0 %v6966_v45 }
 0x813   :  { %5143 = vmatprep.subr.bf16.mxu0 %v6878_v3 }
 0x815   :  { %5141 = vmatpush1.bf16.msra.mxu1 %v6969_v53 }
 0x816   :  { %5175 = vmatprep.subr.bf16.mxu1 %v6880_v14 }
 0x892   :  { %v2304_v61 = vpop.f32.mrb[14].mxu0  ;;  %v2375_v50 = vpop.f32.mrb[14].mxu1 }
 0x893   :  { %v5628_v26 = vadd.f32 %v2304_v61, %v6491_v35  ;;  %v2306_v44 = vpop.f32.mrb[15].mxu0  ;;  %v2377_v57 = vpop.f32.mrb[15].mxu1  ;;  %v5644_v22 = vadd.f32 %v2375_v50, %v6508_v59 }
 0x894   :  { %v5629_v56 = vadd.f32 %v2306_v44, %v6495_v38  ;;  %v5645_v48 = vadd.f32 %v2377_v57, %v6502_v52 }
 0x895   :  { %v4358_v49 = vmul.f32 -1.442695, %v5628_v26 }
 0x896   :  { %v4359_v2 = vmul.f32 -1.442695, %v5629_v56  ;;  %v4360_v4 = vmul.f32 -1.442695, %v5645_v48 }
 0x897   :  { %5868 = vpow2.f32 %v4358_v49 }
 0x898   :  { %5870 = vpow2.f32 %v4359_v2 }
 0x899   :  { %5872 = vpow2.f32 %v4360_v4 }
 0x89a   :  { %5874 = vtanh.f32 %v5644_v22 }
 0x8a1   :  { %v5869_v43 = vpop.eup %5868 }
 0x8a2   :  { %v5871_v1 = vpop.eup %5870  ;;  %v2387_v9 = vadd.f32 1.0, %v5869_v43 }
 0x8a3   :  { %v2393_v15 = vadd.f32 1.0, %v5871_v1  ;;  %v5873_v35 = vpop.eup %5872 }
 0x8a4   :  { %5876 = vrcp.f32 %v2387_v9  ;;  %v5875_v5 = vpop.eup %5874  ;;  %v2400_v20 = vadd.f32 1.0, %v5873_v35 }
 0x8a5   :  { %5878 = vrcp.f32 %v2393_v15 }
 0x8a6   :  { %5880 = vrcp.f32 %v2400_v20 }
 0x8ae   :  { %v5877_v38 = vpop.eup %5876 }
 0x8af   :  { %v5879_v7 = vpop.eup %5878  ;;  %v2404_v24 = vmul.f32 %v5877_v38, %v5875_v5 }
 0x8b0   :  { %v2403_v27 = vmul.f32 %v5879_v7, %v6841_v51  ;;  %v5881_v59 = vpop.eup %5880  ;;  %v2482_v51 = vld [vmem:[%s7322_s6] sm:$0xf] }
 0x8b1   :  { %v7024_v50 = vrot.slane %v2482_v51, %v191_v31  ;;  %v7028_v26 = vrot.slane %v2482_v51, %v195_v34  ;;  %v7034_v43 = vrot.slane %v2482_v51, %v203_v37  ;;  %v7039_v34 = vrot.slane %v2482_v51, %v199_v55 }
 0x8b2   :  { %v2405_v52 = vadd.f32 %v2404_v24, %v2403_v27 }
 0x8b4   :  { %5882 = vtanh.f32 %v2405_v52 }
 0x8be   :  { %v5883_v47 = vpop.eup %5882 }
 0x8bf   :  { %v2407_v61 = vmul.f32 %v5883_v47, %v5881_v59 }
 0x8c1   :  { %2611 = vmatmul.mubr.f32.gmra.mrb[30].mxu0 %v2407_v61  ;;  %2724 = vmatmul.mubr.f32.gmra.mrb[30].mxu1 %v2407_v61 }
 0x8c2   :  { %2894 = vmatprep.mubr.f32.mxu0 %v6186_v0  ;;  %2965 = vmatprep.mubr.f32.mxu1 %v6186_v0 }
 0x8c5   :  { %2895 = vmatmul.mubr.f32.vlgmr.msra.gmra.mrb[16].mxu0 %v6186_v0  ;;  %2966 = vmatmul.mubr.f32.vlgmr.msra.gmra.mrb[16].mxu1 %v6186_v0 }
 0x8c6   :  { %5145 = vmatpush1.bf16.msra.mxu0 %v6882_v18  ;;  %5177 = vmatpush1.bf16.msra.mxu1 %v6885_v13 }
 0x8c7   :  { %5147 = vmatprep.subr.bf16.mxu0 %v6890_v46  ;;  %5179 = vmatprep.subr.bf16.mxu1 %v6892_v25 }
 0x8c8   :  { %3068 = vmatprep.mubr.f32.mxu0 %v6186_v0  ;;  %3139 = vmatprep.mubr.f32.mxu1 %v6186_v0 }
 0x8ca   :  { %5149 = vmatpush1.bf16.msra.mxu0 %v6894_v23  ;;  %5181 = vmatpush1.bf16.msra.mxu1 %v6897_v63 }
 0x8cb   :  { %5151 = vmatprep.subr.bf16.mxu0 %v6902_v42  ;;  %5183 = vmatprep.subr.bf16.mxu1 %v6904_v10 }
 0x8ce   :  { %5153 = vmatpush1.bf16.msra.mxu0 %v6906_v19  ;;  %5185 = vmatpush1.bf16.msra.mxu1 %v6909_v54 }
 0x8cf   :  { %5155 = vmatprep.subr.bf16.mxu0 %v6914_v33  ;;  %5187 = vmatprep.subr.bf16.mxu1 %v6916_v16 }
 0x8d2   :  { %5157 = vmatpush1.bf16.msra.mxu0 %v6918_v36  ;;  %5189 = vmatpush1.bf16.msra.mxu1 %v6921_v17 }
 0x8d3   :  { %5159 = vmatprep.subr.bf16.mxu0 %v6925_v12  ;;  %5191 = vmatprep.subr.bf16.mxu1 %v6927_v39 }
 0x8d6   :  { %5161 = vmatpush1.bf16.msra.mxu0 %v6930_v62  ;;  %5193 = vmatpush1.bf16.msra.mxu1 %v6934_v28 }
 0x8d7   :  { %5163 = vmatprep.subr.bf16.mxu0 %v6936_v60  ;;  %5195 = vmatprep.subr.bf16.mxu1 %v6938_v11 }
 0x8da   :  { %5165 = vmatpush1.bf16.msra.mxu0 %v6941_v41  ;;  %5197 = vmatpush1.bf16.msra.mxu1 %v6945_v6 }
 0x8db   :  { %5167 = vmatprep.subr.bf16.mxu0 %v6947_v32  ;;  %5199 = vmatprep.subr.bf16.mxu1 %v6950_v21 }
 0x8de   :  { %5169 = vmatpush1.bf16.msra.mxu0 %v6953_v8  ;;  %5201 = vmatpush1.bf16.msra.mxu1 %v6957_v40 }
 0x8df   :  { %5171 = vmatprep.subr.bf16.mxu0 %v6962_v29  ;;  %5203 = vmatprep.subr.bf16.mxu1 %v6964_v58 }
 0x8e2   :  { %5173 = vmatpush1.bf16.msra.mxu0 %v6966_v45  ;;  %5205 = vmatpush1.bf16.msra.mxu1 %v6969_v53 }
 0x8e3   :  { %5207 = vmatprep.subr.bf16.mxu0 %v6878_v3  ;;  %5239 = vmatprep.subr.bf16.mxu1 %v6880_v14 }
 0x998   :  { %v2896_v44 = vpop.f32.mrb[16].mxu0  ;;  %v2967_v57 = vpop.f32.mrb[16].mxu1 }
 0x999   :  { %v5646_v56 = vadd.f32 %v2896_v44, %v7024_v50  ;;  %v2898_v49 = vpop.f32.mrb[17].mxu0  ;;  %v2969_v2 = vpop.f32.mrb[17].mxu1  ;;  %v5662_v9 = vadd.f32 %v2967_v57, %v7039_v34 }
 0x99a   :  { %v5647_v48 = vadd.f32 %v2898_v49, %v7028_v26  ;;  %v5663_v31 = vadd.f32 %v2969_v2, %v7034_v43 }
 0x99b   :  { %v4361_v4 = vmul.f32 -1.442695, %v5646_v56 }
 0x99c   :  { %v4362_v22 = vmul.f32 -1.442695, %v5647_v48  ;;  %v4363_v1 = vmul.f32 -1.442695, %v5663_v31 }
 0x99d   :  { %5884 = vpow2.f32 %v4361_v4 }
 0x99e   :  { %5886 = vpow2.f32 %v4362_v22 }
 0x99f   :  { %5888 = vpow2.f32 %v4363_v1 }
 0x9a0   :  { %5890 = vtanh.f32 %v5662_v9 }
 0x9a7   :  { %v5885_v15 = vpop.eup %5884 }
 0x9a8   :  { %v5887_v35 = vpop.eup %5886  ;;  %v2979_v5 = vadd.f32 1.0, %v5885_v15 }
 0x9a9   :  { %v2985_v38 = vadd.f32 1.0, %v5887_v35  ;;  %v5889_v37 = vpop.eup %5888 }
 0x9aa   :  { %5892 = vrcp.f32 %v2979_v5  ;;  %v5891_v7 = vpop.eup %5890  ;;  %v2992_v52 = vadd.f32 1.0, %v5889_v37 }
 0x9ab   :  { %5894 = vrcp.f32 %v2985_v38 }
 0x9ac   :  { %5896 = vrcp.f32 %v2992_v52 }
 0x9b4   :  { %v5893_v24 = vpop.eup %5892 }
 0x9b5   :  { %v5895_v20 = vpop.eup %5894  ;;  %v2996_v27 = vmul.f32 %v5893_v24, %v5891_v7 }
 0x9b6   :  { %v2995_v30 = vmul.f32 0.0, %v5895_v20  ;;  %v5897_v59 = vpop.eup %5896 }
 0x9b8   :  { %v7042_v55 = vadd.f32 %v2996_v27, %v2995_v30 }
 0x9ba   :  { %5898 = vtanh.f32 %v7042_v55 }
 0x9c4   :  { %v5899_v47 = vpop.eup %5898 }
 0x9c5   :  { %v2999_v61 = vmul.f32 %v5899_v47, %v5897_v59 }
 0x9c7   :  { %3069 = vmatmul.mubr.f32.vlgmr.msra.gmra.mrb[18].mxu0 %v2999_v61  ;;  %3140 = vmatmul.mubr.f32.vlgmr.msra.gmra.mrb[18].mxu1 %v2999_v61 }
 0x9c8   :  { %5209 = vmatpush1.bf16.msra.mxu0 %v6882_v18  ;;  %5241 = vmatpush1.bf16.msra.mxu1 %v6885_v13 }
 0x9c9   :  { %5211 = vmatprep.subr.bf16.mxu0 %v6890_v46  ;;  %5243 = vmatprep.subr.bf16.mxu1 %v6892_v25 }
 0x9ca   :  { %3242 = vmatprep.mubr.f32.mxu0 %v6186_v0  ;;  %3313 = vmatprep.mubr.f32.mxu1 %v6186_v0 }
 0x9cc   :  { %5213 = vmatpush1.bf16.msra.mxu0 %v6894_v23  ;;  %5245 = vmatpush1.bf16.msra.mxu1 %v6897_v63 }
 0x9cd   :  { %5215 = vmatprep.subr.bf16.mxu0 %v6902_v42  ;;  %5247 = vmatprep.subr.bf16.mxu1 %v6904_v10 }
 0x9d0   :  { %5217 = vmatpush1.bf16.msra.mxu0 %v6906_v19  ;;  %5249 = vmatpush1.bf16.msra.mxu1 %v6909_v54 }
 0x9d1   :  { %5219 = vmatprep.subr.bf16.mxu0 %v6914_v33  ;;  %5251 = vmatprep.subr.bf16.mxu1 %v6916_v16 }
 0x9d4   :  { %5221 = vmatpush1.bf16.msra.mxu0 %v6918_v36  ;;  %5253 = vmatpush1.bf16.msra.mxu1 %v6921_v17 }
 0x9d5   :  { %5223 = vmatprep.subr.bf16.mxu0 %v6925_v12  ;;  %5255 = vmatprep.subr.bf16.mxu1 %v6927_v39 }
 0x9d8   :  { %5225 = vmatpush1.bf16.msra.mxu0 %v6930_v62  ;;  %5257 = vmatpush1.bf16.msra.mxu1 %v6934_v28 }
 0x9d9   :  { %5227 = vmatprep.subr.bf16.mxu0 %v6936_v60  ;;  %5259 = vmatprep.subr.bf16.mxu1 %v6938_v11 }
 0x9dc   :  { %5229 = vmatpush1.bf16.msra.mxu0 %v6941_v41  ;;  %5261 = vmatpush1.bf16.msra.mxu1 %v6945_v6 }
 0x9dd   :  { %5231 = vmatprep.subr.bf16.mxu0 %v6947_v32  ;;  %5263 = vmatprep.subr.bf16.mxu1 %v6950_v21 }
 0x9e0   :  { %5233 = vmatpush1.bf16.msra.mxu0 %v6953_v8  ;;  %5265 = vmatpush1.bf16.msra.mxu1 %v6957_v40 }
 0x9e1   :  { %5235 = vmatprep.subr.bf16.mxu0 %v6962_v29  ;;  %5267 = vmatprep.subr.bf16.mxu1 %v6964_v58 }
 0x9e4   :  { %5237 = vmatpush1.bf16.msra.mxu0 %v6966_v45  ;;  %5269 = vmatpush1.bf16.msra.mxu1 %v6969_v53 }
 0x9e5   :  { %5271 = vmatprep.subr.bf16.mxu0 %v6878_v3  ;;  %5303 = vmatprep.subr.bf16.mxu1 %v6880_v14 }
 0xa9a   :  { %v3070_v51 = vpop.f32.mrb[18].mxu0  ;;  %v3141_v44 = vpop.f32.mrb[18].mxu1 }
 0xa9b   :  { %v5648_v57 = vadd.f32 %v3070_v51, %v7024_v50  ;;  %v3072_v56 = vpop.f32.mrb[19].mxu0  ;;  %v3143_v49 = vpop.f32.mrb[19].mxu1  ;;  %v5664_v1 = vadd.f32 %v3141_v44, %v7039_v34 }
 0xa9c   :  { %v5649_v2 = vadd.f32 %v3072_v56, %v7028_v26  ;;  %v5665_v22 = vadd.f32 %v3143_v49, %v7034_v43 }
 0xa9d   :  { %v4364_v48 = vmul.f32 -1.442695, %v5648_v57 }
 0xa9e   :  { %v4365_v4 = vmul.f32 -1.442695, %v5649_v2  ;;  %v4366_v31 = vmul.f32 -1.442695, %v5665_v22 }
 0xa9f   :  { %5900 = vpow2.f32 %v4364_v48 }
 0xaa0   :  { %5902 = vpow2.f32 %v4365_v4 }
 0xaa1   :  { %5904 = vpow2.f32 %v4366_v31 }
 0xaa2   :  { %5906 = vtanh.f32 %v5664_v1 }
 0xaa9   :  { %v5901_v9 = vpop.eup %5900 }
 0xaaa   :  { %v5903_v15 = vpop.eup %5902  ;;  %v3153_v35 = vadd.f32 1.0, %v5901_v9 }
 0xaab   :  { %v3159_v5 = vadd.f32 1.0, %v5903_v15  ;;  %v5905_v38 = vpop.eup %5904 }
 0xaac   :  { %5908 = vrcp.f32 %v3153_v35  ;;  %v5907_v37 = vpop.eup %5906  ;;  %v3166_v27 = vadd.f32 1.0, %v5905_v38 }
 0xaad   :  { %5910 = vrcp.f32 %v3159_v5 }
 0xaae   :  { %5912 = vrcp.f32 %v3166_v27 }
 0xab6   :  { %v5909_v7 = vpop.eup %5908 }
 0xab7   :  { %v5911_v24 = vpop.eup %5910  ;;  %v3170_v20 = vmul.f32 %v5909_v7, %v5907_v37 }
 0xab8   :  { %v3169_v52 = vmul.f32 %v5911_v24, %v7042_v55  ;;  %v5913_v59 = vpop.eup %5912 }
 0xaba   :  { %v7084_v30 = vadd.f32 %v3170_v20, %v3169_v52 }
 0xabc   :  { %5914 = vtanh.f32 %v7084_v30 }
 0xac6   :  { %v5915_v47 = vpop.eup %5914 }
 0xac7   :  { %v3173_v61 = vmul.f32 %v5915_v47, %v5913_v59 }
 0xac9   :  { %3243 = vmatmul.mubr.f32.vlgmr.msra.gmra.mrb[20].mxu0 %v3173_v61  ;;  %3314 = vmatmul.mubr.f32.vlgmr.msra.gmra.mrb[20].mxu1 %v3173_v61 }
 0xaca   :  { %5273 = vmatpush1.bf16.msra.mxu0 %v6882_v18  ;;  %5305 = vmatpush1.bf16.msra.mxu1 %v6885_v13 }
 0xacb   :  { %5275 = vmatprep.subr.bf16.mxu0 %v6890_v46  ;;  %5307 = vmatprep.subr.bf16.mxu1 %v6892_v25 }
 0xacc   :  { %3416 = vmatprep.mubr.f32.mxu0 %v6186_v0  ;;  %3487 = vmatprep.mubr.f32.mxu1 %v6186_v0 }
 0xace   :  { %5277 = vmatpush1.bf16.msra.mxu0 %v6894_v23  ;;  %5309 = vmatpush1.bf16.msra.mxu1 %v6897_v63 }
 0xacf   :  { %5279 = vmatprep.subr.bf16.mxu0 %v6902_v42  ;;  %5311 = vmatprep.subr.bf16.mxu1 %v6904_v10 }
 0xad2   :  { %5281 = vmatpush1.bf16.msra.mxu0 %v6906_v19  ;;  %5313 = vmatpush1.bf16.msra.mxu1 %v6909_v54 }
 0xad3   :  { %5283 = vmatprep.subr.bf16.mxu0 %v6914_v33  ;;  %5315 = vmatprep.subr.bf16.mxu1 %v6916_v16 }
 0xad6   :  { %5285 = vmatpush1.bf16.msra.mxu0 %v6918_v36  ;;  %5317 = vmatpush1.bf16.msra.mxu1 %v6921_v17 }
 0xad7   :  { %5287 = vmatprep.subr.bf16.mxu0 %v6925_v12  ;;  %5319 = vmatprep.subr.bf16.mxu1 %v6927_v39 }
 0xada   :  { %5289 = vmatpush1.bf16.msra.mxu0 %v6930_v62  ;;  %5321 = vmatpush1.bf16.msra.mxu1 %v6934_v28 }
 0xadb   :  { %5291 = vmatprep.subr.bf16.mxu0 %v6936_v60  ;;  %5323 = vmatprep.subr.bf16.mxu1 %v6938_v11 }
 0xade   :  { %5293 = vmatpush1.bf16.msra.mxu0 %v6941_v41  ;;  %5325 = vmatpush1.bf16.msra.mxu1 %v6945_v6 }
 0xadf   :  { %5295 = vmatprep.subr.bf16.mxu0 %v6947_v32  ;;  %5327 = vmatprep.subr.bf16.mxu1 %v6950_v21 }
 0xae2   :  { %5297 = vmatpush1.bf16.msra.mxu0 %v6953_v8  ;;  %5329 = vmatpush1.bf16.msra.mxu1 %v6957_v40 }
 0xae3   :  { %5299 = vmatprep.subr.bf16.mxu0 %v6962_v29  ;;  %5331 = vmatprep.subr.bf16.mxu1 %v6964_v58 }
 0xae6   :  { %5301 = vmatpush1.bf16.msra.mxu0 %v6966_v45  ;;  %5333 = vmatpush1.bf16.msra.mxu1 %v6969_v53 }
 0xae7   :  { %5335 = vmatprep.subr.bf16.mxu0 %v6878_v3  ;;  %5367 = vmatprep.subr.bf16.mxu1 %v6880_v14 }
 0xb9c   :  { %v3244_v55 = vpop.f32.mrb[20].mxu0  ;;  %v3315_v51 = vpop.f32.mrb[20].mxu1 }
 0xb9d   :  { %v5650_v44 = vadd.f32 %v3244_v55, %v7024_v50  ;;  %v3246_v57 = vpop.f32.mrb[21].mxu0  ;;  %v3317_v56 = vpop.f32.mrb[21].mxu1  ;;  %v5666_v31 = vadd.f32 %v3315_v51, %v7039_v34 }
 0xb9e   :  { %v5651_v49 = vadd.f32 %v3246_v57, %v7028_v26  ;;  %v5667_v4 = vadd.f32 %v3317_v56, %v7034_v43 }
 0xb9f   :  { %v4367_v2 = vmul.f32 -1.442695, %v5650_v44 }
 0xba0   :  { %v4368_v48 = vmul.f32 -1.442695, %v5651_v49  ;;  %v4369_v22 = vmul.f32 -1.442695, %v5667_v4 }
 0xba1   :  { %5916 = vpow2.f32 %v4367_v2 }
 0xba2   :  { %5918 = vpow2.f32 %v4368_v48 }
 0xba3   :  { %5920 = vpow2.f32 %v4369_v22 }
 0xba4   :  { %5922 = vtanh.f32 %v5666_v31 }
 0xbab   :  { %v5917_v1 = vpop.eup %5916 }
 0xbac   :  { %v5919_v9 = vpop.eup %5918  ;;  %v3327_v15 = vadd.f32 1.0, %v5917_v1 }
 0xbad   :  { %v3333_v35 = vadd.f32 1.0, %v5919_v9  ;;  %v5921_v5 = vpop.eup %5920 }
 0xbae   :  { %5924 = vrcp.f32 %v3327_v15  ;;  %v5923_v38 = vpop.eup %5922  ;;  %v3340_v20 = vadd.f32 1.0, %v5921_v5 }
 0xbaf   :  { %5926 = vrcp.f32 %v3333_v35 }
 0xbb0   :  { %5928 = vrcp.f32 %v3340_v20 }
 0xbb8   :  { %v5925_v37 = vpop.eup %5924 }
 0xbb9   :  { %v5927_v7 = vpop.eup %5926  ;;  %v3344_v24 = vmul.f32 %v5925_v37, %v5923_v38 }
 0xbba   :  { %v3343_v27 = vmul.f32 %v5927_v7, %v7084_v30  ;;  %v5929_v59 = vpop.eup %5928 }
 0xbbc   :  { %v7126_v52 = vadd.f32 %v3344_v24, %v3343_v27 }
 0xbbe   :  { %5930 = vtanh.f32 %v7126_v52 }
 0xbc8   :  { %v5931_v47 = vpop.eup %5930 }
 0xbc9   :  { %v3347_v61 = vmul.f32 %v5931_v47, %v5929_v59 }
 0xbcb   :  { %3417 = vmatmul.mubr.f32.vlgmr.msra.gmra.mrb[22].mxu0 %v3347_v61  ;;  %3488 = vmatmul.mubr.f32.vlgmr.msra.gmra.mrb[22].mxu1 %v3347_v61 }
 0xbcc   :  { %5337 = vmatpush1.bf16.msra.mxu0 %v6882_v18  ;;  %5369 = vmatpush1.bf16.msra.mxu1 %v6885_v13 }
 0xbcd   :  { %5339 = vmatprep.subr.bf16.mxu0 %v6890_v46  ;;  %5371 = vmatprep.subr.bf16.mxu1 %v6892_v25 }
 0xbce   :  { %3590 = vmatprep.mubr.f32.mxu0 %v6186_v0  ;;  %3661 = vmatprep.mubr.f32.mxu1 %v6186_v0 }
 0xbd0   :  { %5341 = vmatpush1.bf16.msra.mxu0 %v6894_v23  ;;  %5373 = vmatpush1.bf16.msra.mxu1 %v6897_v63 }
 0xbd1   :  { %5343 = vmatprep.subr.bf16.mxu0 %v6902_v42  ;;  %5375 = vmatprep.subr.bf16.mxu1 %v6904_v10 }
 0xbd4   :  { %5345 = vmatpush1.bf16.msra.mxu0 %v6906_v19  ;;  %5377 = vmatpush1.bf16.msra.mxu1 %v6909_v54 }
 0xbd5   :  { %5347 = vmatprep.subr.bf16.mxu0 %v6914_v33  ;;  %5379 = vmatprep.subr.bf16.mxu1 %v6916_v16 }
 0xbd8   :  { %5349 = vmatpush1.bf16.msra.mxu0 %v6918_v36  ;;  %5381 = vmatpush1.bf16.msra.mxu1 %v6921_v17 }
 0xbd9   :  { %5351 = vmatprep.subr.bf16.mxu0 %v6925_v12  ;;  %5383 = vmatprep.subr.bf16.mxu1 %v6927_v39 }
 0xbdc   :  { %5353 = vmatpush1.bf16.msra.mxu0 %v6930_v62  ;;  %5385 = vmatpush1.bf16.msra.mxu1 %v6934_v28 }
 0xbdd   :  { %5355 = vmatprep.subr.bf16.mxu0 %v6936_v60  ;;  %5387 = vmatprep.subr.bf16.mxu1 %v6938_v11 }
 0xbe0   :  { %5357 = vmatpush1.bf16.msra.mxu0 %v6941_v41  ;;  %5389 = vmatpush1.bf16.msra.mxu1 %v6945_v6 }
 0xbe1   :  { %5359 = vmatprep.subr.bf16.mxu0 %v6947_v32  ;;  %5391 = vmatprep.subr.bf16.mxu1 %v6950_v21 }
 0xbe4   :  { %5361 = vmatpush1.bf16.msra.mxu0 %v6953_v8  ;;  %5393 = vmatpush1.bf16.msra.mxu1 %v6957_v40 }
 0xbe5   :  { %5363 = vmatprep.subr.bf16.mxu0 %v6962_v29  ;;  %5395 = vmatprep.subr.bf16.mxu1 %v6964_v58 }
 0xbe8   :  { %5365 = vmatpush1.bf16.msra.mxu0 %v6966_v45  ;;  %5397 = vmatpush1.bf16.msra.mxu1 %v6969_v53 }
 0xbe9   :  { %5399 = vmatprep.subr.bf16.mxu0 %v6878_v3  ;;  %5431 = vmatprep.subr.bf16.mxu1 %v6880_v14 }
 0xc9e   :  { %v3418_v30 = vpop.f32.mrb[22].mxu0  ;;  %v3489_v55 = vpop.f32.mrb[22].mxu1 }
 0xc9f   :  { %v5652_v51 = vadd.f32 %v3418_v30, %v7024_v50  ;;  %v3420_v44 = vpop.f32.mrb[23].mxu0  ;;  %v3491_v57 = vpop.f32.mrb[23].mxu1  ;;  %v5668_v22 = vadd.f32 %v3489_v55, %v7039_v34 }
 0xca0   :  { %v5653_v56 = vadd.f32 %v3420_v44, %v7028_v26  ;;  %v5669_v48 = vadd.f32 %v3491_v57, %v7034_v43 }
 0xca1   :  { %v4370_v49 = vmul.f32 -1.442695, %v5652_v51 }
 0xca2   :  { %v4371_v2 = vmul.f32 -1.442695, %v5653_v56  ;;  %v4372_v4 = vmul.f32 -1.442695, %v5669_v48 }
 0xca3   :  { %5932 = vpow2.f32 %v4370_v49 }
 0xca4   :  { %5934 = vpow2.f32 %v4371_v2 }
 0xca5   :  { %5936 = vpow2.f32 %v4372_v4 }
 0xca6   :  { %5938 = vtanh.f32 %v5668_v22 }
 0xcad   :  { %v5933_v31 = vpop.eup %5932 }
 0xcae   :  { %v5935_v1 = vpop.eup %5934  ;;  %v3501_v9 = vadd.f32 1.0, %v5933_v31 }
 0xcaf   :  { %v3507_v15 = vadd.f32 1.0, %v5935_v1  ;;  %v5937_v35 = vpop.eup %5936 }
 0xcb0   :  { %5940 = vrcp.f32 %v3501_v9  ;;  %v5939_v5 = vpop.eup %5938  ;;  %v3514_v24 = vadd.f32 1.0, %v5937_v35 }
 0xcb1   :  { %5942 = vrcp.f32 %v3507_v15 }
 0xcb2   :  { %5944 = vrcp.f32 %v3514_v24 }
 0xcba   :  { %v5941_v38 = vpop.eup %5940 }
 0xcbb   :  { %v5943_v37 = vpop.eup %5942  ;;  %v3518_v7 = vmul.f32 %v5941_v38, %v5939_v5 }
 0xcbc   :  { %v3517_v20 = vmul.f32 %v5943_v37, %v7126_v52  ;;  %v5945_v59 = vpop.eup %5944 }
 0xcbe   :  { %v7168_v27 = vadd.f32 %v3518_v7, %v3517_v20 }
 0xcc0   :  { %5946 = vtanh.f32 %v7168_v27 }
 0xcca   :  { %v5947_v47 = vpop.eup %5946 }
 0xccb   :  { %v3521_v61 = vmul.f32 %v5947_v47, %v5945_v59 }
 0xccd   :  { %3591 = vmatmul.mubr.f32.vlgmr.msra.gmra.mrb[24].mxu0 %v3521_v61  ;;  %3662 = vmatmul.mubr.f32.vlgmr.msra.gmra.mrb[24].mxu1 %v3521_v61 }
 0xcce   :  { %5401 = vmatpush1.bf16.msra.mxu0 %v6882_v18  ;;  %5433 = vmatpush1.bf16.msra.mxu1 %v6885_v13 }
 0xccf   :  { %5403 = vmatprep.subr.bf16.mxu0 %v6890_v46  ;;  %5435 = vmatprep.subr.bf16.mxu1 %v6892_v25 }
 0xcd0   :  { %3764 = vmatprep.mubr.f32.mxu0 %v6186_v0  ;;  %3835 = vmatprep.mubr.f32.mxu1 %v6186_v0 }
 0xcd2   :  { %5405 = vmatpush1.bf16.msra.mxu0 %v6894_v23  ;;  %5437 = vmatpush1.bf16.msra.mxu1 %v6897_v63 }
 0xcd3   :  { %5407 = vmatprep.subr.bf16.mxu0 %v6902_v42  ;;  %5439 = vmatprep.subr.bf16.mxu1 %v6904_v10 }
 0xcd6   :  { %5409 = vmatpush1.bf16.msra.mxu0 %v6906_v19  ;;  %5441 = vmatpush1.bf16.msra.mxu1 %v6909_v54 }
 0xcd7   :  { %5411 = vmatprep.subr.bf16.mxu0 %v6914_v33  ;;  %5443 = vmatprep.subr.bf16.mxu1 %v6916_v16 }
 0xcda   :  { %5413 = vmatpush1.bf16.msra.mxu0 %v6918_v36  ;;  %5445 = vmatpush1.bf16.msra.mxu1 %v6921_v17 }
 0xcdb   :  { %5415 = vmatprep.subr.bf16.mxu0 %v6925_v12  ;;  %5447 = vmatprep.subr.bf16.mxu1 %v6927_v39 }
 0xcde   :  { %5417 = vmatpush1.bf16.msra.mxu0 %v6930_v62  ;;  %5449 = vmatpush1.bf16.msra.mxu1 %v6934_v28 }
 0xcdf   :  { %5419 = vmatprep.subr.bf16.mxu0 %v6936_v60  ;;  %5451 = vmatprep.subr.bf16.mxu1 %v6938_v11 }
 0xce2   :  { %5421 = vmatpush1.bf16.msra.mxu0 %v6941_v41  ;;  %5453 = vmatpush1.bf16.msra.mxu1 %v6945_v6 }
 0xce3   :  { %5423 = vmatprep.subr.bf16.mxu0 %v6947_v32  ;;  %5455 = vmatprep.subr.bf16.mxu1 %v6950_v21 }
 0xce6   :  { %5425 = vmatpush1.bf16.msra.mxu0 %v6953_v8  ;;  %5457 = vmatpush1.bf16.msra.mxu1 %v6957_v40 }
 0xce7   :  { %5427 = vmatprep.subr.bf16.mxu0 %v6962_v29  ;;  %5459 = vmatprep.subr.bf16.mxu1 %v6964_v58 }
 0xcea   :  { %5429 = vmatpush1.bf16.msra.mxu0 %v6966_v45  ;;  %5461 = vmatpush1.bf16.msra.mxu1 %v6969_v53 }
 0xceb   :  { %5463 = vmatprep.subr.bf16.mxu0 %v6878_v3  ;;  %5495 = vmatprep.subr.bf16.mxu1 %v6880_v14 }
 0xda0   :  { %v3592_v52 = vpop.f32.mrb[24].mxu0  ;;  %v3663_v30 = vpop.f32.mrb[24].mxu1 }
 0xda1   :  { %v5654_v55 = vadd.f32 %v3592_v52, %v7024_v50  ;;  %v3594_v51 = vpop.f32.mrb[25].mxu0  ;;  %v3665_v44 = vpop.f32.mrb[25].mxu1  ;;  %v5670_v4 = vadd.f32 %v3663_v30, %v7039_v34 }
 0xda2   :  { %v5655_v57 = vadd.f32 %v3594_v51, %v7028_v26  ;;  %v5671_v2 = vadd.f32 %v3665_v44, %v7034_v43 }
 0xda3   :  { %v4373_v56 = vmul.f32 -1.442695, %v5654_v55 }
 0xda4   :  { %v4374_v49 = vmul.f32 -1.442695, %v5655_v57  ;;  %v4375_v48 = vmul.f32 -1.442695, %v5671_v2 }
 0xda5   :  { %5948 = vpow2.f32 %v4373_v56 }
 0xda6   :  { %5950 = vpow2.f32 %v4374_v49 }
 0xda7   :  { %5952 = vpow2.f32 %v4375_v48 }
 0xda8   :  { %5954 = vtanh.f32 %v5670_v4 }
 0xdaf   :  { %v5949_v22 = vpop.eup %5948 }
 0xdb0   :  { %v5951_v31 = vpop.eup %5950  ;;  %v3675_v1 = vadd.f32 1.0, %v5949_v22 }
 0xdb1   :  { %v3681_v9 = vadd.f32 1.0, %v5951_v31  ;;  %v5953_v15 = vpop.eup %5952 }
 0xdb2   :  { %5956 = vrcp.f32 %v3675_v1  ;;  %v5955_v35 = vpop.eup %5954  ;;  %v3688_v7 = vadd.f32 1.0, %v5953_v15 }
 0xdb3   :  { %5958 = vrcp.f32 %v3681_v9 }
 0xdb4   :  { %5960 = vrcp.f32 %v3688_v7 }
 0xdbc   :  { %v5957_v5 = vpop.eup %5956 }
 0xdbd   :  { %v5959_v38 = vpop.eup %5958  ;;  %v3692_v37 = vmul.f32 %v5957_v5, %v5955_v35 }
 0xdbe   :  { %v3691_v24 = vmul.f32 %v5959_v38, %v7168_v27  ;;  %v5961_v59 = vpop.eup %5960 }
 0xdc0   :  { %v7210_v20 = vadd.f32 %v3692_v37, %v3691_v24 }
 0xdc2   :  { %5962 = vtanh.f32 %v7210_v20 }
 0xdcc   :  { %v5963_v47 = vpop.eup %5962 }
 0xdcd   :  { %v3695_v61 = vmul.f32 %v5963_v47, %v5961_v59  ;;  %v4221_v47 = vld [vmem:[#allocation13 + $0x18] sm:$0xff] }
 0xdcf   :  { %3765 = vmatmul.mubr.f32.vlgmr.msra.gmra.mrb[26].mxu0 %v3695_v61  ;;  %3836 = vmatmul.mubr.f32.vlgmr.msra.gmra.mrb[26].mxu1 %v3695_v61 }
 0xdd0   :  { %5465 = vmatpush1.bf16.msra.mxu0 %v6882_v18  ;;  %5497 = vmatpush1.bf16.msra.mxu1 %v6885_v13 }
 0xdd1   :  { %5467 = vmatprep.subr.bf16.mxu0 %v6890_v46  ;;  %5499 = vmatprep.subr.bf16.mxu1 %v6892_v25 }
 0xdd2   :  { %3938 = vmatprep.mubr.f32.mxu0 %v6186_v0  ;;  %4009 = vmatprep.mubr.f32.mxu1 %v6186_v0 }
 0xdd4   :  { %5469 = vmatpush1.bf16.msra.mxu0 %v6894_v23  ;;  %5501 = vmatpush1.bf16.msra.mxu1 %v6897_v63 }
 0xdd5   :  { %5471 = vmatprep.subr.bf16.mxu0 %v6902_v42  ;;  %5503 = vmatprep.subr.bf16.mxu1 %v6904_v10 }
 0xdd8   :  { %5473 = vmatpush1.bf16.msra.mxu0 %v6906_v19  ;;  %5505 = vmatpush1.bf16.msra.mxu1 %v6909_v54 }
 0xdd9   :  { %5475 = vmatprep.subr.bf16.mxu0 %v6914_v33  ;;  %5507 = vmatprep.subr.bf16.mxu1 %v6916_v16 }
 0xddc   :  { %5477 = vmatpush1.bf16.msra.mxu0 %v6918_v36  ;;  %5509 = vmatpush1.bf16.msra.mxu1 %v6921_v17 }
 0xddd   :  { %5479 = vmatprep.subr.bf16.mxu0 %v6925_v12  ;;  %5511 = vmatprep.subr.bf16.mxu1 %v6927_v39 }
 0xde0   :  { %5481 = vmatpush1.bf16.msra.mxu0 %v6930_v62  ;;  %5513 = vmatpush1.bf16.msra.mxu1 %v6934_v28 }
 0xde1   :  { %5483 = vmatprep.subr.bf16.mxu0 %v6936_v60  ;;  %5515 = vmatprep.subr.bf16.mxu1 %v6938_v11 }
 0xde4   :  { %5485 = vmatpush1.bf16.msra.mxu0 %v6941_v41  ;;  %5517 = vmatpush1.bf16.msra.mxu1 %v6945_v6 }
 0xde5   :  { %5487 = vmatprep.subr.bf16.mxu0 %v6947_v32  ;;  %5519 = vmatprep.subr.bf16.mxu1 %v6950_v21 }
 0xde8   :  { %5489 = vmatpush1.bf16.msra.mxu0 %v6953_v8  ;;  %5521 = vmatpush1.bf16.msra.mxu1 %v6957_v40 }
 0xde9   :  { %5491 = vmatprep.subr.bf16.mxu0 %v6962_v29  ;;  %5523 = vmatprep.subr.bf16.mxu1 %v6964_v58 }
 0xdec   :  { %5493 = vmatpush1.bf16.msra.mxu0 %v6966_v45  ;;  %5525 = vmatpush1.bf16.msra.mxu1 %v6969_v53 }
 0xded   :  { %5527 = vmatprep.subr.bf16.mxu0 %v6878_v3  ;;  %5559 = vmatprep.subr.bf16.mxu1 %v6880_v14 }
 0xea2   :  { %v3766_v27 = vpop.f32.mrb[26].mxu0  ;;  %v3837_v52 = vpop.f32.mrb[26].mxu1 }
 0xea3   :  { %v5656_v30 = vadd.f32 %v3766_v27, %v7024_v50  ;;  %v3768_v55 = vpop.f32.mrb[27].mxu0  ;;  %v3839_v51 = vpop.f32.mrb[27].mxu1  ;;  %v5672_v48 = vadd.f32 %v3837_v52, %v7039_v34  ;;  %v4222_v27 = vld [vmem:[#allocation13 + $0x20] sm:$0xff]  ;;  %v4223_v52 = vld [vmem:[#allocation13 + $0x28] sm:$0xff] }
 0xea4   :  { %v5657_v44 = vadd.f32 %v3768_v55, %v7028_v26  ;;  %v5673_v49 = vadd.f32 %v3839_v51, %v7034_v43  ;;  %v4224_v55 = vld [vmem:[#allocation13 + $0x30] sm:$0xff]  ;;  %v4225_v51 = vld [vmem:[#allocation13 + $0x38] sm:$0xff] }
 0xea5   :  { %v4376_v57 = vmul.f32 -1.442695, %v5656_v30  ;;  %v5597_v30 = vpack.c.bf16 %v4223_v52, %v4222_v27 }
 0xea6   :  { %v4377_v56 = vmul.f32 -1.442695, %v5657_v44  ;;  %v4378_v2 = vmul.f32 -1.442695, %v5673_v49  ;;  %v5600_v44 = vpack.c.bf16 %v4225_v51, %v4224_v55 }
 0xea7   :  { %5964 = vpow2.f32 %v4376_v57  ;;  %v4226_v57 = vld [vmem:[#allocation13 + $0x40] sm:$0xff] }
 0xea8   :  { %5966 = vpow2.f32 %v4377_v56  ;;  %v4227_v56 = vld [vmem:[#allocation13 + $0x48] sm:$0xff] }
 0xea9   :  { %5968 = vpow2.f32 %v4378_v2  ;;  %v5603_v49 = vpack.c.bf16 %v4227_v56, %v4226_v57  ;;  %v4228_v2 = vld [vmem:[#allocation13 + $0x50] sm:$0xff] }
 0xeaa   :  { %5970 = vtanh.f32 %v5672_v48  ;;  %v4229_v48 = vld [vmem:[#allocation13 + $0x58] sm:$0xff] }
 0xeb1   :  { %v5965_v3 = vpop.eup %5964 }
 0xeb2   :  { %v5967_v4 = vpop.eup %5966  ;;  %v3849_v14 = vadd.f32 1.0, %v5965_v3  ;;  %v4230_v3 = vld [vmem:[#allocation13 + $0x60] sm:$0xff] }
 0xeb3   :  { %v3855_v22 = vadd.f32 1.0, %v5967_v4  ;;  %v5969_v31 = vpop.eup %5968  ;;  %v5606_v4 = vpack.c.bf16 %v4229_v48, %v4228_v2 }
 0xeb4   :  { %5972 = vrcp.f32 %v3849_v14  ;;  %v5971_v1 = vpop.eup %5970  ;;  %v3862_v5 = vadd.f32 1.0, %v5969_v31  ;;  %v4231_v14 = vld [vmem:[#allocation13 + $0x68] sm:$0xff]  ;;  %v4232_v31 = vld [vmem:[#allocation13 + $0x70] sm:$0xff] }
 0xeb5   :  { %5974 = vrcp.f32 %v3855_v22  ;;  %v5609_v22 = vpack.c.bf16 %v4231_v14, %v4230_v3 }
 0xeb6   :  { %5976 = vrcp.f32 %v3862_v5 }
 0xebe   :  { %v5973_v9 = vpop.eup %5972 }
 0xebf   :  { %v5975_v15 = vpop.eup %5974  ;;  %v3866_v35 = vmul.f32 %v5973_v9, %v5971_v1  ;;  %v4233_v1 = vld [vmem:[#allocation13 + $0x78] sm:$0xff] }
 0xec0   :  { %v3865_v38 = vmul.f32 %v5975_v15, %v7210_v20  ;;  %v5977_v7 = vpop.eup %5976  ;;  %v4220_v20 = vld [vmem:[#allocation13 + $0x10] sm:$0xff]  ;;  %v5612_v9 = vpack.c.bf16 %v4233_v1, %v4232_v31 }
 0xec1   :  { %v5594_v61 = vpack.c.bf16 %v4221_v47, %v4220_v20 }
 0xec2   :  { %v7252_v37 = vadd.f32 %v3866_v35, %v3865_v38 }
 0xec4   :  { %5978 = vtanh.f32 %v7252_v37 }
 0xece   :  { %v5979_v24 = vpop.eup %5978 }
 0xecf   :  { %v3869_v59 = vmul.f32 %v5979_v24, %v5977_v7 }
 0xed1   :  { %3939 = vmatmul.mubr.f32.vlgmr.msra.gmra.mrb[28].mxu0 %v3869_v59  ;;  %4010 = vmatmul.mubr.f32.vlgmr.msra.gmra.mrb[28].mxu1 %v3869_v59 }
 0xed2   :  { %5529 = vmatpush1.bf16.msra.mxu0 %v6882_v18  ;;  %5561 = vmatpush1.bf16.msra.mxu1 %v6885_v13 }
 0xed3   :  { %5531 = vmatprep.subr.bf16.mxu0 %v6890_v46  ;;  %5563 = vmatprep.subr.bf16.mxu1 %v6892_v25 }
 0xed4   :  { %4112 = vmatprep.mubr.f32.mxu0 %v6186_v0  ;;  %4183 = vmatprep.mubr.f32.mxu1 %v6186_v0 }
 0xed6   :  { %5533 = vmatpush1.bf16.msra.mxu0 %v6894_v23  ;;  %5565 = vmatpush1.bf16.msra.mxu1 %v6897_v63 }
 0xed7   :  { %5535 = vmatprep.subr.bf16.mxu0 %v6902_v42  ;;  %5567 = vmatprep.subr.bf16.mxu1 %v6904_v10 }
 0xeda   :  { %5537 = vmatpush1.bf16.msra.mxu0 %v6906_v19  ;;  %5569 = vmatpush1.bf16.msra.mxu1 %v6909_v54 }
 0xedb   :  { %5539 = vmatprep.subr.bf16.mxu0 %v6914_v33  ;;  %5571 = vmatprep.subr.bf16.mxu1 %v6916_v16 }
 0xede   :  { %5541 = vmatpush1.bf16.msra.mxu0 %v6918_v36  ;;  %5573 = vmatpush1.bf16.msra.mxu1 %v6921_v17 }
 0xedf   :  { %5543 = vmatprep.subr.bf16.mxu0 %v6925_v12  ;;  %5575 = vmatprep.subr.bf16.mxu1 %v6927_v39 }
 0xee2   :  { %5545 = vmatpush1.bf16.msra.mxu0 %v6930_v62  ;;  %5577 = vmatpush1.bf16.msra.mxu1 %v6934_v28 }
 0xee3   :  { %5547 = vmatprep.subr.bf16.mxu0 %v6936_v60  ;;  %5579 = vmatprep.subr.bf16.mxu1 %v6938_v11 }
 0xee6   :  { %5549 = vmatpush1.bf16.msra.mxu0 %v6941_v41  ;;  %5581 = vmatpush1.bf16.msra.mxu1 %v6945_v6 }
 0xee7   :  { %5551 = vmatprep.subr.bf16.mxu0 %v6947_v32  ;;  %5583 = vmatprep.subr.bf16.mxu1 %v6950_v21 }
 0xeea   :  { %5553 = vmatpush1.bf16.msra.mxu0 %v6953_v8  ;;  %5585 = vmatpush1.bf16.msra.mxu1 %v6957_v40 }
 0xeeb   :  { %5555 = vmatprep.subr.bf16.mxu0 %v6962_v29  ;;  %5587 = vmatprep.subr.bf16.mxu1 %v6964_v58  ;;  %v4218_v29 = vld [vmem:[#allocation13] sm:$0xff]  ;;  %v4219_v58 = vld [vmem:[#allocation13 + $0x8] sm:$0xff] }
 0xeee   :  { %5557 = vmatpush1.bf16.msra.mxu0 %v6966_v45  ;;  %5589 = vmatpush1.bf16.msra.mxu1 %v6969_v53  ;;  %v5591_v45 = vpack.c.bf16 %v4219_v58, %v4218_v29  ;;  %v6187_v53 = vmov 0.0|0.0  }
 0xeef   :  { %5590 = vmatprep.subr.bf16.mxu0 %v6187_v53 }
 0xfa4   :  { %v3940_v18 = vpop.f32.mrb[28].mxu0  ;;  %v4011_v13 = vpop.f32.mrb[28].mxu1 }
 0xfa5   :  { %v5658_v46 = vadd.f32 %v3940_v18, %v7024_v50  ;;  %v3942_v25 = vpop.f32.mrb[29].mxu0  ;;  %v4013_v23 = vpop.f32.mrb[29].mxu1  ;;  %v5674_v33 = vadd.f32 %v4011_v13, %v7039_v34 }
 0xfa6   :  { %v5659_v63 = vadd.f32 %v3942_v25, %v7028_v26  ;;  %v5675_v19 = vadd.f32 %v4013_v23, %v7034_v43 }
 0xfa7   :  { %v4379_v42 = vmul.f32 -1.442695, %v5658_v46 }
 0xfa8   :  { %v4380_v10 = vmul.f32 -1.442695, %v5659_v63  ;;  %v4381_v54 = vmul.f32 -1.442695, %v5675_v19 }
 0xfa9   :  { %5980 = vpow2.f32 %v4379_v42 }
 0xfaa   :  { %5982 = vpow2.f32 %v4380_v10 }
 0xfab   :  { %5984 = vpow2.f32 %v4381_v54 }
 0xfac   :  { %5986 = vtanh.f32 %v5674_v33 }
 0xfb3   :  { %v5981_v16 = vpop.eup %5980 }
 0xfb4   :  { %v5983_v36 = vpop.eup %5982  ;;  %v4023_v17 = vadd.f32 1.0, %v5981_v16 }
 0xfb5   :  { %v4029_v12 = vadd.f32 1.0, %v5983_v36  ;;  %v5985_v39 = vpop.eup %5984 }
 0xfb6   :  { %5988 = vrcp.f32 %v4023_v17  ;;  %v5987_v62 = vpop.eup %5986  ;;  %v4036_v41 = vadd.f32 1.0, %v5985_v39  ;;  %v4385_v17 = vld [vmem:[%s7324_s8] ss:$0 sm:$0xff] }
 0xfb7   :  { %5990 = vrcp.f32 %v4029_v12 }
 0xfb8   :  { %5992 = vrcp.f32 %v4036_v41 }
 0xfc0   :  { %v5989_v28 = vpop.eup %5988 }
 0xfc1   :  { %v5991_v60 = vpop.eup %5990  ;;  %v4040_v11 = vmul.f32 %v5989_v28, %v5987_v62 }
 0xfc2   :  { %v4039_v6 = vmul.f32 %v5991_v60, %v7252_v37  ;;  %v5993_v21 = vpop.eup %5992 }
 0xfc4   :  { %v7292_v32 = vadd.f32 %v4040_v11, %v4039_v6 }
 0xfc6   :  { %5994 = vtanh.f32 %v7292_v32 }
 0xfd0   :  { %v5995_v8 = vpop.eup %5994 }
 0xfd1   :  { %v4043_v40 = vmul.f32 %v5995_v8, %v5993_v21 }
 0xfd3   :  { %4113 = vmatmul.mubr.f32.vlgmr.msra.gmra.mrb[30].mxu0 %v4043_v40  ;;  %4184 = vmatmul.mubr.f32.vlgmr.msra.gmra.mrb[30].mxu1 %v4043_v40 }
 0xfd4   :  { %5592 = vmatpush3.bf16.msra.mxu0 %v5591_v45  ;;  %4435 = vmatprep.mubr.msk.f32.mxu0 %vm6188_vm0, %v6186_v0 }
 0xfd5   :  { %5593 = vmatprep.subr.bf16.mxu0 %v6187_v53 }
 0xfd8   :  { %5595 = vmatpush3.bf16.msra.mxu0 %v5594_v61 }
 0xfd9   :  { %5596 = vmatprep.subr.bf16.mxu0 %v6187_v53 }
 0xfdc   :  { %5598 = vmatpush3.bf16.msra.mxu0 %v5597_v30 }
 0xfdd   :  { %5599 = vmatprep.subr.bf16.mxu0 %v6187_v53 }
 0xfe0   :  { %5601 = vmatpush3.bf16.msra.mxu0 %v5600_v44 }
 0xfe1   :  { %5602 = vmatprep.subr.bf16.mxu0 %v6187_v53 }
 0xfe4   :  { %5604 = vmatpush3.bf16.msra.mxu0 %v5603_v49 }
 0xfe5   :  { %5605 = vmatprep.subr.bf16.mxu0 %v6187_v53 }
 0xfe8   :  { %5607 = vmatpush3.bf16.msra.mxu0 %v5606_v4 }
 0xfe9   :  { %5608 = vmatprep.subr.bf16.mxu0 %v6187_v53 }
 0xfec   :  { %5610 = vmatpush3.bf16.msra.mxu0 %v5609_v22 }
 0xfed   :  { %5611 = vmatprep.subr.bf16.mxu0 %v6187_v53 }
 0xff0   :  { %5613 = vmatpush3.bf16.msra.mxu0 %v5612_v9 }
0x10a6   :  { %v4114_v15 = vpop.f32.mrb[30].mxu0  ;;  %v4185_v35 = vpop.f32.mrb[30].mxu1 }
0x10a7   :  { %v5660_v5 = vadd.f32 %v4114_v15, %v7024_v50  ;;  %v4116_v38 = vpop.f32.mrb[31].mxu0  ;;  %v4187_v37 = vpop.f32.mrb[31].mxu1  ;;  %v5676_v13 = vadd.f32 %v4185_v35, %v7039_v34 }
0x10a8   :  { %v5661_v7 = vadd.f32 %v4116_v38, %v7028_v26  ;;  %v5677_v0 = vadd.f32 %v4187_v37, %v7034_v43 }
0x10a9   :  { %v4382_v24 = vmul.f32 -1.442695, %v5660_v5 }
0x10aa   :  { %v4383_v59 = vmul.f32 -1.442695, %v5661_v7  ;;  %v4384_v18 = vmul.f32 -1.442695, %v5677_v0 }
0x10ab   :  { %5996 = vpow2.f32 %v4382_v24 }
0x10ac   :  { %5998 = vpow2.f32 %v4383_v59 }
0x10ad   :  { %6000 = vpow2.f32 %v4384_v18 }
0x10ae   :  { %6002 = vtanh.f32 %v5676_v13 }
0x10b5   :  { %v5997_v46 = vpop.eup %5996 }
0x10b6   :  { %v5999_v25 = vpop.eup %5998  ;;  %v4197_v23 = vadd.f32 1.0, %v5997_v46 }
0x10b7   :  { %v4203_v63 = vadd.f32 1.0, %v5999_v25  ;;  %v6001_v50 = vpop.eup %6000 }
0x10b8   :  { %6004 = vrcp.f32 %v4197_v23  ;;  %v6003_v42 = vpop.eup %6002  ;;  %v4210_v54 = vadd.f32 1.0, %v6001_v50 }
0x10b9   :  { %6006 = vrcp.f32 %v4203_v63 }
0x10ba   :  { %6008 = vrcp.f32 %v4210_v54 }
0x10c2   :  { %v6005_v26 = vpop.eup %6004 }
0x10c3   :  { %v6007_v10 = vpop.eup %6006  ;;  %v4214_v19 = vmul.f32 %v6005_v26, %v6003_v42 }
0x10c4   :  { %v4213_v33 = vmul.f32 %v6007_v10, %v7292_v32  ;;  %v6009_v34 = vpop.eup %6008 }
0x10c6   :  { %v4215_v43 = vadd.f32 %v4214_v19, %v4213_v33 }
0x10c8   :  { %6010 = vtanh.f32 %v4215_v43 }
0x10d2   :  { %v6011_v16 = vpop.eup %6010 }
0x10d3   :  { %v4217_v36 = vmul.f32 %v6011_v16, %v6009_v34 }
0x10d5   :  { %4436 = vmatmul.mubr.f32.vlgmr.msra.gmra.mrb[32].mxu0 %v4217_v36 }
0x11a8   :  { %v4307_v12 = vpop.f32.mrb[32].mxu0 }
0x11a9   :  { %v4308_v39 = vadd.f32 %v4385_v17, %v4307_v12  ;;  %v4437_v62 = vpop.f32.mrb[33].mxu0 }
0x11ab   :  { %4311 = vst [vmem:[#allocation15] sm:$0xff] %v4308_v39 }
0x11ac   :  { %6155 = shalt.err (!%p6152_p10)
}
0x11ad   :  { %s6156_s27 = scalar_lea.hbm %s7325_s9, 128 }
0x11ae   :  { %p6157_p11 = scmp.ne.s32.totalorder %s7325_s9, %s6156_s27  ;;  %p6160_p12 = scmp.lt.u32.totalorder %s6156_s27, %s7325_s9 }
0x11b0   :  { %p6162_p13 = pnand %p6160_p12, %p6157_p11 }
0x11b2   :  { %6165 = shalt.err (!%p6162_p13)
}
0x11b3   :  { %4321 = dma.vmem_to_hbm [thread:$0]  %s4319_s21, 128, %s7325_s9, [#allocation6]  }
0x11b4   :  { %6174 = dma.done.wait [#allocation6], 128  }
0x11b5   :  { %6175 = vsyncadd [#allocation6], 4294967168 }
0x11b6   :  { %4325 = vsyncpa [#allocation5], 1 }
0x11b7   :  { %4326 = vsyncpa [#allocation8], 1 }
0x11b8   :  { %4327 = vsyncpa [#allocation11], 1 }
0x11b9   :  { %4328 = vsyncpa [#allocation14], 1 }
0x11ba   :  { %4329 = vsyncpa [#allocation6], 1 }

</bundles_post_ra>
